<compile_context>
chip_gen: v7x
topology: tpu7x:2x2x1
jax: 0.10.0
libtpu: 0.0.40
codegen_flags: <defaults>
</compile_context>

<pallas_src>
import math
import functools

import jax
import jax.numpy as jnp
from jax.experimental import pallas as pl
from jax.experimental.pallas import tpu as pltpu

F32_MIN = float(jnp.finfo(jnp.float32).min)
NEG_BIG = -1e30  # finite large-negative additive mask bias (F32_MIN/-inf would NaN fully-masked rows)


def _softmax_exp_dtype():
    """bf16 exp on chips whose VPU/EUP support bf16 (v6e/v7x); f32 elsewhere (v5e etc.)."""
    try:
        kind = jax.devices()[0].device_kind.lower()
    except Exception:
        return jnp.float32
    if "v6" in kind or "v7" in kind:
        return jnp.bfloat16
    return jnp.float32


def _mha_kernel(n_head, d_k, batch_block, exp_dtype,
                q_ref, k_ref, v_ref, mask_ref, w_ref, b_ref,
                out_ref, x_scratch):
    """batch_block batch rows per grid step.

    q_ref/k_ref/v_ref : (bb, T, F) f32
    mask_ref          : (bb, 1, T) f32 (nonzero keep, 0.0 masked)
    w_ref             : (4, F, F) bf16  [Wq*scale, Wk, Wv, Wo], pre-transposed for x @ W
    b_ref             : (4, 1, F) f32   [bq*scale, bk, bv, bo]
    out_ref           : (bb, T, F) f32
    x_scratch         : (T, F) bf16 VMEM slab of per-head contexts (fully rewritten per row)
    """
    wq, wk, wv, wo = w_ref[0], w_ref[1], w_ref[2], w_ref[3]     # (F, F) bf16 each
    bq, bk, bv, bo = b_ref[0], b_ref[1], b_ref[2], b_ref[3]     # (1, F) f32 each

    for bi in range(batch_block):                               # static small unroll
        query = q_ref[bi].astype(jnp.bfloat16)                  # (T, F)
        key = k_ref[bi].astype(jnp.bfloat16)
        value = v_ref[bi].astype(jnp.bfloat16)

        # Mask-derived vectors hoisted out of the head loop (JAX does not CSE broadcasts).
        neg_bias = jnp.where(mask_ref[bi] == 0.0, NEG_BIG, 0.0)                  # (1, T) f32
        # 0.0 iff every key position is masked -> reference yields x == 0 for such rows.
        row_keep = (jnp.max(neg_bias, axis=-1, keepdims=True) == 0.0).astype(jnp.float32)  # (1, 1)

        # Fused full-width projections (lane-dense MXU, bf16 in, f32 accumulate).
        # 1/sqrt(d_k) is already folded into wq / bq by the wrapper.
        q_all = (jnp.dot(query, wq, preferred_element_type=jnp.float32) + bq).astype(jnp.bfloat16)
        k_all = (jnp.dot(key, wk, preferred_element_type=jnp.float32) + bk).astype(jnp.bfloat16)
        v_all = (jnp.dot(value, wv, preferred_element_type=jnp.float32) + bv).astype(jnp.bfloat16)

        for h in range(n_head):                                 # n_head is small & static
            lo = h * d_k
            q_h = q_all[:, lo:lo + d_k]                         # (T, d_k) bf16
            k_h = k_all[:, lo:lo + d_k]
            v_h = v_all[:, lo:lo + d_k]
            # TODO(synk): for d_k < 128 these lane slices / the scratch column store below are not
            # 128-lane dense; head-pair packing would make them dense at the cost of extra relayouts.

            scores = jnp.einsum('td,sd->ts', q_h, k_h,
                                preferred_element_type=jnp.float32)              # (T, T) f32
            scores = scores + neg_bias        # masked keys ~ -1e30 -> exp underflows to exactly 0

            m = jnp.max(scores, axis=-1, keepdims=True)
            p = jnp.exp((scores - m).astype(exp_dtype))                          # (T, T)
            l = jnp.sum(p, axis=-1, keepdims=True, dtype=jnp.float32)            # (T, 1) f32, l >= 1
            # Defer 1/l to the (T, d_k) context instead of scaling the (T, T) attention matrix.
            inv_l = pl.reciprocal(l, approx=True) * row_keep                     # (T, 1) f32

            # TODO(synk): nn.Dropout on the attention weights omitted (inference / identity path).
            ctx = jnp.dot(p.astype(jnp.bfloat16), v_h,
                          preferred_element_type=jnp.float32)                    # (T, d_k) f32
            x_scratch[:, lo:lo + d_k] = (ctx * inv_l).astype(jnp.bfloat16)

        # Output projection: one full-width matmul over the concatenated heads (bf16 slab).
        out = jnp.dot(x_scratch[...], wo, preferred_element_type=jnp.float32) + bo
        out_ref[bi] = out.astype(out_ref.dtype)


def mha_pallas(query, key, value, mask, params, *, n_head, batch_block=None):
    """Pallas forward of MultiHeadedAttention. mask: (B,1,T) f32; pass all-ones for mask=None."""
    B, T, F = query.shape
    assert F % n_head == 0, "n_feat must be divisible by n_head (context slab is only then fully rewritten)"
    d_k = F // n_head
    assert mask.shape == (B, 1, T), "kernel supports the (batch, 1, time2) mask form"
    scale = 1.0 / math.sqrt(d_k)

    if batch_block is None:
        # Tiny shapes: amortize the ~0.35us per-grid-step overhead by packing the batch into one step.
        batch_block = B if T * F <= 128 * 128 else 1
    assert B % batch_block == 0
    grid = (B // batch_block,)
    # TODO(synk): for very long T on v7x (64 MiB VMEM), add a query-tile grid axis instead of full-T blocks.

    # torch nn.Linear computes y = x @ W.T + b (W is (out,in)); pre-transpose so kernel does x @ W.
    # Fold the 1/sqrt(d_k) score scale into the query projection (weights AND bias).
    wq = (params['Wq'].T * scale).astype(jnp.bfloat16)
    wk = params['Wk'].T.astype(jnp.bfloat16)
    wv = params['Wv'].T.astype(jnp.bfloat16)
    wo = params['Wo'].T.astype(jnp.bfloat16)
    w_all = jnp.stack([wq, wk, wv, wo], axis=0)                                  # (4, F, F) bf16
    b_all = jnp.stack([params['bq'] * scale, params['bk'],
                       params['bv'], params['bo']], axis=0)
    b_all = b_all.reshape(4, 1, F).astype(jnp.float32)                           # (4, 1, F) f32

    exp_dtype = _softmax_exp_dtype()
    kernel = functools.partial(_mha_kernel, n_head, d_k, batch_block, exp_dtype)

    # VMEM budget derived from actual buffer sizes (+50% headroom), not a hard-coded cap.
    f32b, bf16b = 4, 2
    io_bytes = 2 * (3 * batch_block * T * F * f32b      # q, k, v blocks (double-buffered)
                    + batch_block * T * f32b            # mask
                    + batch_block * T * F * f32b)       # out
    w_bytes = 2 * (4 * F * F * bf16b + 4 * F * f32b)    # conservative (as if double-buffered)
    scratch_bytes = T * F * bf16b
    transient = 3 * T * F * f32b + 3 * T * F * bf16b + 2 * T * T * f32b + T * F * f32b
    vmem_limit = int(1.5 * (io_bytes + w_bytes + scratch_bytes + transient))
    vmem_limit = min(max(vmem_limit, 16 * 1024 * 1024), 96 * 1024 * 1024)

    cost = pl.CostEstimate(
        flops=2 * B * (4 * T * F * F + 2 * n_head * T * T * d_k),
        transcendentals=B * n_head * T * T,
        bytes_accessed=4 * B * T * F * 4 + B * T * 4 + 4 * F * F * 2 + 4 * F * 4)

    def build(single_buffer_weights):
        # Grid-invariant weight/bias refs: single pipeline buffer (index_map is constant).
        w_kw = dict(pipeline_mode=pl.Buffered(1)) if single_buffer_weights else {}
        grid_spec = pltpu.PrefetchScalarGridSpec(
            num_scalar_prefetch=0,
            grid=grid,
            in_specs=[
                pl.BlockSpec((batch_block, T, F), lambda b: (b, 0, 0)),   # query
                pl.BlockSpec((batch_block, T, F), lambda b: (b, 0, 0)),   # key
                pl.BlockSpec((batch_block, T, F), lambda b: (b, 0, 0)),   # value
                pl.BlockSpec((batch_block, 1, T), lambda b: (b, 0, 0)),   # mask
                pl.BlockSpec((4, F, F), lambda b: (0, 0, 0), **w_kw),     # stacked weights (bf16)
                pl.BlockSpec((4, 1, F), lambda b: (0, 0, 0), **w_kw),     # stacked biases (f32)
            ],
            out_specs=pl.BlockSpec((batch_block, T, F), lambda b: (b, 0, 0)),
            scratch_shapes=[pltpu.VMEM((T, F), jnp.bfloat16)],
        )
        return pl.pallas_call(
            kernel,
            out_shape=jax.ShapeDtypeStruct((B, T, F), jnp.float32),
            grid_spec=grid_spec,
            compiler_params=pltpu.CompilerParams(
                dimension_semantics=("parallel",),
                vmem_limit_bytes=vmem_limit,
            ),
            cost_estimate=cost,
        )

    try:
        return build(True)(query, key, value, mask, w_all, b_all)
    except Exception:
        # Fallback for jax versions without BlockSpec pipeline_mode / Buffered(1) support.
        return build(False)(query, key, value, mask, w_all, b_all)


def mha_ref(query, key, value, mask, p, *, n_head):
    """Plain-JAX (f32) mirror of the PyTorch forward (dropout = identity, tags=None)."""
    B, T, F = query.shape
    d_k = F // n_head
    q = (query @ p['Wq'].T + p['bq']).reshape(B, T, n_head, d_k).transpose(0, 2, 1, 3)
    k = (key @ p['Wk'].T + p['bk']).reshape(B, T, n_head, d_k).transpose(0, 2, 1, 3)
    v = (value @ p['Wv'].T + p['bv']).reshape(B, T, n_head, d_k).transpose(0, 2, 1, 3)

    scores = jnp.einsum('bhtd,bhsd->bhts', q, k) / math.sqrt(d_k)
    masked = (mask == 0.0)[:, None, :, :]                                        # (B,1,1,T)
    scores = jnp.where(masked, F32_MIN, scores)
    attn = jax.nn.softmax(scores, axis=-1)
    attn = jnp.where(masked, 0.0, attn)
    x = jnp.einsum('bhts,bhsd->bhtd', attn, v).transpose(0, 2, 1, 3).reshape(B, T, F)
    return x @ p['Wo'].T + p['bo']


if __name__ == "__main__":
    B, T, n_feat, n_head = 2, 8, 32, 4

    key0 = jax.random.PRNGKey(0)
    keys = jax.random.split(key0, 12)

    def nrm(k, shape, scale=0.1):
        return scale * jax.random.normal(k, shape, dtype=jnp.float32)

    params = {
        'Wq': nrm(keys[0], (n_feat, n_feat)), 'bq': nrm(keys[1], (n_feat,)),
        'Wk': nrm(keys[2], (n_feat, n_feat)), 'bk': nrm(keys[3], (n_feat,)),
        'Wv': nrm(keys[4], (n_feat, n_feat)), 'bv': nrm(keys[5], (n_feat,)),
        'Wo': nrm(keys[6], (n_feat, n_feat)), 'bo': nrm(keys[7], (n_feat,)),
    }

    query = nrm(keys[8], (B, T, n_feat), 1.0)
    key_in = nrm(keys[9], (B, T, n_feat), 1.0)
    value = nrm(keys[10], (B, T, n_feat), 1.0)
    # (B, 1, T) mask: 1.0 = keep, 0.0 = masked (mask last two key positions of batch 1).
    mask = jnp.ones((B, 1, T), dtype=jnp.float32).at[1, 0, T - 2:].set(0.0)

    out = mha_pallas(query, key_in, value, mask, params, n_head=n_head)
    out = jax.block_until_ready(out)

    ref = jax.block_until_ready(
        mha_ref(query, key_in, value, mask, params, n_head=n_head))

    assert out.shape == (B, T, n_feat)
    assert jnp.allclose(out, ref, atol=2e-2, rtol=2e-2), \
        f"max abs err = {float(jnp.max(jnp.abs(out - ref)))}"

    print("KERNEL_OK")
</pallas_src>

<mosaic_0001>
module attributes {stable_mosaic.version = 11 : i64} {
  func.func @_mha_kernel(%arg0: i32, %arg1: memref<2x8x32xf32, #tpu.memory_space<vmem>>, %arg2: memref<2x8x32xf32, #tpu.memory_space<vmem>>, %arg3: memref<2x8x32xf32, #tpu.memory_space<vmem>>, %arg4: memref<2x1x8xf32, #tpu.memory_space<vmem>>, %arg5: memref<4x32x32xbf16, #tpu.memory_space<vmem>>, %arg6: memref<4x1x32xf32, #tpu.memory_space<vmem>>, %arg7: memref<2x8x32xf32, #tpu.memory_space<vmem>>, %arg8: memref<8x32xbf16, #tpu.memory_space<vmem>>) attributes {dimension_semantics = [#tpu.dimension_semantics<parallel>], iteration_bounds = array<i64: 1>, scalar_prefetch = 0 : i64, scratch_operands = 1 : i64, tpu.core_type = #tpu.core_type<tc>, window_params = [{transform_indices = @transform_0, window_bounds = array<i64: 2, 8, 32>}, {transform_indices = @transform_1, window_bounds = array<i64: 2, 8, 32>}, {transform_indices = @transform_2, window_bounds = array<i64: 2, 8, 32>}, {transform_indices = @transform_3, window_bounds = array<i64: 2, 1, 8>}, {pipeline_mode = #tpu.pipeline_mode<synchronous>, transform_indices = @transform_4, window_bounds = array<i64: 4, 32, 32>}, {pipeline_mode = #tpu.pipeline_mode<synchronous>, transform_indices = @transform_5, window_bounds = array<i64: 4, 1, 32>}, {transform_indices = @transform_6, window_bounds = array<i64: 2, 8, 32>}]} {
    %c0 = arith.constant 0 : index
    %c0_0 = arith.constant 0 : index
    %c0_1 = arith.constant 0 : index
    %0 = vector.load %arg5[%c0, %c0_0, %c0_1] : memref<4x32x32xbf16, #tpu.memory_space<vmem>>, vector<1x32x32xbf16>
    %1 = vector.shape_cast %0 : vector<1x32x32xbf16> to vector<32x32xbf16>
    %c1 = arith.constant 1 : index
    %c0_2 = arith.constant 0 : index
    %c0_3 = arith.constant 0 : index
    %2 = vector.load %arg5[%c1, %c0_2, %c0_3] : memref<4x32x32xbf16, #tpu.memory_space<vmem>>, vector<1x32x32xbf16>
    %3 = vector.shape_cast %2 : vector<1x32x32xbf16> to vector<32x32xbf16>
    %c2 = arith.constant 2 : index
    %c0_4 = arith.constant 0 : index
    %c0_5 = arith.constant 0 : index
    %4 = vector.load %arg5[%c2, %c0_4, %c0_5] : memref<4x32x32xbf16, #tpu.memory_space<vmem>>, vector<1x32x32xbf16>
    %5 = vector.shape_cast %4 : vector<1x32x32xbf16> to vector<32x32xbf16>
    %c3 = arith.constant 3 : index
    %c0_6 = arith.constant 0 : index
    %c0_7 = arith.constant 0 : index
    %6 = vector.load %arg5[%c3, %c0_6, %c0_7] : memref<4x32x32xbf16, #tpu.memory_space<vmem>>, vector<1x32x32xbf16>
    %7 = vector.shape_cast %6 : vector<1x32x32xbf16> to vector<32x32xbf16>
    %c0_8 = arith.constant 0 : index
    %c0_9 = arith.constant 0 : index
    %c0_10 = arith.constant 0 : index
    %8 = vector.load %arg6[%c0_8, %c0_9, %c0_10] : memref<4x1x32xf32, #tpu.memory_space<vmem>>, vector<1x1x32xf32>
    %9 = vector.shape_cast %8 : vector<1x1x32xf32> to vector<1x32xf32>
    %c1_11 = arith.constant 1 : index
    %c0_12 = arith.constant 0 : index
    %c0_13 = arith.constant 0 : index
    %10 = vector.load %arg6[%c1_11, %c0_12, %c0_13] : memref<4x1x32xf32, #tpu.memory_space<vmem>>, vector<1x1x32xf32>
    %11 = vector.shape_cast %10 : vector<1x1x32xf32> to vector<1x32xf32>
    %c2_14 = arith.constant 2 : index
    %c0_15 = arith.constant 0 : index
    %c0_16 = arith.constant 0 : index
    %12 = vector.load %arg6[%c2_14, %c0_15, %c0_16] : memref<4x1x32xf32, #tpu.memory_space<vmem>>, vector<1x1x32xf32>
    %13 = vector.shape_cast %12 : vector<1x1x32xf32> to vector<1x32xf32>
    %c3_17 = arith.constant 3 : index
    %c0_18 = arith.constant 0 : index
    %c0_19 = arith.constant 0 : index
    %14 = vector.load %arg6[%c3_17, %c0_18, %c0_19] : memref<4x1x32xf32, #tpu.memory_space<vmem>>, vector<1x1x32xf32>
    %15 = vector.shape_cast %14 : vector<1x1x32xf32> to vector<1x32xf32>
    %c0_20 = arith.constant 0 : index
    %c0_21 = arith.constant 0 : index
    %c0_22 = arith.constant 0 : index
    %16 = vector.load %arg1[%c0_20, %c0_21, %c0_22] : memref<2x8x32xf32, #tpu.memory_space<vmem>>, vector<1x8x32xf32>
    %17 = vector.shape_cast %16 : vector<1x8x32xf32> to vector<8x32xf32>
    %18 = arith.truncf %17 : vector<8x32xf32> to vector<8x32xbf16>
    %c0_23 = arith.constant 0 : index
    %c0_24 = arith.constant 0 : index
    %c0_25 = arith.constant 0 : index
    %19 = vector.load %arg2[%c0_23, %c0_24, %c0_25] : memref<2x8x32xf32, #tpu.memory_space<vmem>>, vector<1x8x32xf32>
    %20 = vector.shape_cast %19 : vector<1x8x32xf32> to vector<8x32xf32>
    %21 = arith.truncf %20 : vector<8x32xf32> to vector<8x32xbf16>
    %c0_26 = arith.constant 0 : index
    %c0_27 = arith.constant 0 : index
    %c0_28 = arith.constant 0 : index
    %22 = vector.load %arg3[%c0_26, %c0_27, %c0_28] : memref<2x8x32xf32, #tpu.memory_space<vmem>>, vector<1x8x32xf32>
    %23 = vector.shape_cast %22 : vector<1x8x32xf32> to vector<8x32xf32>
    %24 = arith.truncf %23 : vector<8x32xf32> to vector<8x32xbf16>
    %c0_29 = arith.constant 0 : index
    %c0_30 = arith.constant 0 : index
    %c0_31 = arith.constant 0 : index
    %25 = vector.load %arg4[%c0_29, %c0_30, %c0_31] : memref<2x1x8xf32, #tpu.memory_space<vmem>>, vector<1x1x8xf32>
    %26 = vector.shape_cast %25 : vector<1x1x8xf32> to vector<1x8xf32>
    %cst = arith.constant 0.000000e+00 : f32
    %27 = vector.broadcast %cst : f32 to vector<1x8xf32>
    %28 = arith.cmpf oeq, %26, %27 : vector<1x8xf32>
    %cst_32 = arith.constant -1.000000e+30 : f32
    %cst_33 = arith.constant 0.000000e+00 : f32
    %29 = vector.broadcast %cst_32 : f32 to vector<1x8xf32>
    %30 = vector.broadcast %cst_33 : f32 to vector<1x8xf32>
    %31 = arith.select %28, %29, %30 : vector<1x8xi1>, vector<1x8xf32>
    %cst_34 = arith.constant dense<0xFF800000> : vector<1xf32>
    %32 = vector.multi_reduction <maximumf>, %31, %cst_34 [1] : vector<1x8xf32> to vector<1xf32>
    %33 = vector.shape_cast %32 : vector<1xf32> to vector<1x1xf32>
    %cst_35 = arith.constant 0.000000e+00 : f32
    %34 = vector.broadcast %cst_35 : f32 to vector<1x1xf32>
    %35 = arith.cmpf oeq, %33, %34 : vector<1x1xf32>
    %36 = arith.extui %35 : vector<1x1xi1> to vector<1x1xi32>
    %37 = arith.sitofp %36 : vector<1x1xi32> to vector<1x1xf32>
    %cst_36 = arith.constant dense<0.000000e+00> : vector<8x32xf32>
    %38 = tpu.matmul %18, %1, %cst_36 {dimension_numbers = #tpu.dot_dimension_numbers<[1], [0], [0], [1], [0, 0, 1, 1], [], []>} : vector<8x32xbf16>, vector<32x32xbf16>, vector<8x32xf32> -> vector<8x32xf32>
    %39 = vector.broadcast %9 : vector<1x32xf32> to vector<8x32xf32>
    %40 = arith.addf %38, %39 : vector<8x32xf32>
    %41 = arith.truncf %40 : vector<8x32xf32> to vector<8x32xbf16>
    %cst_37 = arith.constant dense<0.000000e+00> : vector<8x32xf32>
    %42 = tpu.matmul %21, %3, %cst_37 {dimension_numbers = #tpu.dot_dimension_numbers<[1], [0], [0], [1], [0, 0, 1, 1], [], []>} : vector<8x32xbf16>, vector<32x32xbf16>, vector<8x32xf32> -> vector<8x32xf32>
    %43 = vector.broadcast %11 : vector<1x32xf32> to vector<8x32xf32>
    %44 = arith.addf %42, %43 : vector<8x32xf32>
    %45 = arith.truncf %44 : vector<8x32xf32> to vector<8x32xbf16>
    %cst_38 = arith.constant dense<0.000000e+00> : vector<8x32xf32>
    %46 = tpu.matmul %24, %5, %cst_38 {dimension_numbers = #tpu.dot_dimension_numbers<[1], [0], [0], [1], [0, 0, 1, 1], [], []>} : vector<8x32xbf16>, vector<32x32xbf16>, vector<8x32xf32> -> vector<8x32xf32>
    %47 = vector.broadcast %13 : vector<1x32xf32> to vector<8x32xf32>
    %48 = arith.addf %46, %47 : vector<8x32xf32>
    %49 = arith.truncf %48 : vector<8x32xf32> to vector<8x32xbf16>
    %50 = vector.extract_strided_slice %41 {offsets = [0, 0], sizes = [8, 8], strides = [1, 1]} : vector<8x32xbf16> to vector<8x8xbf16>
    %51 = vector.extract_strided_slice %45 {offsets = [0, 0], sizes = [8, 8], strides = [1, 1]} : vector<8x32xbf16> to vector<8x8xbf16>
    %52 = vector.extract_strided_slice %49 {offsets = [0, 0], sizes = [8, 8], strides = [1, 1]} : vector<8x32xbf16> to vector<8x8xbf16>
    "tpu.trace_start"() <{level = 10 : i32, message = "td,sd->ts"}> : () -> ()
    %cst_39 = arith.constant dense<0.000000e+00> : vector<8x8xf32>
    %53 = tpu.matmul %50, %51, %cst_39 {dimension_numbers = #tpu.dot_dimension_numbers<[1], [1], [0], [0], [0, 0, 1, 0], [], []>} : vector<8x8xbf16>, vector<8x8xbf16>, vector<8x8xf32> -> vector<8x8xf32>
    "tpu.trace_stop"() : () -> ()
    %54 = vector.broadcast %31 : vector<1x8xf32> to vector<8x8xf32>
    %55 = arith.addf %53, %54 : vector<8x8xf32>
    %cst_40 = arith.constant dense<0xFF800000> : vector<8xf32>
    %56 = vector.multi_reduction <maximumf>, %55, %cst_40 [1] : vector<8x8xf32> to vector<8xf32>
    %57 = vector.shape_cast %56 : vector<8xf32> to vector<8x1xf32>
    %58 = vector.broadcast %57 : vector<8x1xf32> to vector<8x8xf32>
    %59 = arith.subf %55, %58 : vector<8x8xf32>
    %60 = math.exp %59 : vector<8x8xf32>
    %cst_41 = arith.constant dense<0.000000e+00> : vector<8xf32>
    %61 = vector.multi_reduction <add>, %60, %cst_41 [1] : vector<8x8xf32> to vector<8xf32>
    %62 = vector.shape_cast %61 : vector<8xf32> to vector<8x1xf32>
    %63 = tpu.reciprocal %62 {approx = true} : vector<8x1xf32> -> vector<8x1xf32>
    %64 = vector.broadcast %37 : vector<1x1xf32> to vector<8x1xf32>
    %65 = arith.mulf %63, %64 : vector<8x1xf32>
    %66 = arith.truncf %60 : vector<8x8xf32> to vector<8x8xbf16>
    %cst_42 = arith.constant dense<0.000000e+00> : vector<8x8xf32>
    %67 = tpu.matmul %66, %52, %cst_42 {dimension_numbers = #tpu.dot_dimension_numbers<[1], [0], [0], [1], [0, 0, 1, 1], [], []>} : vector<8x8xbf16>, vector<8x8xbf16>, vector<8x8xf32> -> vector<8x8xf32>
    %68 = vector.broadcast %65 : vector<8x1xf32> to vector<8x8xf32>
    %69 = arith.mulf %67, %68 : vector<8x8xf32>
    %70 = arith.truncf %69 : vector<8x8xf32> to vector<8x8xbf16>
    %c0_43 = arith.constant 0 : index
    %c0_44 = arith.constant 0 : index
    %71 = vector.load %arg8[%c0_43, %c0_44] : memref<8x32xbf16, #tpu.memory_space<vmem>>, vector<8x8xbf16>
    tpu.vector_store %arg8[%c0_43, %c0_44], %70 {strides = array<i32>} : memref<8x32xbf16, #tpu.memory_space<vmem>>, vector<8x8xbf16>,
    %72 = vector.extract_strided_slice %41 {offsets = [0, 8], sizes = [8, 8], strides = [1, 1]} : vector<8x32xbf16> to vector<8x8xbf16>
    %73 = vector.extract_strided_slice %45 {offsets = [0, 8], sizes = [8, 8], strides = [1, 1]} : vector<8x32xbf16> to vector<8x8xbf16>
    %74 = vector.extract_strided_slice %49 {offsets = [0, 8], sizes = [8, 8], strides = [1, 1]} : vector<8x32xbf16> to vector<8x8xbf16>
    "tpu.trace_start"() <{level = 10 : i32, message = "td,sd->ts"}> : () -> ()
    %cst_45 = arith.constant dense<0.000000e+00> : vector<8x8xf32>
    %75 = tpu.matmul %72, %73, %cst_45 {dimension_numbers = #tpu.dot_dimension_numbers<[1], [1], [0], [0], [0, 0, 1, 0], [], []>} : vector<8x8xbf16>, vector<8x8xbf16>, vector<8x8xf32> -> vector<8x8xf32>
    "tpu.trace_stop"() : () -> ()
    %76 = vector.broadcast %31 : vector<1x8xf32> to vector<8x8xf32>
    %77 = arith.addf %75, %76 : vector<8x8xf32>
    %cst_46 = arith.constant dense<0xFF800000> : vector<8xf32>
    %78 = vector.multi_reduction <maximumf>, %77, %cst_46 [1] : vector<8x8xf32> to vector<8xf32>
    %79 = vector.shape_cast %78 : vector<8xf32> to vector<8x1xf32>
    %80 = vector.broadcast %79 : vector<8x1xf32> to vector<8x8xf32>
    %81 = arith.subf %77, %80 : vector<8x8xf32>
    %82 = math.exp %81 : vector<8x8xf32>
    %cst_47 = arith.constant dense<0.000000e+00> : vector<8xf32>
    %83 = vector.multi_reduction <add>, %82, %cst_47 [1] : vector<8x8xf32> to vector<8xf32>
    %84 = vector.shape_cast %83 : vector<8xf32> to vector<8x1xf32>
    %85 = tpu.reciprocal %84 {approx = true} : vector<8x1xf32> -> vector<8x1xf32>
    %86 = vector.broadcast %37 : vector<1x1xf32> to vector<8x1xf32>
    %87 = arith.mulf %85, %86 : vector<8x1xf32>
    %88 = arith.truncf %82 : vector<8x8xf32> to vector<8x8xbf16>
    %cst_48 = arith.constant dense<0.000000e+00> : vector<8x8xf32>
    %89 = tpu.matmul %88, %74, %cst_48 {dimension_numbers = #tpu.dot_dimension_numbers<[1], [0], [0], [1], [0, 0, 1, 1], [], []>} : vector<8x8xbf16>, vector<8x8xbf16>, vector<8x8xf32> -> vector<8x8xf32>
    %90 = vector.broadcast %87 : vector<8x1xf32> to vector<8x8xf32>
    %91 = arith.mulf %89, %90 : vector<8x8xf32>
    %92 = arith.truncf %91 : vector<8x8xf32> to vector<8x8xbf16>
    %c0_49 = arith.constant 0 : index
    %c8 = arith.constant 8 : index
    %93 = vector.load %arg8[%c0_49, %c8] : memref<8x32xbf16, #tpu.memory_space<vmem>>, vector<8x8xbf16>
    tpu.vector_store %arg8[%c0_49, %c8], %92 {strides = array<i32>} : memref<8x32xbf16, #tpu.memory_space<vmem>>, vector<8x8xbf16>,
    %94 = vector.extract_strided_slice %41 {offsets = [0, 16], sizes = [8, 8], strides = [1, 1]} : vector<8x32xbf16> to vector<8x8xbf16>
    %95 = vector.extract_strided_slice %45 {offsets = [0, 16], sizes = [8, 8], strides = [1, 1]} : vector<8x32xbf16> to vector<8x8xbf16>
    %96 = vector.extract_strided_slice %49 {offsets = [0, 16], sizes = [8, 8], strides = [1, 1]} : vector<8x32xbf16> to vector<8x8xbf16>
    "tpu.trace_start"() <{level = 10 : i32, message = "td,sd->ts"}> : () -> ()
    %cst_50 = arith.constant dense<0.000000e+00> : vector<8x8xf32>
    %97 = tpu.matmul %94, %95, %cst_50 {dimension_numbers = #tpu.dot_dimension_numbers<[1], [1], [0], [0], [0, 0, 1, 0], [], []>} : vector<8x8xbf16>, vector<8x8xbf16>, vector<8x8xf32> -> vector<8x8xf32>
    "tpu.trace_stop"() : () -> ()
    %98 = vector.broadcast %31 : vector<1x8xf32> to vector<8x8xf32>
    %99 = arith.addf %97, %98 : vector<8x8xf32>
    %cst_51 = arith.constant dense<0xFF800000> : vector<8xf32>
    %100 = vector.multi_reduction <maximumf>, %99, %cst_51 [1] : vector<8x8xf32> to vector<8xf32>
    %101 = vector.shape_cast %100 : vector<8xf32> to vector<8x1xf32>
    %102 = vector.broadcast %101 : vector<8x1xf32> to vector<8x8xf32>
    %103 = arith.subf %99, %102 : vector<8x8xf32>
    %104 = math.exp %103 : vector<8x8xf32>
    %cst_52 = arith.constant dense<0.000000e+00> : vector<8xf32>
    %105 = vector.multi_reduction <add>, %104, %cst_52 [1] : vector<8x8xf32> to vector<8xf32>
    %106 = vector.shape_cast %105 : vector<8xf32> to vector<8x1xf32>
    %107 = tpu.reciprocal %106 {approx = true} : vector<8x1xf32> -> vector<8x1xf32>
    %108 = vector.broadcast %37 : vector<1x1xf32> to vector<8x1xf32>
    %109 = arith.mulf %107, %108 : vector<8x1xf32>
    %110 = arith.truncf %104 : vector<8x8xf32> to vector<8x8xbf16>
    %cst_53 = arith.constant dense<0.000000e+00> : vector<8x8xf32>
    %111 = tpu.matmul %110, %96, %cst_53 {dimension_numbers = #tpu.dot_dimension_numbers<[1], [0], [0], [1], [0, 0, 1, 1], [], []>} : vector<8x8xbf16>, vector<8x8xbf16>, vector<8x8xf32> -> vector<8x8xf32>
    %112 = vector.broadcast %109 : vector<8x1xf32> to vector<8x8xf32>
    %113 = arith.mulf %111, %112 : vector<8x8xf32>
    %114 = arith.truncf %113 : vector<8x8xf32> to vector<8x8xbf16>
    %c0_54 = arith.constant 0 : index
    %c16 = arith.constant 16 : index
    %115 = vector.load %arg8[%c0_54, %c16] : memref<8x32xbf16, #tpu.memory_space<vmem>>, vector<8x8xbf16>
    tpu.vector_store %arg8[%c0_54, %c16], %114 {strides = array<i32>} : memref<8x32xbf16, #tpu.memory_space<vmem>>, vector<8x8xbf16>,
    %116 = vector.extract_strided_slice %41 {offsets = [0, 24], sizes = [8, 8], strides = [1, 1]} : vector<8x32xbf16> to vector<8x8xbf16>
    %117 = vector.extract_strided_slice %45 {offsets = [0, 24], sizes = [8, 8], strides = [1, 1]} : vector<8x32xbf16> to vector<8x8xbf16>
    %118 = vector.extract_strided_slice %49 {offsets = [0, 24], sizes = [8, 8], strides = [1, 1]} : vector<8x32xbf16> to vector<8x8xbf16>
    "tpu.trace_start"() <{level = 10 : i32, message = "td,sd->ts"}> : () -> ()
    %cst_55 = arith.constant dense<0.000000e+00> : vector<8x8xf32>
    %119 = tpu.matmul %116, %117, %cst_55 {dimension_numbers = #tpu.dot_dimension_numbers<[1], [1], [0], [0], [0, 0, 1, 0], [], []>} : vector<8x8xbf16>, vector<8x8xbf16>, vector<8x8xf32> -> vector<8x8xf32>
    "tpu.trace_stop"() : () -> ()
    %120 = vector.broadcast %31 : vector<1x8xf32> to vector<8x8xf32>
    %121 = arith.addf %119, %120 : vector<8x8xf32>
    %cst_56 = arith.constant dense<0xFF800000> : vector<8xf32>
    %122 = vector.multi_reduction <maximumf>, %121, %cst_56 [1] : vector<8x8xf32> to vector<8xf32>
    %123 = vector.shape_cast %122 : vector<8xf32> to vector<8x1xf32>
    %124 = vector.broadcast %123 : vector<8x1xf32> to vector<8x8xf32>
    %125 = arith.subf %121, %124 : vector<8x8xf32>
    %126 = math.exp %125 : vector<8x8xf32>
    %cst_57 = arith.constant dense<0.000000e+00> : vector<8xf32>
    %127 = vector.multi_reduction <add>, %126, %cst_57 [1] : vector<8x8xf32> to vector<8xf32>
    %128 = vector.shape_cast %127 : vector<8xf32> to vector<8x1xf32>
    %129 = tpu.reciprocal %128 {approx = true} : vector<8x1xf32> -> vector<8x1xf32>
    %130 = vector.broadcast %37 : vector<1x1xf32> to vector<8x1xf32>
    %131 = arith.mulf %129, %130 : vector<8x1xf32>
    %132 = arith.truncf %126 : vector<8x8xf32> to vector<8x8xbf16>
    %cst_58 = arith.constant dense<0.000000e+00> : vector<8x8xf32>
    %133 = tpu.matmul %132, %118, %cst_58 {dimension_numbers = #tpu.dot_dimension_numbers<[1], [0], [0], [1], [0, 0, 1, 1], [], []>} : vector<8x8xbf16>, vector<8x8xbf16>, vector<8x8xf32> -> vector<8x8xf32>
    %134 = vector.broadcast %131 : vector<8x1xf32> to vector<8x8xf32>
    %135 = arith.mulf %133, %134 : vector<8x8xf32>
    %136 = arith.truncf %135 : vector<8x8xf32> to vector<8x8xbf16>
    %c0_59 = arith.constant 0 : index
    %c24 = arith.constant 24 : index
    %137 = vector.load %arg8[%c0_59, %c24] : memref<8x32xbf16, #tpu.memory_space<vmem>>, vector<8x8xbf16>
    tpu.vector_store %arg8[%c0_59, %c24], %136 {strides = array<i32>} : memref<8x32xbf16, #tpu.memory_space<vmem>>, vector<8x8xbf16>,
    %c0_60 = arith.constant 0 : index
    %c0_61 = arith.constant 0 : index
    %138 = vector.load %arg8[%c0_60, %c0_61] : memref<8x32xbf16, #tpu.memory_space<vmem>>, vector<8x32xbf16>
    %cst_62 = arith.constant dense<0.000000e+00> : vector<8x32xf32>
    %139 = tpu.matmul %138, %7, %cst_62 {dimension_numbers = #tpu.dot_dimension_numbers<[1], [0], [0], [1], [0, 0, 1, 1], [], []>} : vector<8x32xbf16>, vector<32x32xbf16>, vector<8x32xf32> -> vector<8x32xf32>
    %140 = vector.broadcast %15 : vector<1x32xf32> to vector<8x32xf32>
    %141 = arith.addf %139, %140 : vector<8x32xf32>
    %c0_63 = arith.constant 0 : index
    %c0_64 = arith.constant 0 : index
    %c0_65 = arith.constant 0 : index
    %142 = vector.load %arg7[%c0_63, %c0_64, %c0_65] : memref<2x8x32xf32, #tpu.memory_space<vmem>>, vector<1x8x32xf32>
    %143 = vector.shape_cast %142 : vector<1x8x32xf32> to vector<8x32xf32>
    %144 = vector.shape_cast %141 : vector<8x32xf32> to vector<1x8x32xf32>
    tpu.vector_store %arg7[%c0_63, %c0_64, %c0_65], %144 {strides = array<i32>} : memref<2x8x32xf32, #tpu.memory_space<vmem>>, vector<1x8x32xf32>,
    %c1_66 = arith.constant 1 : index
    %c0_67 = arith.constant 0 : index
    %c0_68 = arith.constant 0 : index
    %145 = vector.load %arg1[%c1_66, %c0_67, %c0_68] : memref<2x8x32xf32, #tpu.memory_space<vmem>>, vector<1x8x32xf32>
    %146 = vector.shape_cast %145 : vector<1x8x32xf32> to vector<8x32xf32>
    %147 = arith.truncf %146 : vector<8x32xf32> to vector<8x32xbf16>
    %c1_69 = arith.constant 1 : index
    %c0_70 = arith.constant 0 : index
    %c0_71 = arith.constant 0 : index
    %148 = vector.load %arg2[%c1_69, %c0_70, %c0_71] : memref<2x8x32xf32, #tpu.memory_space<vmem>>, vector<1x8x32xf32>
    %149 = vector.shape_cast %148 : vector<1x8x32xf32> to vector<8x32xf32>
    %150 = arith.truncf %149 : vector<8x32xf32> to vector<8x32xbf16>
    %c1_72 = arith.constant 1 : index
    %c0_73 = arith.constant 0 : index
    %c0_74 = arith.constant 0 : index
    %151 = vector.load %arg3[%c1_72, %c0_73, %c0_74] : memref<2x8x32xf32, #tpu.memory_space<vmem>>, vector<1x8x32xf32>
    %152 = vector.shape_cast %151 : vector<1x8x32xf32> to vector<8x32xf32>
    %153 = arith.truncf %152 : vector<8x32xf32> to vector<8x32xbf16>
    %c1_75 = arith.constant 1 : index
    %c0_76 = arith.constant 0 : index
    %c0_77 = arith.constant 0 : index
    %154 = vector.load %arg4[%c1_75, %c0_76, %c0_77] : memref<2x1x8xf32, #tpu.memory_space<vmem>>, vector<1x1x8xf32>
    %155 = vector.shape_cast %154 : vector<1x1x8xf32> to vector<1x8xf32>
    %cst_78 = arith.constant 0.000000e+00 : f32
    %156 = vector.broadcast %cst_78 : f32 to vector<1x8xf32>
    %157 = arith.cmpf oeq, %155, %156 : vector<1x8xf32>
    %cst_79 = arith.constant -1.000000e+30 : f32
    %cst_80 = arith.constant 0.000000e+00 : f32
    %158 = vector.broadcast %cst_79 : f32 to vector<1x8xf32>
    %159 = vector.broadcast %cst_80 : f32 to vector<1x8xf32>
    %160 = arith.select %157, %158, %159 : vector<1x8xi1>, vector<1x8xf32>
    %cst_81 = arith.constant dense<0xFF800000> : vector<1xf32>
    %161 = vector.multi_reduction <maximumf>, %160, %cst_81 [1] : vector<1x8xf32> to vector<1xf32>
    %162 = vector.shape_cast %161 : vector<1xf32> to vector<1x1xf32>
    %cst_82 = arith.constant 0.000000e+00 : f32
    %163 = vector.broadcast %cst_82 : f32 to vector<1x1xf32>
    %164 = arith.cmpf oeq, %162, %163 : vector<1x1xf32>
    %165 = arith.extui %164 : vector<1x1xi1> to vector<1x1xi32>
    %166 = arith.sitofp %165 : vector<1x1xi32> to vector<1x1xf32>
    %cst_83 = arith.constant dense<0.000000e+00> : vector<8x32xf32>
    %167 = tpu.matmul %147, %1, %cst_83 {dimension_numbers = #tpu.dot_dimension_numbers<[1], [0], [0], [1], [0, 0, 1, 1], [], []>} : vector<8x32xbf16>, vector<32x32xbf16>, vector<8x32xf32> -> vector<8x32xf32>
    %168 = vector.broadcast %9 : vector<1x32xf32> to vector<8x32xf32>
    %169 = arith.addf %167, %168 : vector<8x32xf32>
    %170 = arith.truncf %169 : vector<8x32xf32> to vector<8x32xbf16>
    %cst_84 = arith.constant dense<0.000000e+00> : vector<8x32xf32>
    %171 = tpu.matmul %150, %3, %cst_84 {dimension_numbers = #tpu.dot_dimension_numbers<[1], [0], [0], [1], [0, 0, 1, 1], [], []>} : vector<8x32xbf16>, vector<32x32xbf16>, vector<8x32xf32> -> vector<8x32xf32>
    %172 = vector.broadcast %11 : vector<1x32xf32> to vector<8x32xf32>
    %173 = arith.addf %171, %172 : vector<8x32xf32>
    %174 = arith.truncf %173 : vector<8x32xf32> to vector<8x32xbf16>
    %cst_85 = arith.constant dense<0.000000e+00> : vector<8x32xf32>
    %175 = tpu.matmul %153, %5, %cst_85 {dimension_numbers = #tpu.dot_dimension_numbers<[1], [0], [0], [1], [0, 0, 1, 1], [], []>} : vector<8x32xbf16>, vector<32x32xbf16>, vector<8x32xf32> -> vector<8x32xf32>
    %176 = vector.broadcast %13 : vector<1x32xf32> to vector<8x32xf32>
    %177 = arith.addf %175, %176 : vector<8x32xf32>
    %178 = arith.truncf %177 : vector<8x32xf32> to vector<8x32xbf16>
    %179 = vector.extract_strided_slice %170 {offsets = [0, 0], sizes = [8, 8], strides = [1, 1]} : vector<8x32xbf16> to vector<8x8xbf16>
    %180 = vector.extract_strided_slice %174 {offsets = [0, 0], sizes = [8, 8], strides = [1, 1]} : vector<8x32xbf16> to vector<8x8xbf16>
    %181 = vector.extract_strided_slice %178 {offsets = [0, 0], sizes = [8, 8], strides = [1, 1]} : vector<8x32xbf16> to vector<8x8xbf16>
    "tpu.trace_start"() <{level = 10 : i32, message = "td,sd->ts"}> : () -> ()
    %cst_86 = arith.constant dense<0.000000e+00> : vector<8x8xf32>
    %182 = tpu.matmul %179, %180, %cst_86 {dimension_numbers = #tpu.dot_dimension_numbers<[1], [1], [0], [0], [0, 0, 1, 0], [], []>} : vector<8x8xbf16>, vector<8x8xbf16>, vector<8x8xf32> -> vector<8x8xf32>
    "tpu.trace_stop"() : () -> ()
    %183 = vector.broadcast %160 : vector<1x8xf32> to vector<8x8xf32>
    %184 = arith.addf %182, %183 : vector<8x8xf32>
    %cst_87 = arith.constant dense<0xFF800000> : vector<8xf32>
    %185 = vector.multi_reduction <maximumf>, %184, %cst_87 [1] : vector<8x8xf32> to vector<8xf32>
    %186 = vector.shape_cast %185 : vector<8xf32> to vector<8x1xf32>
    %187 = vector.broadcast %186 : vector<8x1xf32> to vector<8x8xf32>
    %188 = arith.subf %184, %187 : vector<8x8xf32>
    %189 = math.exp %188 : vector<8x8xf32>
    %cst_88 = arith.constant dense<0.000000e+00> : vector<8xf32>
    %190 = vector.multi_reduction <add>, %189, %cst_88 [1] : vector<8x8xf32> to vector<8xf32>
    %191 = vector.shape_cast %190 : vector<8xf32> to vector<8x1xf32>
    %192 = tpu.reciprocal %191 {approx = true} : vector<8x1xf32> -> vector<8x1xf32>
    %193 = vector.broadcast %166 : vector<1x1xf32> to vector<8x1xf32>
    %194 = arith.mulf %192, %193 : vector<8x1xf32>
    %195 = arith.truncf %189 : vector<8x8xf32> to vector<8x8xbf16>
    %cst_89 = arith.constant dense<0.000000e+00> : vector<8x8xf32>
    %196 = tpu.matmul %195, %181, %cst_89 {dimension_numbers = #tpu.dot_dimension_numbers<[1], [0], [0], [1], [0, 0, 1, 1], [], []>} : vector<8x8xbf16>, vector<8x8xbf16>, vector<8x8xf32> -> vector<8x8xf32>
    %197 = vector.broadcast %194 : vector<8x1xf32> to vector<8x8xf32>
    %198 = arith.mulf %196, %197 : vector<8x8xf32>
    %199 = arith.truncf %198 : vector<8x8xf32> to vector<8x8xbf16>
    %c0_90 = arith.constant 0 : index
    %c0_91 = arith.constant 0 : index
    %200 = vector.load %arg8[%c0_90, %c0_91] : memref<8x32xbf16, #tpu.memory_space<vmem>>, vector<8x8xbf16>
    tpu.vector_store %arg8[%c0_90, %c0_91], %199 {strides = array<i32>} : memref<8x32xbf16, #tpu.memory_space<vmem>>, vector<8x8xbf16>,
    %201 = vector.extract_strided_slice %170 {offsets = [0, 8], sizes = [8, 8], strides = [1, 1]} : vector<8x32xbf16> to vector<8x8xbf16>
    %202 = vector.extract_strided_slice %174 {offsets = [0, 8], sizes = [8, 8], strides = [1, 1]} : vector<8x32xbf16> to vector<8x8xbf16>
    %203 = vector.extract_strided_slice %178 {offsets = [0, 8], sizes = [8, 8], strides = [1, 1]} : vector<8x32xbf16> to vector<8x8xbf16>
    "tpu.trace_start"() <{level = 10 : i32, message = "td,sd->ts"}> : () -> ()
    %cst_92 = arith.constant dense<0.000000e+00> : vector<8x8xf32>
    %204 = tpu.matmul %201, %202, %cst_92 {dimension_numbers = #tpu.dot_dimension_numbers<[1], [1], [0], [0], [0, 0, 1, 0], [], []>} : vector<8x8xbf16>, vector<8x8xbf16>, vector<8x8xf32> -> vector<8x8xf32>
    "tpu.trace_stop"() : () -> ()
    %205 = vector.broadcast %160 : vector<1x8xf32> to vector<8x8xf32>
    %206 = arith.addf %204, %205 : vector<8x8xf32>
    %cst_93 = arith.constant dense<0xFF800000> : vector<8xf32>
    %207 = vector.multi_reduction <maximumf>, %206, %cst_93 [1] : vector<8x8xf32> to vector<8xf32>
    %208 = vector.shape_cast %207 : vector<8xf32> to vector<8x1xf32>
    %209 = vector.broadcast %208 : vector<8x1xf32> to vector<8x8xf32>
    %210 = arith.subf %206, %209 : vector<8x8xf32>
    %211 = math.exp %210 : vector<8x8xf32>
    %cst_94 = arith.constant dense<0.000000e+00> : vector<8xf32>
    %212 = vector.multi_reduction <add>, %211, %cst_94 [1] : vector<8x8xf32> to vector<8xf32>
    %213 = vector.shape_cast %212 : vector<8xf32> to vector<8x1xf32>
    %214 = tpu.reciprocal %213 {approx = true} : vector<8x1xf32> -> vector<8x1xf32>
    %215 = vector.broadcast %166 : vector<1x1xf32> to vector<8x1xf32>
    %216 = arith.mulf %214, %215 : vector<8x1xf32>
    %217 = arith.truncf %211 : vector<8x8xf32> to vector<8x8xbf16>
    %cst_95 = arith.constant dense<0.000000e+00> : vector<8x8xf32>
    %218 = tpu.matmul %217, %203, %cst_95 {dimension_numbers = #tpu.dot_dimension_numbers<[1], [0], [0], [1], [0, 0, 1, 1], [], []>} : vector<8x8xbf16>, vector<8x8xbf16>, vector<8x8xf32> -> vector<8x8xf32>
    %219 = vector.broadcast %216 : vector<8x1xf32> to vector<8x8xf32>
    %220 = arith.mulf %218, %219 : vector<8x8xf32>
    %221 = arith.truncf %220 : vector<8x8xf32> to vector<8x8xbf16>
    %c0_96 = arith.constant 0 : index
    %c8_97 = arith.constant 8 : index
    %222 = vector.load %arg8[%c0_96, %c8_97] : memref<8x32xbf16, #tpu.memory_space<vmem>>, vector<8x8xbf16>
    tpu.vector_store %arg8[%c0_96, %c8_97], %221 {strides = array<i32>} : memref<8x32xbf16, #tpu.memory_space<vmem>>, vector<8x8xbf16>,
    %223 = vector.extract_strided_slice %170 {offsets = [0, 16], sizes = [8, 8], strides = [1, 1]} : vector<8x32xbf16> to vector<8x8xbf16>
    %224 = vector.extract_strided_slice %174 {offsets = [0, 16], sizes = [8, 8], strides = [1, 1]} : vector<8x32xbf16> to vector<8x8xbf16>
    %225 = vector.extract_strided_slice %178 {offsets = [0, 16], sizes = [8, 8], strides = [1, 1]} : vector<8x32xbf16> to vector<8x8xbf16>
    "tpu.trace_start"() <{level = 10 : i32, message = "td,sd->ts"}> : () -> ()
    %cst_98 = arith.constant dense<0.000000e+00> : vector<8x8xf32>
    %226 = tpu.matmul %223, %224, %cst_98 {dimension_numbers = #tpu.dot_dimension_numbers<[1], [1], [0], [0], [0, 0, 1, 0], [], []>} : vector<8x8xbf16>, vector<8x8xbf16>, vector<8x8xf32> -> vector<8x8xf32>
    "tpu.trace_stop"() : () -> ()
    %227 = vector.broadcast %160 : vector<1x8xf32> to vector<8x8xf32>
    %228 = arith.addf %226, %227 : vector<8x8xf32>
    %cst_99 = arith.constant dense<0xFF800000> : vector<8xf32>
    %229 = vector.multi_reduction <maximumf>, %228, %cst_99 [1] : vector<8x8xf32> to vector<8xf32>
    %230 = vector.shape_cast %229 : vector<8xf32> to vector<8x1xf32>
    %231 = vector.broadcast %230 : vector<8x1xf32> to vector<8x8xf32>
    %232 = arith.subf %228, %231 : vector<8x8xf32>
    %233 = math.exp %232 : vector<8x8xf32>
    %cst_100 = arith.constant dense<0.000000e+00> : vector<8xf32>
    %234 = vector.multi_reduction <add>, %233, %cst_100 [1] : vector<8x8xf32> to vector<8xf32>
    %235 = vector.shape_cast %234 : vector<8xf32> to vector<8x1xf32>
    %236 = tpu.reciprocal %235 {approx = true} : vector<8x1xf32> -> vector<8x1xf32>
    %237 = vector.broadcast %166 : vector<1x1xf32> to vector<8x1xf32>
    %238 = arith.mulf %236, %237 : vector<8x1xf32>
    %239 = arith.truncf %233 : vector<8x8xf32> to vector<8x8xbf16>
    %cst_101 = arith.constant dense<0.000000e+00> : vector<8x8xf32>
    %240 = tpu.matmul %239, %225, %cst_101 {dimension_numbers = #tpu.dot_dimension_numbers<[1], [0], [0], [1], [0, 0, 1, 1], [], []>} : vector<8x8xbf16>, vector<8x8xbf16>, vector<8x8xf32> -> vector<8x8xf32>
    %241 = vector.broadcast %238 : vector<8x1xf32> to vector<8x8xf32>
    %242 = arith.mulf %240, %241 : vector<8x8xf32>
    %243 = arith.truncf %242 : vector<8x8xf32> to vector<8x8xbf16>
    %c0_102 = arith.constant 0 : index
    %c16_103 = arith.constant 16 : index
    %244 = vector.load %arg8[%c0_102, %c16_103] : memref<8x32xbf16, #tpu.memory_space<vmem>>, vector<8x8xbf16>
    tpu.vector_store %arg8[%c0_102, %c16_103], %243 {strides = array<i32>} : memref<8x32xbf16, #tpu.memory_space<vmem>>, vector<8x8xbf16>,
    %245 = vector.extract_strided_slice %170 {offsets = [0, 24], sizes = [8, 8], strides = [1, 1]} : vector<8x32xbf16> to vector<8x8xbf16>
    %246 = vector.extract_strided_slice %174 {offsets = [0, 24], sizes = [8, 8], strides = [1, 1]} : vector<8x32xbf16> to vector<8x8xbf16>
    %247 = vector.extract_strided_slice %178 {offsets = [0, 24], sizes = [8, 8], strides = [1, 1]} : vector<8x32xbf16> to vector<8x8xbf16>
    "tpu.trace_start"() <{level = 10 : i32, message = "td,sd->ts"}> : () -> ()
    %cst_104 = arith.constant dense<0.000000e+00> : vector<8x8xf32>
    %248 = tpu.matmul %245, %246, %cst_104 {dimension_numbers = #tpu.dot_dimension_numbers<[1], [1], [0], [0], [0, 0, 1, 0], [], []>} : vector<8x8xbf16>, vector<8x8xbf16>, vector<8x8xf32> -> vector<8x8xf32>
    "tpu.trace_stop"() : () -> ()
    %249 = vector.broadcast %160 : vector<1x8xf32> to vector<8x8xf32>
    %250 = arith.addf %248, %249 : vector<8x8xf32>
    %cst_105 = arith.constant dense<0xFF800000> : vector<8xf32>
    %251 = vector.multi_reduction <maximumf>, %250, %cst_105 [1] : vector<8x8xf32> to vector<8xf32>
    %252 = vector.shape_cast %251 : vector<8xf32> to vector<8x1xf32>
    %253 = vector.broadcast %252 : vector<8x1xf32> to vector<8x8xf32>
    %254 = arith.subf %250, %253 : vector<8x8xf32>
    %255 = math.exp %254 : vector<8x8xf32>
    %cst_106 = arith.constant dense<0.000000e+00> : vector<8xf32>
    %256 = vector.multi_reduction <add>, %255, %cst_106 [1] : vector<8x8xf32> to vector<8xf32>
    %257 = vector.shape_cast %256 : vector<8xf32> to vector<8x1xf32>
    %258 = tpu.reciprocal %257 {approx = true} : vector<8x1xf32> -> vector<8x1xf32>
    %259 = vector.broadcast %166 : vector<1x1xf32> to vector<8x1xf32>
    %260 = arith.mulf %258, %259 : vector<8x1xf32>
    %261 = arith.truncf %255 : vector<8x8xf32> to vector<8x8xbf16>
    %cst_107 = arith.constant dense<0.000000e+00> : vector<8x8xf32>
    %262 = tpu.matmul %261, %247, %cst_107 {dimension_numbers = #tpu.dot_dimension_numbers<[1], [0], [0], [1], [0, 0, 1, 1], [], []>} : vector<8x8xbf16>, vector<8x8xbf16>, vector<8x8xf32> -> vector<8x8xf32>
    %263 = vector.broadcast %260 : vector<8x1xf32> to vector<8x8xf32>
    %264 = arith.mulf %262, %263 : vector<8x8xf32>
    %265 = arith.truncf %264 : vector<8x8xf32> to vector<8x8xbf16>
    %c0_108 = arith.constant 0 : index
    %c24_109 = arith.constant 24 : index
    %266 = vector.load %arg8[%c0_108, %c24_109] : memref<8x32xbf16, #tpu.memory_space<vmem>>, vector<8x8xbf16>
    tpu.vector_store %arg8[%c0_108, %c24_109], %265 {strides = array<i32>} : memref<8x32xbf16, #tpu.memory_space<vmem>>, vector<8x8xbf16>,
    %c0_110 = arith.constant 0 : index
    %c0_111 = arith.constant 0 : index
    %267 = vector.load %arg8[%c0_110, %c0_111] : memref<8x32xbf16, #tpu.memory_space<vmem>>, vector<8x32xbf16>
    %cst_112 = arith.constant dense<0.000000e+00> : vector<8x32xf32>
    %268 = tpu.matmul %267, %7, %cst_112 {dimension_numbers = #tpu.dot_dimension_numbers<[1], [0], [0], [1], [0, 0, 1, 1], [], []>} : vector<8x32xbf16>, vector<32x32xbf16>, vector<8x32xf32> -> vector<8x32xf32>
    %269 = vector.broadcast %15 : vector<1x32xf32> to vector<8x32xf32>
    %270 = arith.addf %268, %269 : vector<8x32xf32>
    %c1_113 = arith.constant 1 : index
    %c0_114 = arith.constant 0 : index
    %c0_115 = arith.constant 0 : index
    %271 = vector.load %arg7[%c1_113, %c0_114, %c0_115] : memref<2x8x32xf32, #tpu.memory_space<vmem>>, vector<1x8x32xf32>
    %272 = vector.shape_cast %271 : vector<1x8x32xf32> to vector<8x32xf32>
    %273 = vector.shape_cast %270 : vector<8x32xf32> to vector<1x8x32xf32>
    tpu.vector_store %arg7[%c1_113, %c0_114, %c0_115], %273 {strides = array<i32>} : memref<2x8x32xf32, #tpu.memory_space<vmem>>, vector<1x8x32xf32>,
    return
  }
  func.func @transform_0(%arg0: i32) -> (i32, i32, i32) {
    %c0_i32 = arith.constant 0 : i32
    %c0_i32_0 = arith.constant 0 : i32
    %c0_i32_1 = arith.constant 0 : i32
    return %arg0, %c0_i32, %c0_i32_0 : i32, i32, i32
  }
  func.func @transform_1(%arg0: i32) -> (i32, i32, i32) {
    %c0_i32 = arith.constant 0 : i32
    %c0_i32_0 = arith.constant 0 : i32
    %c0_i32_1 = arith.constant 0 : i32
    return %arg0, %c0_i32, %c0_i32_0 : i32, i32, i32
  }
  func.func @transform_2(%arg0: i32) -> (i32, i32, i32) {
    %c0_i32 = arith.constant 0 : i32
    %c0_i32_0 = arith.constant 0 : i32
    %c0_i32_1 = arith.constant 0 : i32
    return %arg0, %c0_i32, %c0_i32_0 : i32, i32, i32
  }
  func.func @transform_3(%arg0: i32) -> (i32, i32, i32) {
    %c0_i32 = arith.constant 0 : i32
    %c0_i32_0 = arith.constant 0 : i32
    %c0_i32_1 = arith.constant 0 : i32
    return %arg0, %c0_i32, %c0_i32_0 : i32, i32, i32
  }
  func.func @transform_4(%arg0: i32) -> (i32, i32, i32) {
    %c0_i32 = arith.constant 0 : i32
    %c0_i32_0 = arith.constant 0 : i32
    %c0_i32_1 = arith.constant 0 : i32
    %c0_i32_2 = arith.constant 0 : i32
    return %c0_i32, %c0_i32_0, %c0_i32_1 : i32, i32, i32
  }
  func.func @transform_5(%arg0: i32) -> (i32, i32, i32) {
    %c0_i32 = arith.constant 0 : i32
    %c0_i32_0 = arith.constant 0 : i32
    %c0_i32_1 = arith.constant 0 : i32
    %c0_i32_2 = arith.constant 0 : i32
    return %c0_i32, %c0_i32_0, %c0_i32_1 : i32, i32, i32
  }
  func.func @transform_6(%arg0: i32) -> (i32, i32, i32) {
    %c0_i32 = arith.constant 0 : i32
    %c0_i32_0 = arith.constant 0 : i32
    %c0_i32_1 = arith.constant 0 : i32
    return %arg0, %c0_i32, %c0_i32_0 : i32, i32, i32
  }
}

module attributes {stable_mosaic.version = 11 : i64} {
  func.func @_mha_kernel(%arg0: i32, %arg1: memref<2x8x32xf32, #tpu.memory_space<vmem>>, %arg2: memref<2x8x32xf32, #tpu.memory_space<vmem>>, %arg3: memref<2x8x32xf32, #tpu.memory_space<vmem>>, %arg4: memref<2x1x8xf32, #tpu.memory_space<vmem>>, %arg5: memref<4x32x32xbf16, #tpu.memory_space<vmem>>, %arg6: memref<4x1x32xf32, #tpu.memory_space<vmem>>, %arg7: memref<2x8x32xf32, #tpu.memory_space<vmem>>, %arg8: memref<8x32xbf16, #tpu.memory_space<vmem>>) attributes {dimension_semantics = [#tpu.dimension_semantics<parallel>], iteration_bounds = array<i64: 1>, scalar_prefetch = 0 : i64, scratch_operands = 1 : i64, tpu.core_type = #tpu.core_type<tc>, window_params = [{transform_indices = @transform_0, window_bounds = array<i64: 2, 8, 32>}, {transform_indices = @transform_1, window_bounds = array<i64: 2, 8, 32>}, {transform_indices = @transform_2, window_bounds = array<i64: 2, 8, 32>}, {transform_indices = @transform_3, window_bounds = array<i64: 2, 1, 8>}, {pipeline_mode = #tpu.pipeline_mode<synchronous>, transform_indices = @transform_4, window_bounds = array<i64: 4, 32, 32>}, {pipeline_mode = #tpu.pipeline_mode<synchronous>, transform_indices = @transform_5, window_bounds = array<i64: 4, 1, 32>}, {transform_indices = @transform_6, window_bounds = array<i64: 2, 8, 32>}]} {
    %c0 = arith.constant 0 : index
    %c0_0 = arith.constant 0 : index
    %c0_1 = arith.constant 0 : index
    %0 = vector.load %arg5[%c0, %c0_0, %c0_1] : memref<4x32x32xbf16, #tpu.memory_space<vmem>>, vector<1x32x32xbf16>
    %1 = vector.shape_cast %0 : vector<1x32x32xbf16> to vector<32x32xbf16>
    %c1 = arith.constant 1 : index
    %c0_2 = arith.constant 0 : index
    %c0_3 = arith.constant 0 : index
    %2 = vector.load %arg5[%c1, %c0_2, %c0_3] : memref<4x32x32xbf16, #tpu.memory_space<vmem>>, vector<1x32x32xbf16>
    %3 = vector.shape_cast %2 : vector<1x32x32xbf16> to vector<32x32xbf16>
    %c2 = arith.constant 2 : index
    %c0_4 = arith.constant 0 : index
    %c0_5 = arith.constant 0 : index
    %4 = vector.load %arg5[%c2, %c0_4, %c0_5] : memref<4x32x32xbf16, #tpu.memory_space<vmem>>, vector<1x32x32xbf16>
    %5 = vector.shape_cast %4 : vector<1x32x32xbf16> to vector<32x32xbf16>
    %c3 = arith.constant 3 : index
    %c0_6 = arith.constant 0 : index
    %c0_7 = arith.constant 0 : index
    %6 = vector.load %arg5[%c3, %c0_6, %c0_7] : memref<4x32x32xbf16, #tpu.memory_space<vmem>>, vector<1x32x32xbf16>
    %7 = vector.shape_cast %6 : vector<1x32x32xbf16> to vector<32x32xbf16>
    %c0_8 = arith.constant 0 : index
    %c0_9 = arith.constant 0 : index
    %c0_10 = arith.constant 0 : index
    %8 = vector.load %arg6[%c0_8, %c0_9, %c0_10] : memref<4x1x32xf32, #tpu.memory_space<vmem>>, vector<1x1x32xf32>
    %9 = vector.shape_cast %8 : vector<1x1x32xf32> to vector<1x32xf32>
    %c1_11 = arith.constant 1 : index
    %c0_12 = arith.constant 0 : index
    %c0_13 = arith.constant 0 : index
    %10 = vector.load %arg6[%c1_11, %c0_12, %c0_13] : memref<4x1x32xf32, #tpu.memory_space<vmem>>, vector<1x1x32xf32>
    %11 = vector.shape_cast %10 : vector<1x1x32xf32> to vector<1x32xf32>
    %c2_14 = arith.constant 2 : index
    %c0_15 = arith.constant 0 : index
    %c0_16 = arith.constant 0 : index
    %12 = vector.load %arg6[%c2_14, %c0_15, %c0_16] : memref<4x1x32xf32, #tpu.memory_space<vmem>>, vector<1x1x32xf32>
    %13 = vector.shape_cast %12 : vector<1x1x32xf32> to vector<1x32xf32>
    %c3_17 = arith.constant 3 : index
    %c0_18 = arith.constant 0 : index
    %c0_19 = arith.constant 0 : index
    %14 = vector.load %arg6[%c3_17, %c0_18, %c0_19] : memref<4x1x32xf32, #tpu.memory_space<vmem>>, vector<1x1x32xf32>
    %15 = vector.shape_cast %14 : vector<1x1x32xf32> to vector<1x32xf32>
    %c0_20 = arith.constant 0 : index
    %c0_21 = arith.constant 0 : index
    %c0_22 = arith.constant 0 : index
    %16 = vector.load %arg1[%c0_20, %c0_21, %c0_22] : memref<2x8x32xf32, #tpu.memory_space<vmem>>, vector<1x8x32xf32>
    %17 = vector.shape_cast %16 : vector<1x8x32xf32> to vector<8x32xf32>
    %18 = arith.truncf %17 : vector<8x32xf32> to vector<8x32xbf16>
    %c0_23 = arith.constant 0 : index
    %c0_24 = arith.constant 0 : index
    %c0_25 = arith.constant 0 : index
    %19 = vector.load %arg2[%c0_23, %c0_24, %c0_25] : memref<2x8x32xf32, #tpu.memory_space<vmem>>, vector<1x8x32xf32>
    %20 = vector.shape_cast %19 : vector<1x8x32xf32> to vector<8x32xf32>
    %21 = arith.truncf %20 : vector<8x32xf32> to vector<8x32xbf16>
    %c0_26 = arith.constant 0 : index
    %c0_27 = arith.constant 0 : index
    %c0_28 = arith.constant 0 : index
    %22 = vector.load %arg3[%c0_26, %c0_27, %c0_28] : memref<2x8x32xf32, #tpu.memory_space<vmem>>, vector<1x8x32xf32>
    %23 = vector.shape_cast %22 : vector<1x8x32xf32> to vector<8x32xf32>
    %24 = arith.truncf %23 : vector<8x32xf32> to vector<8x32xbf16>
    %c0_29 = arith.constant 0 : index
    %c0_30 = arith.constant 0 : index
    %c0_31 = arith.constant 0 : index
    %25 = vector.load %arg4[%c0_29, %c0_30, %c0_31] : memref<2x1x8xf32, #tpu.memory_space<vmem>>, vector<1x1x8xf32>
    %26 = vector.shape_cast %25 : vector<1x1x8xf32> to vector<1x8xf32>
    %cst = arith.constant 0.000000e+00 : f32
    %27 = vector.broadcast %cst : f32 to vector<1x8xf32>
    %28 = arith.cmpf oeq, %26, %27 : vector<1x8xf32>
    %cst_32 = arith.constant -1.000000e+30 : f32
    %cst_33 = arith.constant 0.000000e+00 : f32
    %29 = vector.broadcast %cst_32 : f32 to vector<1x8xf32>
    %30 = vector.broadcast %cst_33 : f32 to vector<1x8xf32>
    %31 = arith.select %28, %29, %30 : vector<1x8xi1>, vector<1x8xf32>
    %cst_34 = arith.constant dense<0xFF800000> : vector<1xf32>
    %32 = vector.multi_reduction <maximumf>, %31, %cst_34 [1] : vector<1x8xf32> to vector<1xf32>
    %33 = vector.shape_cast %32 : vector<1xf32> to vector<1x1xf32>
    %cst_35 = arith.constant 0.000000e+00 : f32
    %34 = vector.broadcast %cst_35 : f32 to vector<1x1xf32>
    %35 = arith.cmpf oeq, %33, %34 : vector<1x1xf32>
    %36 = arith.extui %35 : vector<1x1xi1> to vector<1x1xi32>
    %37 = arith.sitofp %36 : vector<1x1xi32> to vector<1x1xf32>
    %cst_36 = arith.constant dense<0.000000e+00> : vector<8x32xf32>
    %38 = tpu.matmul %18, %1, %cst_36 {dimension_numbers = #tpu.dot_dimension_numbers<[1], [0], [0], [1], [0, 0, 1, 1], [], []>} : vector<8x32xbf16>, vector<32x32xbf16>, vector<8x32xf32> -> vector<8x32xf32>
    %39 = vector.broadcast %9 : vector<1x32xf32> to vector<8x32xf32>
    %40 = arith.addf %38, %39 : vector<8x32xf32>
    %41 = arith.truncf %40 : vector<8x32xf32> to vector<8x32xbf16>
    %cst_37 = arith.constant dense<0.000000e+00> : vector<8x32xf32>
    %42 = tpu.matmul %21, %3, %cst_37 {dimension_numbers = #tpu.dot_dimension_numbers<[1], [0], [0], [1], [0, 0, 1, 1], [], []>} : vector<8x32xbf16>, vector<32x32xbf16>, vector<8x32xf32> -> vector<8x32xf32>
    %43 = vector.broadcast %11 : vector<1x32xf32> to vector<8x32xf32>
    %44 = arith.addf %42, %43 : vector<8x32xf32>
    %45 = arith.truncf %44 : vector<8x32xf32> to vector<8x32xbf16>
    %cst_38 = arith.constant dense<0.000000e+00> : vector<8x32xf32>
    %46 = tpu.matmul %24, %5, %cst_38 {dimension_numbers = #tpu.dot_dimension_numbers<[1], [0], [0], [1], [0, 0, 1, 1], [], []>} : vector<8x32xbf16>, vector<32x32xbf16>, vector<8x32xf32> -> vector<8x32xf32>
    %47 = vector.broadcast %13 : vector<1x32xf32> to vector<8x32xf32>
    %48 = arith.addf %46, %47 : vector<8x32xf32>
    %49 = arith.truncf %48 : vector<8x32xf32> to vector<8x32xbf16>
    %50 = vector.extract_strided_slice %41 {offsets = [0, 0], sizes = [8, 8], strides = [1, 1]} : vector<8x32xbf16> to vector<8x8xbf16>
    %51 = vector.extract_strided_slice %45 {offsets = [0, 0], sizes = [8, 8], strides = [1, 1]} : vector<8x32xbf16> to vector<8x8xbf16>
    %52 = vector.extract_strided_slice %49 {offsets = [0, 0], sizes = [8, 8], strides = [1, 1]} : vector<8x32xbf16> to vector<8x8xbf16>
    "tpu.trace_start"() <{level = 10 : i32, message = "td,sd->ts"}> : () -> ()
    %cst_39 = arith.constant dense<0.000000e+00> : vector<8x8xf32>
    %53 = tpu.matmul %50, %51, %cst_39 {dimension_numbers = #tpu.dot_dimension_numbers<[1], [1], [0], [0], [0, 0, 1, 0], [], []>} : vector<8x8xbf16>, vector<8x8xbf16>, vector<8x8xf32> -> vector<8x8xf32>
    "tpu.trace_stop"() : () -> ()
    %54 = vector.broadcast %31 : vector<1x8xf32> to vector<8x8xf32>
    %55 = arith.addf %53, %54 : vector<8x8xf32>
    %cst_40 = arith.constant dense<0xFF800000> : vector<8xf32>
    %56 = vector.multi_reduction <maximumf>, %55, %cst_40 [1] : vector<8x8xf32> to vector<8xf32>
    %57 = vector.shape_cast %56 : vector<8xf32> to vector<8x1xf32>
    %58 = vector.broadcast %57 : vector<8x1xf32> to vector<8x8xf32>
    %59 = arith.subf %55, %58 : vector<8x8xf32>
    %60 = math.exp %59 : vector<8x8xf32>
    %cst_41 = arith.constant dense<0.000000e+00> : vector<8xf32>
    %61 = vector.multi_reduction <add>, %60, %cst_41 [1] : vector<8x8xf32> to vector<8xf32>
    %62 = vector.shape_cast %61 : vector<8xf32> to vector<8x1xf32>
    %63 = tpu.reciprocal %62 {approx = true} : vector<8x1xf32> -> vector<8x1xf32>
    %64 = vector.broadcast %37 : vector<1x1xf32> to vector<8x1xf32>
    %65 = arith.mulf %63, %64 : vector<8x1xf32>
    %66 = arith.truncf %60 : vector<8x8xf32> to vector<8x8xbf16>
    %cst_42 = arith.constant dense<0.000000e+00> : vector<8x8xf32>
    %67 = tpu.matmul %66, %52, %cst_42 {dimension_numbers = #tpu.dot_dimension_numbers<[1], [0], [0], [1], [0, 0, 1, 1], [], []>} : vector<8x8xbf16>, vector<8x8xbf16>, vector<8x8xf32> -> vector<8x8xf32>
    %68 = vector.broadcast %65 : vector<8x1xf32> to vector<8x8xf32>
    %69 = arith.mulf %67, %68 : vector<8x8xf32>
    %70 = arith.truncf %69 : vector<8x8xf32> to vector<8x8xbf16>
    %c0_43 = arith.constant 0 : index
    %c0_44 = arith.constant 0 : index
    %71 = vector.load %arg8[%c0_43, %c0_44] : memref<8x32xbf16, #tpu.memory_space<vmem>>, vector<8x8xbf16>
    tpu.vector_store %arg8[%c0_43, %c0_44], %70 {strides = array<i32>} : memref<8x32xbf16, #tpu.memory_space<vmem>>, vector<8x8xbf16>,
    %72 = vector.extract_strided_slice %41 {offsets = [0, 8], sizes = [8, 8], strides = [1, 1]} : vector<8x32xbf16> to vector<8x8xbf16>
    %73 = vector.extract_strided_slice %45 {offsets = [0, 8], sizes = [8, 8], strides = [1, 1]} : vector<8x32xbf16> to vector<8x8xbf16>
    %74 = vector.extract_strided_slice %49 {offsets = [0, 8], sizes = [8, 8], strides = [1, 1]} : vector<8x32xbf16> to vector<8x8xbf16>
    "tpu.trace_start"() <{level = 10 : i32, message = "td,sd->ts"}> : () -> ()
    %cst_45 = arith.constant dense<0.000000e+00> : vector<8x8xf32>
    %75 = tpu.matmul %72, %73, %cst_45 {dimension_numbers = #tpu.dot_dimension_numbers<[1], [1], [0], [0], [0, 0, 1, 0], [], []>} : vector<8x8xbf16>, vector<8x8xbf16>, vector<8x8xf32> -> vector<8x8xf32>
    "tpu.trace_stop"() : () -> ()
    %76 = vector.broadcast %31 : vector<1x8xf32> to vector<8x8xf32>
    %77 = arith.addf %75, %76 : vector<8x8xf32>
    %cst_46 = arith.constant dense<0xFF800000> : vector<8xf32>
    %78 = vector.multi_reduction <maximumf>, %77, %cst_46 [1] : vector<8x8xf32> to vector<8xf32>
    %79 = vector.shape_cast %78 : vector<8xf32> to vector<8x1xf32>
    %80 = vector.broadcast %79 : vector<8x1xf32> to vector<8x8xf32>
    %81 = arith.subf %77, %80 : vector<8x8xf32>
    %82 = math.exp %81 : vector<8x8xf32>
    %cst_47 = arith.constant dense<0.000000e+00> : vector<8xf32>
    %83 = vector.multi_reduction <add>, %82, %cst_47 [1] : vector<8x8xf32> to vector<8xf32>
    %84 = vector.shape_cast %83 : vector<8xf32> to vector<8x1xf32>
    %85 = tpu.reciprocal %84 {approx = true} : vector<8x1xf32> -> vector<8x1xf32>
    %86 = vector.broadcast %37 : vector<1x1xf32> to vector<8x1xf32>
    %87 = arith.mulf %85, %86 : vector<8x1xf32>
    %88 = arith.truncf %82 : vector<8x8xf32> to vector<8x8xbf16>
    %cst_48 = arith.constant dense<0.000000e+00> : vector<8x8xf32>
    %89 = tpu.matmul %88, %74, %cst_48 {dimension_numbers = #tpu.dot_dimension_numbers<[1], [0], [0], [1], [0, 0, 1, 1], [], []>} : vector<8x8xbf16>, vector<8x8xbf16>, vector<8x8xf32> -> vector<8x8xf32>
    %90 = vector.broadcast %87 : vector<8x1xf32> to vector<8x8xf32>
    %91 = arith.mulf %89, %90 : vector<8x8xf32>
    %92 = arith.truncf %91 : vector<8x8xf32> to vector<8x8xbf16>
    %c0_49 = arith.constant 0 : index
    %c8 = arith.constant 8 : index
    %93 = vector.load %arg8[%c0_49, %c8] : memref<8x32xbf16, #tpu.memory_space<vmem>>, vector<8x8xbf16>
    tpu.vector_store %arg8[%c0_49, %c8], %92 {strides = array<i32>} : memref<8x32xbf16, #tpu.memory_space<vmem>>, vector<8x8xbf16>,
    %94 = vector.extract_strided_slice %41 {offsets = [0, 16], sizes = [8, 8], strides = [1, 1]} : vector<8x32xbf16> to vector<8x8xbf16>
    %95 = vector.extract_strided_slice %45 {offsets = [0, 16], sizes = [8, 8], strides = [1, 1]} : vector<8x32xbf16> to vector<8x8xbf16>
    %96 = vector.extract_strided_slice %49 {offsets = [0, 16], sizes = [8, 8], strides = [1, 1]} : vector<8x32xbf16> to vector<8x8xbf16>
    "tpu.trace_start"() <{level = 10 : i32, message = "td,sd->ts"}> : () -> ()
    %cst_50 = arith.constant dense<0.000000e+00> : vector<8x8xf32>
    %97 = tpu.matmul %94, %95, %cst_50 {dimension_numbers = #tpu.dot_dimension_numbers<[1], [1], [0], [0], [0, 0, 1, 0], [], []>} : vector<8x8xbf16>, vector<8x8xbf16>, vector<8x8xf32> -> vector<8x8xf32>
    "tpu.trace_stop"() : () -> ()
    %98 = vector.broadcast %31 : vector<1x8xf32> to vector<8x8xf32>
    %99 = arith.addf %97, %98 : vector<8x8xf32>
    %cst_51 = arith.constant dense<0xFF800000> : vector<8xf32>
    %100 = vector.multi_reduction <maximumf>, %99, %cst_51 [1] : vector<8x8xf32> to vector<8xf32>
    %101 = vector.shape_cast %100 : vector<8xf32> to vector<8x1xf32>
    %102 = vector.broadcast %101 : vector<8x1xf32> to vector<8x8xf32>
    %103 = arith.subf %99, %102 : vector<8x8xf32>
    %104 = math.exp %103 : vector<8x8xf32>
    %cst_52 = arith.constant dense<0.000000e+00> : vector<8xf32>
    %105 = vector.multi_reduction <add>, %104, %cst_52 [1] : vector<8x8xf32> to vector<8xf32>
    %106 = vector.shape_cast %105 : vector<8xf32> to vector<8x1xf32>
    %107 = tpu.reciprocal %106 {approx = true} : vector<8x1xf32> -> vector<8x1xf32>
    %108 = vector.broadcast %37 : vector<1x1xf32> to vector<8x1xf32>
    %109 = arith.mulf %107, %108 : vector<8x1xf32>
    %110 = arith.truncf %104 : vector<8x8xf32> to vector<8x8xbf16>
    %cst_53 = arith.constant dense<0.000000e+00> : vector<8x8xf32>
    %111 = tpu.matmul %110, %96, %cst_53 {dimension_numbers = #tpu.dot_dimension_numbers<[1], [0], [0], [1], [0, 0, 1, 1], [], []>} : vector<8x8xbf16>, vector<8x8xbf16>, vector<8x8xf32> -> vector<8x8xf32>
    %112 = vector.broadcast %109 : vector<8x1xf32> to vector<8x8xf32>
    %113 = arith.mulf %111, %112 : vector<8x8xf32>
    %114 = arith.truncf %113 : vector<8x8xf32> to vector<8x8xbf16>
    %c0_54 = arith.constant 0 : index
    %c16 = arith.constant 16 : index
    %115 = vector.load %arg8[%c0_54, %c16] : memref<8x32xbf16, #tpu.memory_space<vmem>>, vector<8x8xbf16>
    tpu.vector_store %arg8[%c0_54, %c16], %114 {strides = array<i32>} : memref<8x32xbf16, #tpu.memory_space<vmem>>, vector<8x8xbf16>,
    %116 = vector.extract_strided_slice %41 {offsets = [0, 24], sizes = [8, 8], strides = [1, 1]} : vector<8x32xbf16> to vector<8x8xbf16>
    %117 = vector.extract_strided_slice %45 {offsets = [0, 24], sizes = [8, 8], strides = [1, 1]} : vector<8x32xbf16> to vector<8x8xbf16>
    %118 = vector.extract_strided_slice %49 {offsets = [0, 24], sizes = [8, 8], strides = [1, 1]} : vector<8x32xbf16> to vector<8x8xbf16>
    "tpu.trace_start"() <{level = 10 : i32, message = "td,sd->ts"}> : () -> ()
    %cst_55 = arith.constant dense<0.000000e+00> : vector<8x8xf32>
    %119 = tpu.matmul %116, %117, %cst_55 {dimension_numbers = #tpu.dot_dimension_numbers<[1], [1], [0], [0], [0, 0, 1, 0], [], []>} : vector<8x8xbf16>, vector<8x8xbf16>, vector<8x8xf32> -> vector<8x8xf32>
    "tpu.trace_stop"() : () -> ()
    %120 = vector.broadcast %31 : vector<1x8xf32> to vector<8x8xf32>
    %121 = arith.addf %119, %120 : vector<8x8xf32>
    %cst_56 = arith.constant dense<0xFF800000> : vector<8xf32>
    %122 = vector.multi_reduction <maximumf>, %121, %cst_56 [1] : vector<8x8xf32> to vector<8xf32>
    %123 = vector.shape_cast %122 : vector<8xf32> to vector<8x1xf32>
    %124 = vector.broadcast %123 : vector<8x1xf32> to vector<8x8xf32>
    %125 = arith.subf %121, %124 : vector<8x8xf32>
    %126 = math.exp %125 : vector<8x8xf32>
    %cst_57 = arith.constant dense<0.000000e+00> : vector<8xf32>
    %127 = vector.multi_reduction <add>, %126, %cst_57 [1] : vector<8x8xf32> to vector<8xf32>
    %128 = vector.shape_cast %127 : vector<8xf32> to vector<8x1xf32>
    %129 = tpu.reciprocal %128 {approx = true} : vector<8x1xf32> -> vector<8x1xf32>
    %130 = vector.broadcast %37 : vector<1x1xf32> to vector<8x1xf32>
    %131 = arith.mulf %129, %130 : vector<8x1xf32>
    %132 = arith.truncf %126 : vector<8x8xf32> to vector<8x8xbf16>
    %cst_58 = arith.constant dense<0.000000e+00> : vector<8x8xf32>
    %133 = tpu.matmul %132, %118, %cst_58 {dimension_numbers = #tpu.dot_dimension_numbers<[1], [0], [0], [1], [0, 0, 1, 1], [], []>} : vector<8x8xbf16>, vector<8x8xbf16>, vector<8x8xf32> -> vector<8x8xf32>
    %134 = vector.broadcast %131 : vector<8x1xf32> to vector<8x8xf32>
    %135 = arith.mulf %133, %134 : vector<8x8xf32>
    %136 = arith.truncf %135 : vector<8x8xf32> to vector<8x8xbf16>
    %c0_59 = arith.constant 0 : index
    %c24 = arith.constant 24 : index
    %137 = vector.load %arg8[%c0_59, %c24] : memref<8x32xbf16, #tpu.memory_space<vmem>>, vector<8x8xbf16>
    tpu.vector_store %arg8[%c0_59, %c24], %136 {strides = array<i32>} : memref<8x32xbf16, #tpu.memory_space<vmem>>, vector<8x8xbf16>,
    %c0_60 = arith.constant 0 : index
    %c0_61 = arith.constant 0 : index
    %138 = vector.load %arg8[%c0_60, %c0_61] : memref<8x32xbf16, #tpu.memory_space<vmem>>, vector<8x32xbf16>
    %cst_62 = arith.constant dense<0.000000e+00> : vector<8x32xf32>
    %139 = tpu.matmul %138, %7, %cst_62 {dimension_numbers = #tpu.dot_dimension_numbers<[1], [0], [0], [1], [0, 0, 1, 1], [], []>} : vector<8x32xbf16>, vector<32x32xbf16>, vector<8x32xf32> -> vector<8x32xf32>
    %140 = vector.broadcast %15 : vector<1x32xf32> to vector<8x32xf32>
    %141 = arith.addf %139, %140 : vector<8x32xf32>
    %c0_63 = arith.constant 0 : index
    %c0_64 = arith.constant 0 : index
    %c0_65 = arith.constant 0 : index
    %142 = vector.load %arg7[%c0_63, %c0_64, %c0_65] : memref<2x8x32xf32, #tpu.memory_space<vmem>>, vector<1x8x32xf32>
    %143 = vector.shape_cast %142 : vector<1x8x32xf32> to vector<8x32xf32>
    %144 = vector.shape_cast %141 : vector<8x32xf32> to vector<1x8x32xf32>
    tpu.vector_store %arg7[%c0_63, %c0_64, %c0_65], %144 {strides = array<i32>} : memref<2x8x32xf32, #tpu.memory_space<vmem>>, vector<1x8x32xf32>,
    %c1_66 = arith.constant 1 : index
    %c0_67 = arith.constant 0 : index
    %c0_68 = arith.constant 0 : index
    %145 = vector.load %arg1[%c1_66, %c0_67, %c0_68] : memref<2x8x32xf32, #tpu.memory_space<vmem>>, vector<1x8x32xf32>
    %146 = vector.shape_cast %145 : vector<1x8x32xf32> to vector<8x32xf32>
    %147 = arith.truncf %146 : vector<8x32xf32> to vector<8x32xbf16>
    %c1_69 = arith.constant 1 : index
    %c0_70 = arith.constant 0 : index
    %c0_71 = arith.constant 0 : index
    %148 = vector.load %arg2[%c1_69, %c0_70, %c0_71] : memref<2x8x32xf32, #tpu.memory_space<vmem>>, vector<1x8x32xf32>
    %149 = vector.shape_cast %148 : vector<1x8x32xf32> to vector<8x32xf32>
    %150 = arith.truncf %149 : vector<8x32xf32> to vector<8x32xbf16>
    %c1_72 = arith.constant 1 : index
    %c0_73 = arith.constant 0 : index
    %c0_74 = arith.constant 0 : index
    %151 = vector.load %arg3[%c1_72, %c0_73, %c0_74] : memref<2x8x32xf32, #tpu.memory_space<vmem>>, vector<1x8x32xf32>
    %152 = vector.shape_cast %151 : vector<1x8x32xf32> to vector<8x32xf32>
    %153 = arith.truncf %152 : vector<8x32xf32> to vector<8x32xbf16>
    %c1_75 = arith.constant 1 : index
    %c0_76 = arith.constant 0 : index
    %c0_77 = arith.constant 0 : index
    %154 = vector.load %arg4[%c1_75, %c0_76, %c0_77] : memref<2x1x8xf32, #tpu.memory_space<vmem>>, vector<1x1x8xf32>
    %155 = vector.shape_cast %154 : vector<1x1x8xf32> to vector<1x8xf32>
    %cst_78 = arith.constant 0.000000e+00 : f32
    %156 = vector.broadcast %cst_78 : f32 to vector<1x8xf32>
    %157 = arith.cmpf oeq, %155, %156 : vector<1x8xf32>
    %cst_79 = arith.constant -1.000000e+30 : f32
    %cst_80 = arith.constant 0.000000e+00 : f32
    %158 = vector.broadcast %cst_79 : f32 to vector<1x8xf32>
    %159 = vector.broadcast %cst_80 : f32 to vector<1x8xf32>
    %160 = arith.select %157, %158, %159 : vector<1x8xi1>, vector<1x8xf32>
    %cst_81 = arith.constant dense<0xFF800000> : vector<1xf32>
    %161 = vector.multi_reduction <maximumf>, %160, %cst_81 [1] : vector<1x8xf32> to vector<1xf32>
    %162 = vector.shape_cast %161 : vector<1xf32> to vector<1x1xf32>
    %cst_82 = arith.constant 0.000000e+00 : f32
    %163 = vector.broadcast %cst_82 : f32 to vector<1x1xf32>
    %164 = arith.cmpf oeq, %162, %163 : vector<1x1xf32>
    %165 = arith.extui %164 : vector<1x1xi1> to vector<1x1xi32>
    %166 = arith.sitofp %165 : vector<1x1xi32> to vector<1x1xf32>
    %cst_83 = arith.constant dense<0.000000e+00> : vector<8x32xf32>
    %167 = tpu.matmul %147, %1, %cst_83 {dimension_numbers = #tpu.dot_dimension_numbers<[1], [0], [0], [1], [0, 0, 1, 1], [], []>} : vector<8x32xbf16>, vector<32x32xbf16>, vector<8x32xf32> -> vector<8x32xf32>
    %168 = vector.broadcast %9 : vector<1x32xf32> to vector<8x32xf32>
    %169 = arith.addf %167, %168 : vector<8x32xf32>
    %170 = arith.truncf %169 : vector<8x32xf32> to vector<8x32xbf16>
    %cst_84 = arith.constant dense<0.000000e+00> : vector<8x32xf32>
    %171 = tpu.matmul %150, %3, %cst_84 {dimension_numbers = #tpu.dot_dimension_numbers<[1], [0], [0], [1], [0, 0, 1, 1], [], []>} : vector<8x32xbf16>, vector<32x32xbf16>, vector<8x32xf32> -> vector<8x32xf32>
    %172 = vector.broadcast %11 : vector<1x32xf32> to vector<8x32xf32>
    %173 = arith.addf %171, %172 : vector<8x32xf32>
    %174 = arith.truncf %173 : vector<8x32xf32> to vector<8x32xbf16>
    %cst_85 = arith.constant dense<0.000000e+00> : vector<8x32xf32>
    %175 = tpu.matmul %153, %5, %cst_85 {dimension_numbers = #tpu.dot_dimension_numbers<[1], [0], [0], [1], [0, 0, 1, 1], [], []>} : vector<8x32xbf16>, vector<32x32xbf16>, vector<8x32xf32> -> vector<8x32xf32>
    %176 = vector.broadcast %13 : vector<1x32xf32> to vector<8x32xf32>
    %177 = arith.addf %175, %176 : vector<8x32xf32>
    %178 = arith.truncf %177 : vector<8x32xf32> to vector<8x32xbf16>
    %179 = vector.extract_strided_slice %170 {offsets = [0, 0], sizes = [8, 8], strides = [1, 1]} : vector<8x32xbf16> to vector<8x8xbf16>
    %180 = vector.extract_strided_slice %174 {offsets = [0, 0], sizes = [8, 8], strides = [1, 1]} : vector<8x32xbf16> to vector<8x8xbf16>
    %181 = vector.extract_strided_slice %178 {offsets = [0, 0], sizes = [8, 8], strides = [1, 1]} : vector<8x32xbf16> to vector<8x8xbf16>
    "tpu.trace_start"() <{level = 10 : i32, message = "td,sd->ts"}> : () -> ()
    %cst_86 = arith.constant dense<0.000000e+00> : vector<8x8xf32>
    %182 = tpu.matmul %179, %180, %cst_86 {dimension_numbers = #tpu.dot_dimension_numbers<[1], [1], [0], [0], [0, 0, 1, 0], [], []>} : vector<8x8xbf16>, vector<8x8xbf16>, vector<8x8xf32> -> vector<8x8xf32>
    "tpu.trace_stop"() : () -> ()
    %183 = vector.broadcast %160 : vector<1x8xf32> to vector<8x8xf32>
    %184 = arith.addf %182, %183 : vector<8x8xf32>
    %cst_87 = arith.constant dense<0xFF800000> : vector<8xf32>
    %185 = vector.multi_reduction <maximumf>, %184, %cst_87 [1] : vector<8x8xf32> to vector<8xf32>
    %186 = vector.shape_cast %185 : vector<8xf32> to vector<8x1xf32>
    %187 = vector.broadcast %186 : vector<8x1xf32> to vector<8x8xf32>
    %188 = arith.subf %184, %187 : vector<8x8xf32>
    %189 = math.exp %188 : vector<8x8xf32>
    %cst_88 = arith.constant dense<0.000000e+00> : vector<8xf32>
    %190 = vector.multi_reduction <add>, %189, %cst_88 [1] : vector<8x8xf32> to vector<8xf32>
    %191 = vector.shape_cast %190 : vector<8xf32> to vector<8x1xf32>
    %192 = tpu.reciprocal %191 {approx = true} : vector<8x1xf32> -> vector<8x1xf32>
    %193 = vector.broadcast %166 : vector<1x1xf32> to vector<8x1xf32>
    %194 = arith.mulf %192, %193 : vector<8x1xf32>
    %195 = arith.truncf %189 : vector<8x8xf32> to vector<8x8xbf16>
    %cst_89 = arith.constant dense<0.000000e+00> : vector<8x8xf32>
    %196 = tpu.matmul %195, %181, %cst_89 {dimension_numbers = #tpu.dot_dimension_numbers<[1], [0], [0], [1], [0, 0, 1, 1], [], []>} : vector<8x8xbf16>, vector<8x8xbf16>, vector<8x8xf32> -> vector<8x8xf32>
    %197 = vector.broadcast %194 : vector<8x1xf32> to vector<8x8xf32>
    %198 = arith.mulf %196, %197 : vector<8x8xf32>
    %199 = arith.truncf %198 : vector<8x8xf32> to vector<8x8xbf16>
    %c0_90 = arith.constant 0 : index
    %c0_91 = arith.constant 0 : index
    %200 = vector.load %arg8[%c0_90, %c0_91] : memref<8x32xbf16, #tpu.memory_space<vmem>>, vector<8x8xbf16>
    tpu.vector_store %arg8[%c0_90, %c0_91], %199 {strides = array<i32>} : memref<8x32xbf16, #tpu.memory_space<vmem>>, vector<8x8xbf16>,
    %201 = vector.extract_strided_slice %170 {offsets = [0, 8], sizes = [8, 8], strides = [1, 1]} : vector<8x32xbf16> to vector<8x8xbf16>
    %202 = vector.extract_strided_slice %174 {offsets = [0, 8], sizes = [8, 8], strides = [1, 1]} : vector<8x32xbf16> to vector<8x8xbf16>
    %203 = vector.extract_strided_slice %178 {offsets = [0, 8], sizes = [8, 8], strides = [1, 1]} : vector<8x32xbf16> to vector<8x8xbf16>
    "tpu.trace_start"() <{level = 10 : i32, message = "td,sd->ts"}> : () -> ()
    %cst_92 = arith.constant dense<0.000000e+00> : vector<8x8xf32>
    %204 = tpu.matmul %201, %202, %cst_92 {dimension_numbers = #tpu.dot_dimension_numbers<[1], [1], [0], [0], [0, 0, 1, 0], [], []>} : vector<8x8xbf16>, vector<8x8xbf16>, vector<8x8xf32> -> vector<8x8xf32>
    "tpu.trace_stop"() : () -> ()
    %205 = vector.broadcast %160 : vector<1x8xf32> to vector<8x8xf32>
    %206 = arith.addf %204, %205 : vector<8x8xf32>
    %cst_93 = arith.constant dense<0xFF800000> : vector<8xf32>
    %207 = vector.multi_reduction <maximumf>, %206, %cst_93 [1] : vector<8x8xf32> to vector<8xf32>
    %208 = vector.shape_cast %207 : vector<8xf32> to vector<8x1xf32>
    %209 = vector.broadcast %208 : vector<8x1xf32> to vector<8x8xf32>
    %210 = arith.subf %206, %209 : vector<8x8xf32>
    %211 = math.exp %210 : vector<8x8xf32>
    %cst_94 = arith.constant dense<0.000000e+00> : vector<8xf32>
    %212 = vector.multi_reduction <add>, %211, %cst_94 [1] : vector<8x8xf32> to vector<8xf32>
    %213 = vector.shape_cast %212 : vector<8xf32> to vector<8x1xf32>
    %214 = tpu.reciprocal %213 {approx = true} : vector<8x1xf32> -> vector<8x1xf32>
    %215 = vector.broadcast %166 : vector<1x1xf32> to vector<8x1xf32>
    %216 = arith.mulf %214, %215 : vector<8x1xf32>
    %217 = arith.truncf %211 : vector<8x8xf32> to vector<8x8xbf16>
    %cst_95 = arith.constant dense<0.000000e+00> : vector<8x8xf32>
    %218 = tpu.matmul %217, %203, %cst_95 {dimension_numbers = #tpu.dot_dimension_numbers<[1], [0], [0], [1], [0, 0, 1, 1], [], []>} : vector<8x8xbf16>, vector<8x8xbf16>, vector<8x8xf32> -> vector<8x8xf32>
    %219 = vector.broadcast %216 : vector<8x1xf32> to vector<8x8xf32>
    %220 = arith.mulf %218, %219 : vector<8x8xf32>
    %221 = arith.truncf %220 : vector<8x8xf32> to vector<8x8xbf16>
    %c0_96 = arith.constant 0 : index
    %c8_97 = arith.constant 8 : index
    %222 = vector.load %arg8[%c0_96, %c8_97] : memref<8x32xbf16, #tpu.memory_space<vmem>>, vector<8x8xbf16>
    tpu.vector_store %arg8[%c0_96, %c8_97], %221 {strides = array<i32>} : memref<8x32xbf16, #tpu.memory_space<vmem>>, vector<8x8xbf16>,
    %223 = vector.extract_strided_slice %170 {offsets = [0, 16], sizes = [8, 8], strides = [1, 1]} : vector<8x32xbf16> to vector<8x8xbf16>
    %224 = vector.extract_strided_slice %174 {offsets = [0, 16], sizes = [8, 8], strides = [1, 1]} : vector<8x32xbf16> to vector<8x8xbf16>
    %225 = vector.extract_strided_slice %178 {offsets = [0, 16], sizes = [8, 8], strides = [1, 1]} : vector<8x32xbf16> to vector<8x8xbf16>
    "tpu.trace_start"() <{level = 10 : i32, message = "td,sd->ts"}> : () -> ()
    %cst_98 = arith.constant dense<0.000000e+00> : vector<8x8xf32>
    %226 = tpu.matmul %223, %224, %cst_98 {dimension_numbers = #tpu.dot_dimension_numbers<[1], [1], [0], [0], [0, 0, 1, 0], [], []>} : vector<8x8xbf16>, vector<8x8xbf16>, vector<8x8xf32> -> vector<8x8xf32>
    "tpu.trace_stop"() : () -> ()
    %227 = vector.broadcast %160 : vector<1x8xf32> to vector<8x8xf32>
    %228 = arith.addf %226, %227 : vector<8x8xf32>
    %cst_99 = arith.constant dense<0xFF800000> : vector<8xf32>
    %229 = vector.multi_reduction <maximumf>, %228, %cst_99 [1] : vector<8x8xf32> to vector<8xf32>
    %230 = vector.shape_cast %229 : vector<8xf32> to vector<8x1xf32>
    %231 = vector.broadcast %230 : vector<8x1xf32> to vector<8x8xf32>
    %232 = arith.subf %228, %231 : vector<8x8xf32>
    %233 = math.exp %232 : vector<8x8xf32>
    %cst_100 = arith.constant dense<0.000000e+00> : vector<8xf32>
    %234 = vector.multi_reduction <add>, %233, %cst_100 [1] : vector<8x8xf32> to vector<8xf32>
    %235 = vector.shape_cast %234 : vector<8xf32> to vector<8x1xf32>
    %236 = tpu.reciprocal %235 {approx = true} : vector<8x1xf32> -> vector<8x1xf32>
    %237 = vector.broadcast %166 : vector<1x1xf32> to vector<8x1xf32>
    %238 = arith.mulf %236, %237 : vector<8x1xf32>
    %239 = arith.truncf %233 : vector<8x8xf32> to vector<8x8xbf16>
    %cst_101 = arith.constant dense<0.000000e+00> : vector<8x8xf32>
    %240 = tpu.matmul %239, %225, %cst_101 {dimension_numbers = #tpu.dot_dimension_numbers<[1], [0], [0], [1], [0, 0, 1, 1], [], []>} : vector<8x8xbf16>, vector<8x8xbf16>, vector<8x8xf32> -> vector<8x8xf32>
    %241 = vector.broadcast %238 : vector<8x1xf32> to vector<8x8xf32>
    %242 = arith.mulf %240, %241 : vector<8x8xf32>
    %243 = arith.truncf %242 : vector<8x8xf32> to vector<8x8xbf16>
    %c0_102 = arith.constant 0 : index
    %c16_103 = arith.constant 16 : index
    %244 = vector.load %arg8[%c0_102, %c16_103] : memref<8x32xbf16, #tpu.memory_space<vmem>>, vector<8x8xbf16>
    tpu.vector_store %arg8[%c0_102, %c16_103], %243 {strides = array<i32>} : memref<8x32xbf16, #tpu.memory_space<vmem>>, vector<8x8xbf16>,
    %245 = vector.extract_strided_slice %170 {offsets = [0, 24], sizes = [8, 8], strides = [1, 1]} : vector<8x32xbf16> to vector<8x8xbf16>
    %246 = vector.extract_strided_slice %174 {offsets = [0, 24], sizes = [8, 8], strides = [1, 1]} : vector<8x32xbf16> to vector<8x8xbf16>
    %247 = vector.extract_strided_slice %178 {offsets = [0, 24], sizes = [8, 8], strides = [1, 1]} : vector<8x32xbf16> to vector<8x8xbf16>
    "tpu.trace_start"() <{level = 10 : i32, message = "td,sd->ts"}> : () -> ()
    %cst_104 = arith.constant dense<0.000000e+00> : vector<8x8xf32>
    %248 = tpu.matmul %245, %246, %cst_104 {dimension_numbers = #tpu.dot_dimension_numbers<[1], [1], [0], [0], [0, 0, 1, 0], [], []>} : vector<8x8xbf16>, vector<8x8xbf16>, vector<8x8xf32> -> vector<8x8xf32>
    "tpu.trace_stop"() : () -> ()
    %249 = vector.broadcast %160 : vector<1x8xf32> to vector<8x8xf32>
    %250 = arith.addf %248, %249 : vector<8x8xf32>
    %cst_105 = arith.constant dense<0xFF800000> : vector<8xf32>
    %251 = vector.multi_reduction <maximumf>, %250, %cst_105 [1] : vector<8x8xf32> to vector<8xf32>
    %252 = vector.shape_cast %251 : vector<8xf32> to vector<8x1xf32>
    %253 = vector.broadcast %252 : vector<8x1xf32> to vector<8x8xf32>
    %254 = arith.subf %250, %253 : vector<8x8xf32>
    %255 = math.exp %254 : vector<8x8xf32>
    %cst_106 = arith.constant dense<0.000000e+00> : vector<8xf32>
    %256 = vector.multi_reduction <add>, %255, %cst_106 [1] : vector<8x8xf32> to vector<8xf32>
    %257 = vector.shape_cast %256 : vector<8xf32> to vector<8x1xf32>
    %258 = tpu.reciprocal %257 {approx = true} : vector<8x1xf32> -> vector<8x1xf32>
    %259 = vector.broadcast %166 : vector<1x1xf32> to vector<8x1xf32>
    %260 = arith.mulf %258, %259 : vector<8x1xf32>
    %261 = arith.truncf %255 : vector<8x8xf32> to vector<8x8xbf16>
    %cst_107 = arith.constant dense<0.000000e+00> : vector<8x8xf32>
    %262 = tpu.matmul %261, %247, %cst_107 {dimension_numbers = #tpu.dot_dimension_numbers<[1], [0], [0], [1], [0, 0, 1, 1], [], []>} : vector<8x8xbf16>, vector<8x8xbf16>, vector<8x8xf32> -> vector<8x8xf32>
    %263 = vector.broadcast %260 : vector<8x1xf32> to vector<8x8xf32>
    %264 = arith.mulf %262, %263 : vector<8x8xf32>
    %265 = arith.truncf %264 : vector<8x8xf32> to vector<8x8xbf16>
    %c0_108 = arith.constant 0 : index
    %c24_109 = arith.constant 24 : index
    %266 = vector.load %arg8[%c0_108, %c24_109] : memref<8x32xbf16, #tpu.memory_space<vmem>>, vector<8x8xbf16>
    tpu.vector_store %arg8[%c0_108, %c24_109], %265 {strides = array<i32>} : memref<8x32xbf16, #tpu.memory_space<vmem>>, vector<8x8xbf16>,
    %c0_110 = arith.constant 0 : index
    %c0_111 = arith.constant 0 : index
    %267 = vector.load %arg8[%c0_110, %c0_111] : memref<8x32xbf16, #tpu.memory_space<vmem>>, vector<8x32xbf16>
    %cst_112 = arith.constant dense<0.000000e+00> : vector<8x32xf32>
    %268 = tpu.matmul %267, %7, %cst_112 {dimension_numbers = #tpu.dot_dimension_numbers<[1], [0], [0], [1], [0, 0, 1, 1], [], []>} : vector<8x32xbf16>, vector<32x32xbf16>, vector<8x32xf32> -> vector<8x32xf32>
    %269 = vector.broadcast %15 : vector<1x32xf32> to vector<8x32xf32>
    %270 = arith.addf %268, %269 : vector<8x32xf32>
    %c1_113 = arith.constant 1 : index
    %c0_114 = arith.constant 0 : index
    %c0_115 = arith.constant 0 : index
    %271 = vector.load %arg7[%c1_113, %c0_114, %c0_115] : memref<2x8x32xf32, #tpu.memory_space<vmem>>, vector<1x8x32xf32>
    %272 = vector.shape_cast %271 : vector<1x8x32xf32> to vector<8x32xf32>
    %273 = vector.shape_cast %270 : vector<8x32xf32> to vector<1x8x32xf32>
    tpu.vector_store %arg7[%c1_113, %c0_114, %c0_115], %273 {strides = array<i32>} : memref<2x8x32xf32, #tpu.memory_space<vmem>>, vector<1x8x32xf32>,
    return
  }
  func.func @transform_0(%arg0: i32) -> (i32, i32, i32) {
    %c0_i32 = arith.constant 0 : i32
    %c0_i32_0 = arith.constant 0 : i32
    %c0_i32_1 = arith.constant 0 : i32
    return %arg0, %c0_i32, %c0_i32_0 : i32, i32, i32
  }
  func.func @transform_1(%arg0: i32) -> (i32, i32, i32) {
    %c0_i32 = arith.constant 0 : i32
    %c0_i32_0 = arith.constant 0 : i32
    %c0_i32_1 = arith.constant 0 : i32
    return %arg0, %c0_i32, %c0_i32_0 : i32, i32, i32
  }
  func.func @transform_2(%arg0: i32) -> (i32, i32, i32) {
    %c0_i32 = arith.constant 0 : i32
    %c0_i32_0 = arith.constant 0 : i32
    %c0_i32_1 = arith.constant 0 : i32
    return %arg0, %c0_i32, %c0_i32_0 : i32, i32, i32
  }
  func.func @transform_3(%arg0: i32) -> (i32, i32, i32) {
    %c0_i32 = arith.constant 0 : i32
    %c0_i32_0 = arith.constant 0 : i32
    %c0_i32_1 = arith.constant 0 : i32
    return %arg0, %c0_i32, %c0_i32_0 : i32, i32, i32
  }
  func.func @transform_4(%arg0: i32) -> (i32, i32, i32) {
    %c0_i32 = arith.constant 0 : i32
    %c0_i32_0 = arith.constant 0 : i32
    %c0_i32_1 = arith.constant 0 : i32
    %c0_i32_2 = arith.constant 0 : i32
    return %c0_i32, %c0_i32_0, %c0_i32_1 : i32, i32, i32
  }
  func.func @transform_5(%arg0: i32) -> (i32, i32, i32) {
    %c0_i32 = arith.constant 0 : i32
    %c0_i32_0 = arith.constant 0 : i32
    %c0_i32_1 = arith.constant 0 : i32
    %c0_i32_2 = arith.constant 0 : i32
    return %c0_i32, %c0_i32_0, %c0_i32_1 : i32, i32, i32
  }
  func.func @transform_6(%arg0: i32) -> (i32, i32, i32) {
    %c0_i32 = arith.constant 0 : i32
    %c0_i32_0 = arith.constant 0 : i32
    %c0_i32_1 = arith.constant 0 : i32
    return %arg0, %c0_i32, %c0_i32_0 : i32, i32, i32
  }
}

</mosaic_0001>

<bundles_post_ra>
// kernel: tpu_custom_call.1
= control target key start
LH: loop header
LB: loop body
LE: loop exit
PB: predicated region body
PF: predicated region fallthrough
CT: control target
= control target key end

     0   :  { %11 = vsyncpa [#allocation4], 0  ;;  %s2391_s0 = inlined_call_operand.hbm [shape: f32[2,8,32], index: 0, kind: input, shape index: {}]   ;;  %s2392_s1 = inlined_call_operand.hbm [shape: f32[2,8,32], index: 1, kind: input, shape index: {}]   ;;  %s2393_s2 = inlined_call_operand.hbm [shape: f32[2,8,32], index: 2, kind: input, shape index: {}]   ;;  %s2394_s3 = inlined_call_operand.vmem [shape: f32[2,1,8], index: 3, kind: input, shape index: {}]   ;;  %s2395_s4 = inlined_call_operand.hbm [shape: bf16[4,32,32], index: 4, kind: input, shape index: {}]   ;;  %s2396_s5 = inlined_call_operand.vmem [shape: f32[4,1,32], index: 5, kind: input, shape index: {}]   ;;  %s2397_s6 = inlined_call_operand.hbm [shape: f32[2,8,32], index: 6, kind: output, shape index: {}]  }
   0x1   :  { %12 = vsyncpa [#allocation7], 0 }
   0x2   :  { %13 = vsyncpa [#allocation10], 0 }
   0x3   :  { %14 = vsyncpa [#allocation5], 0  ;;  %s1992_s21 = smov [#allocation6]   ;;  %s1993_s23 = smov [#allocation3]  }
   0x4   :  { %s32_s22 = sshll.u32 %s1992_s21, 4  ;;  %s20_s24 = sshll.u32 %s1993_s23, 4  ;;  %s33_s22 = int_to_ptr.vmem [resolvable:$true] %s32_s22  ;;  %s2043_s24 = int_to_ptr.vmem [resolvable:$true] %s20_s24 }
   0x5   :  { %s1874_s27 = scalar_lea.hbm %s2392_s1, 256 }
   0x6   :  { %p1875_p0 = scmp.ne.s32.totalorder %s2392_s1, %s1874_s27  ;;  %p1878_p1 = scmp.lt.u32.totalorder %s1874_s27, %s2392_s1 }
   0x8   :  { %p1880_p2 = pnand %p1878_p1, %p1875_p0 }
   0xa   :  { %1883 = shalt.err (!%p1880_p2)
}
   0xb   :  { %s1884_s8 = scalar_lea.vmem %s33_s22, 256  ;;  %p1889_p4 = scmp.lt.s32.totalorder %s33_s22, %s33_s22 }
   0xc   :  { %p1885_p3 = scmp.ne.s32.totalorder %s33_s22, %s1884_s8  ;;  %p1890_p5 = scmp.lt.s32.totalorder %s1884_s8, %s1884_s8 }
   0xe   :  { %p1891_p6 = por %p1890_p5, %p1889_p4 }
  0x10   :  { %p1892_p7 = pnand %p1891_p6, %p1885_p3 }
  0x12   :  { %1895 = shalt.err (!%p1892_p7)
}
  0x13   :  { %s1994_s9 = smov 128   ;;  %s1995_s10 = smov 8  }
  0x14   :  { %38 = dma.hbm_to_vmem [thread:$0]  %s2392_s1, 256, %s33_s22, [#allocation7], %s1994_s9, %s1994_s9, %s1995_s10  }
  0x15   :  { %s1896_s15 = scalar_lea.hbm %s2391_s0, 256 }
  0x16   :  { %p1897_p8 = scmp.ne.s32.totalorder %s2391_s0, %s1896_s15  ;;  %p1900_p9 = scmp.lt.u32.totalorder %s1896_s15, %s2391_s0 }
  0x18   :  { %p1902_p10 = pnand %p1900_p9, %p1897_p8 }
  0x1a   :  { %1905 = shalt.err (!%p1902_p10)
}
  0x1b   :  { %s1906_s20 = scalar_lea.vmem %s2043_s24, 256  ;;  %p1911_p12 = scmp.lt.s32.totalorder %s2043_s24, %s2043_s24 }
  0x1c   :  { %p1907_p11 = scmp.ne.s32.totalorder %s2043_s24, %s1906_s20  ;;  %p1912_p13 = scmp.lt.s32.totalorder %s1906_s20, %s1906_s20 }
  0x1e   :  { %p1913_p0 = por %p1912_p13, %p1911_p12 }
  0x20   :  { %p1914_p1 = pnand %p1913_p0, %p1907_p11 }
  0x22   :  { %1917 = shalt.err (!%p1914_p1)
}
  0x23   :  { %26 = dma.hbm_to_vmem [thread:$0]  %s2391_s0, 256, %s2043_s24, [#allocation4], %s1994_s9, %s1994_s9, %s1995_s10  }
  0x24   :  { %s1996_s22 = smov [#allocation8]   ;;  %s1997_s25 = smov [#allocation9]  }
  0x25   :  { %s44_s23 = sshll.u32 %s1996_s22, 4  ;;  %s58_s26 = sshll.u32 %s1997_s25, 4  ;;  %s45_s23 = int_to_ptr.vmem [resolvable:$true] %s44_s23  ;;  %s2080_s26 = int_to_ptr.vmem [resolvable:$true] %s58_s26 }
  0x26   :  { %s1918_s29 = scalar_lea.hbm %s2393_s2, 256 }
  0x27   :  { %p1919_p2 = scmp.ne.s32.totalorder %s2393_s2, %s1918_s29  ;;  %p1922_p3 = scmp.lt.u32.totalorder %s1918_s29, %s2393_s2 }
  0x29   :  { %p1924_p4 = pnand %p1922_p3, %p1919_p2 }
  0x2b   :  { %1927 = shalt.err (!%p1924_p4)
}
  0x2c   :  { %s1928_s0 = scalar_lea.vmem %s45_s23, 256  ;;  %p1933_p6 = scmp.lt.s32.totalorder %s45_s23, %s45_s23 }
  0x2d   :  { %p1929_p5 = scmp.ne.s32.totalorder %s45_s23, %s1928_s0  ;;  %p1934_p7 = scmp.lt.s32.totalorder %s1928_s0, %s1928_s0 }
  0x2f   :  { %p1935_p8 = por %p1934_p7, %p1933_p6 }
  0x31   :  { %p1936_p9 = pnand %p1935_p8, %p1929_p5 }
  0x33   :  { %1939 = shalt.err (!%p1936_p9)
}
  0x34   :  { %50 = dma.hbm_to_vmem [thread:$0]  %s2393_s2, 256, %s45_s23, [#allocation7], %s1994_s9, %s1994_s9, %s1995_s10  }
  0x35   :  { %s1940_s15 = scalar_lea.hbm %s2395_s4, 1024 }
  0x36   :  { %p1941_p10 = scmp.ne.s32.totalorder %s2395_s4, %s1940_s15  ;;  %p1944_p11 = scmp.lt.u32.totalorder %s1940_s15, %s2395_s4 }
  0x38   :  { %p1946_p12 = pnand %p1944_p11, %p1941_p10 }
  0x3a   :  { %1949 = shalt.err (!%p1946_p12)
}
  0x3b   :  { %s1950_s20 = scalar_lea.vmem %s2080_s26, 1024  ;;  %p1955_p0 = scmp.lt.s32.totalorder %s2080_s26, %s2080_s26 }
  0x3c   :  { %p1951_p13 = scmp.ne.s32.totalorder %s2080_s26, %s1950_s20  ;;  %p1956_p1 = scmp.lt.s32.totalorder %s1950_s20, %s1950_s20 }
  0x3e   :  { %p1957_p2 = por %p1956_p1, %p1955_p0 }
  0x40   :  { %p1958_p3 = pnand %p1957_p2, %p1951_p13 }
  0x42   :  { %1961 = shalt.err (!%p1958_p3)
}
  0x43   :  { %s1998_s2 = smov 64   ;;  %s1999_s1 = smov 4  }
  0x44   :  { %64 = dma.hbm_to_vmem [thread:$0]  %s2395_s4, 1024, %s2080_s26, [#allocation10], %s1998_s2, %s1998_s2, %s1999_s1  }
  0x45   :  { %1984 = dma.done.wait [#allocation4], 256  }
  0x46   :  { %1985 = vsyncadd [#allocation4], 4294967040 }
  0x47   :  { %1986 = dma.done.wait [#allocation7], 512  }
  0x48   :  { %1987 = vsyncadd [#allocation7], 4294966784 }
  0x49   :  { %1988 = dma.done.wait [#allocation10], 1024  }
  0x4a   :  { %1989 = vsyncadd [#allocation10], 4294966272  ;;  %v2000_v0 = vmov 0.0   ;;  %vm2001_vm0 = vmmov 0   ;;  %v2120_v1 = vld [vmem:[#allocation9 + $0x10] sm:$0xff]   ;;  %v2122_v2 = vld [vmem:[#allocation9] sm:$0xff]   ;;  %v310_v37 = vlaneseq }
  0x4b   :  { %1666 = vmatprep.subr.bf16.mxu1 %v2000_v0  ;;  %1658 = vmatprep.subr.bf16.mxu0 %v2000_v0  ;;  %v2125_v3 = vld [vmem:[#allocation9 + $0x18] sm:$0xff]   ;;  %v108_v4 = vld [vmem:[#allocation6] sm:$0xff]  ;;  %vm140_vm1 = vcmask 261120   ;;  %v2130_v5 = vld [vmem:[#allocation9 + $0x8] sm:$0xff]   ;;  %vm315_vm2 = vcmask 64512   ;;  %s2002_s27 = smov 112  }
  0x4c   :  { %1670 = vmatprep.mubr.msk.bf16.mxu1 %vm2001_vm0, %v2000_v0  ;;  %1662 = vmatprep.mubr.msk.bf16.mxu0 %vm2001_vm0, %v2000_v0  ;;  %v106_v6 = vld [vmem:[#allocation3] sm:$0xff]  ;;  %v109_v7 = vpack.c.bf16 %v108_v4, %v108_v4  ;;  %v2145_v9 = vld [vmem:[%s2396_s5 + $0x1] ss:$0 sm:$0xff]  ;;  %v2150_v10 = vld [vmem:[%s2396_s5] ss:$0 sm:$0xff]  ;;  %s2003_s28 = smov 120  }
  0x4d   :  { %1667 = vmatpush3.bf16.msra.mxu1 %v2120_v1  ;;  %1659 = vmatpush3.bf16.msra.mxu0 %v2122_v2  ;;  %v107_v8 = vpack.c.bf16 %v106_v6, %v106_v6  ;;  %s2004_s29 = smov 104   ;;  %v2165_v24 = vld [vmem:[#allocation9 + $0x20] sm:$0xff]   ;;  %v2168_v25 = vld [vmem:[#allocation9 + $0x28] sm:$0xff]   ;;  %v110_v26 = vld [vmem:[#allocation8] sm:$0xff]  ;;  %v311_v39 = vshrl.u32 %v310_v37, 7  ;;  %vm381_vm4 = vcmask 1043456  }
  0x4e   :  { %1668 = vmatprep.subr.bf16.mxu1 %v2000_v0  ;;  %1660 = vmatprep.subr.bf16.mxu0 %v2000_v0  ;;  %v111_v27 = vpack.c.bf16 %v110_v26, %v110_v26  ;;  %v112_v38 = vld [vmem:[%s2394_s3] sm:$0x1]  ;;  %v2205_v49 = vld [vmem:[%s2396_s5 + $0x2] ss:$0 sm:$0xff]  ;;  %vm115_vm5 = vcmask 57344   ;;  %vm427_vm7 = vcmask 60416  }
  0x4f   :  { %vm113_vm3 = vcmp.eq.f32.partialorder %v112_v38, 0.0  ;;  %v2194_v40 = vsub.s32 0, %v311_v39  ;;  %s2005_s0 = smov 16   ;;  %s2006_s24 = smov 24   ;;  %vm550_vm8 = vcmask 126016   ;;  %vm670_vm9 = vcmask 191616  }
  0x50   :  { %v2197_v41 = vsel %vm113_vm3, -1e+30, %v2000_v0  ;;  %vm790_vm10 = vcmask 257216  }
  0x51   :  { %1669 = vmatpush3.bf16.msra.mxu1 %v2125_v3  ;;  %1661 = vmatpush3.bf16.msra.mxu0 %v2130_v5  ;;  %v313_v42 = vrot.slane %v2197_v41, %v2194_v40  ;;  %v116_v38 = vsel %vm115_vm5, %v2197_v41, -inf }
  0x52   :  { %1682 = vmatprep.subr.bf16.mxu1 %v2000_v0  ;;  %1674 = vmatprep.subr.bf16.mxu0 %v2000_v0 }
  0x54   :  { %1671 = vmatmul.mubr.msk.bf16.vlgmr.msra.gmra.mrb[0].mxu1 %vm140_vm1, %v109_v7  ;;  %1663 = vmatmul.mubr.msk.bf16.vlgmr.msra.gmra.mrb[0].mxu0 %vm140_vm1, %v107_v8 }
  0x55   :  { %1684 = vmatprep.mubr.msk.bf16.mxu1 %vm2001_vm0, %v2000_v0  ;;  %1678 = vmatprep.mubr.msk.bf16.mxu0 %vm2001_vm0, %v2000_v0 }
  0x56   :  { %1675 = vmatpush3.bf16.msra.mxu0 %v2165_v24 }
  0x57   :  { %1676 = vmatprep.subr.bf16.mxu0 %v2000_v0 }
  0x5a   :  { %1677 = vmatpush3.bf16.msra.mxu0 %v2168_v25 }
  0x5b   :  { %1688 = vmatprep.subr.bf16.mxu0 %v2000_v0 }
  0x5d   :  { %1679 = vmatmul.mubr.msk.bf16.vlgmr.msra.gmra.mrb[4].mxu0 %vm140_vm1, %v111_v27 }
  0x5e   :  { %1690 = vmatprep.mubr.msk.bf16.mxu0 %vm2001_vm0, %v2000_v0 }
 0x127   :  { %v240_v11 = vpop.f32.mrb[0].mxu1  ;;  %v178_v14 = vpop.f32.mrb[0].mxu0 }
 0x128   :  { %v241_v12 = vadd.f32 %v2145_v9, %v240_v11  ;;  %v1672_v13 = vpop.f32.mrb[1].mxu1  ;;  %v179_v16 = vadd.f32 %v2150_v10, %v178_v14  ;;  %v1664_v17 = vpop.f32.mrb[1].mxu0 }
 0x129   :  { %v243_v15 = vpop.f32.mrb[2].mxu1  ;;  %v181_v20 = vpop.f32.mrb[2].mxu0 }
 0x12a   :  { %v246_v18 = vpack.c.bf16 %v241_v12, %v241_v12  ;;  %v1673_v19 = vpop.f32.mrb[3].mxu1  ;;  %v1665_v21 = vpop.f32.mrb[3].mxu0  ;;  %v184_v22 = vpack.c.bf16 %v179_v16, %v179_v16 }
 0x12c   :  { %554 = vrot.lane.b32.xlu1 %v246_v18, %s2002_s27  ;;  %433 = vrot.lane.b32.xlu0 %v246_v18, %s2003_s28  ;;  %v320_v23 = vsel %vm315_vm2, %v246_v18, 0 }
 0x12d   :  { %1683 = vmatpush3.bf16.xpose.msra.mxu1 %v320_v23 }
 0x12e   :  { %1694 = vmatprep.subr.bf16.mxu1 %v2000_v0 }
 0x130   :  { %552 = vrot.lane.b32.xlu1 %v184_v22, %s2002_s27  ;;  %430 = vrot.lane.b32.xlu0 %v184_v22, %s2003_s28  ;;  %v302_v50 = vpop.f32.mrb[4].mxu0 }
 0x131   :  { %v303_v51 = vadd.f32 %v2205_v49, %v302_v50  ;;  %v1680_v52 = vpop.f32.mrb[5].mxu0 }
 0x132   :  { %v305_v53 = vpop.f32.mrb[6].mxu0 }
 0x133   :  { %v1681_v54 = vpop.f32.mrb[7].mxu0  ;;  %v308_v55 = vpack.c.bf16 %v303_v51, %v303_v51 }
 0x134   :  { %672 = vrot.lane.b32.xlu1 %v184_v22, %s2004_s29  ;;  %674 = vrot.lane.b32.xlu0 %v246_v18, %s2004_s29 }
 0x135   :  { %1685 = vmatmul.mubr.msk.bf16.vlgmr.msra.gmra.mrb[4].mxu1 %vm315_vm2, %v184_v22  ;;  %v383_v56 = vsel %vm381_vm4, %v308_v55, 0 }
 0x136   :  { %1696 = vmatprep.mubr.msk.bf16.mxu1 %vm2001_vm0, %v2000_v0  ;;  %1689 = vmatpush3.bf16.msra.mxu0 %v383_v56 }
 0x137   :  { %1700 = vmatprep.subr.bf16.mxu0 %v2000_v0 }
 0x19e   :  { %v434_v28 = vpop.permute.xlu0 %433  ;;  %v555_v30 = vpop.permute.xlu1 %554 }
 0x19f   :  { %v439_v29 = vsel %vm315_vm2, %v434_v28, 0  ;;  %v560_v32 = vsel %vm315_vm2, %v555_v30, 0 }
 0x1a0   :  { %1695 = vmatpush3.bf16.xpose.msra.mxu1 %v439_v29 }
 0x1a1   :  { %1706 = vmatprep.subr.bf16.mxu1 %v2000_v0 }
 0x1a2   :  { %v431_v31 = vpop.permute.xlu0 %430  ;;  %v553_v34 = vpop.permute.xlu1 %552 }
 0x1a6   :  { %v675_v33 = vpop.permute.xlu0 %674  ;;  %v673_v36 = vpop.permute.xlu1 %672 }
 0x1a7   :  { %1697 = vmatmul.mubr.msk.bf16.vlgmr.msra.gmra.mrb[8].mxu1 %vm315_vm2, %v431_v31  ;;  %v680_v35 = vsel %vm315_vm2, %v675_v33, 0 }
 0x1a8   :  { %1707 = vmatpush3.bf16.xpose.msra.mxu1 %v560_v32  ;;  %1708 = vmatprep.mubr.msk.bf16.mxu1 %vm2001_vm0, %v2000_v0 }
 0x1a9   :  { %1718 = vmatprep.subr.bf16.mxu1 %v2000_v0 }
 0x1af   :  { %1709 = vmatmul.mubr.msk.bf16.vlgmr.msra.gmra.mrb[12].mxu1 %vm315_vm2, %v553_v34 }
 0x1b0   :  { %1719 = vmatpush3.bf16.xpose.msra.mxu1 %v680_v35  ;;  %1720 = vmatprep.mubr.msk.bf16.mxu1 %vm2001_vm0, %v2000_v0 }
 0x1b1   :  { %1730 = vmatprep.subr.bf16.mxu1 %v2000_v0 }
 0x1b7   :  { %1721 = vmatmul.mubr.msk.bf16.vlgmr.msra.gmra.mrb[16].mxu1 %vm315_vm2, %v673_v36 }
 0x1b8   :  { %1734 = vmatprep.mubr.msk.bf16.mxu1 %vm2001_vm0, %v2000_v0 }
 0x208   :  { %v356_v43 = vpop.f32.mrb[4].mxu1 }
 0x209   :  { %v357_v44 = vadd.f32 %v356_v43, %v313_v42  ;;  %v1686_v45 = vpop.f32.mrb[5].mxu1 }
 0x20a   :  { %v359_v46 = vpop.f32.mrb[6].mxu1 }
 0x20b   :  { %v1687_v47 = vpop.f32.mrb[7].mxu1  ;;  %v362_v48 = vsel %vm315_vm2, %v357_v44, -inf }
 0x20c   :  { %363 = vmax.xlane.f32.xlu0 %v362_v48 }
 0x27a   :  { %v475_v57 = vpop.f32.mrb[8].mxu1 }
 0x27b   :  { %v476_v58 = vadd.f32 %v475_v57, %v313_v42  ;;  %v1698_v59 = vpop.f32.mrb[9].mxu1 }
 0x27c   :  { %v478_v60 = vpop.f32.mrb[10].mxu1 }
 0x27d   :  { %v1699_v61 = vpop.f32.mrb[11].mxu1  ;;  %v481_v62 = vsel %vm315_vm2, %v476_v58, -inf }
 0x27e   :  { %482 = vmax.xlane.f32.xlu1 %v481_v62 }
 0x282   :  { %v596_v63 = vpop.f32.mrb[12].mxu1 }
 0x283   :  { %v597_v4 = vadd.f32 %v596_v63, %v313_v42  ;;  %v1710_v6 = vpop.f32.mrb[13].mxu1 }
 0x284   :  { %v599_v7 = vpop.f32.mrb[14].mxu1 }
 0x285   :  { %v1711_v8 = vpop.f32.mrb[15].mxu1  ;;  %v602_v11 = vsel %vm315_vm2, %v597_v4, -inf }
 0x286   :  { %603 = vmax.xlane.f32.xlu0 %v602_v11 }
 0x28a   :  { %v716_v12 = vpop.f32.mrb[16].mxu1 }
 0x28b   :  { %v717_v13 = vadd.f32 %v716_v12, %v313_v42  ;;  %v1722_v14 = vpop.f32.mrb[17].mxu1 }
 0x28c   :  { %v719_v15 = vpop.f32.mrb[18].mxu1 }
 0x28d   :  { %v1723_v16 = vpop.f32.mrb[19].mxu1  ;;  %v722_v17 = vsel %vm315_vm2, %v717_v13, -inf }
 0x28e   :  { %723 = vmax.xlane.f32.xlu0 %v722_v17 }
 0x28f   :  { %494 = vrot.lane.b32.xlu1 %v308_v55, %s2003_s28 }
 0x293   :  { %734 = vrot.lane.b32.xlu1 %v308_v55, %s2004_s29 }
 0x299   :  { %v364_v18 = vpop.xlane.xlu0 %363 }
 0x29a   :  { %v365_v19 = vsub.f32 %v357_v44, %v364_v18 }
 0x29c   :  { %v366_v20 = vmul.f32 1.442695, %v365_v19 }
 0x29e   :  { %1842 = vpow2.f32 %v366_v20  ;;  %v2248_v20 = vld [vmem:[#allocation9 + $0x30] sm:$0xff]  }
 0x29f   :  { %1731 = vmatpush3.bf16.msra.mxu1 %v2248_v20 }
 0x2a0   :  { %1732 = vmatprep.subr.bf16.mxu1 %v2000_v0 }
 0x2a4   :  { %614 = vrot.lane.b32.xlu0 %v308_v55, %s2002_s27 }
 0x2a8   :  { %v1843_v21 = vpop.eup %1842 }
 0x2a9   :  { %v377_v22 = vpack.c.bf16 %v1843_v21, %v1843_v21  ;;  %v368_v52 = vsel %vm315_vm2, %v1843_v21, 0.0 }
 0x2ab   :  { %1691 = vmatmul.mubr.msk.bf16.vlgmr.msra.gmra.mrb[8].mxu0 %vm315_vm2, %v377_v22 }
 0x2ac   :  { %1702 = vmatprep.mubr.msk.bf16.mxu0 %vm2001_vm0, %v2000_v0 }
 0x30b   :  { %v483_v23 = vpop.xlane.xlu1 %482 }
 0x30c   :  { %v484_v26 = vsub.f32 %v476_v58, %v483_v23 }
 0x30e   :  { %v485_v27 = vmul.f32 1.442695, %v484_v26  ;;  %v2251_v26 = vld [vmem:[#allocation9 + $0x38] sm:$0xff]  }
 0x30f   :  { %v495_v28 = vpop.permute.xlu1 %494  ;;  %1733 = vmatpush3.bf16.msra.mxu1 %v2251_v26 }
 0x310   :  { %1844 = vpow2.f32 %v485_v27  ;;  %v500_v29 = vsel %vm381_vm4, %v495_v28, 0  ;;  %1746 = vmatprep.subr.bf16.mxu1 %v2000_v0 }
 0x311   :  { %1701 = vmatpush3.bf16.msra.mxu0 %v500_v29 }
 0x312   :  { %1712 = vmatprep.subr.bf16.mxu0 %v2000_v0 }
 0x313   :  { %v604_v30 = vpop.xlane.xlu0 %603  ;;  %v735_v45 = vpop.permute.xlu1 %734 }
 0x314   :  { %v605_v31 = vsub.f32 %v597_v4, %v604_v30  ;;  %v740_v41 = vsel %vm381_vm4, %v735_v45, 0 }
 0x316   :  { %v606_v32 = vmul.f32 1.442695, %v605_v31 }
 0x318   :  { %1846 = vpow2.f32 %v606_v32 }
 0x31a   :  { %v1845_v33 = vpop.eup %1844 }
 0x31b   :  { %v724_v34 = vpop.xlane.xlu0 %723  ;;  %v487_v35 = vsel %vm315_vm2, %v1845_v33, 0.0  ;;  %v492_v36 = vpack.c.bf16 %v1845_v33, %v1845_v33 }
 0x31c   :  { %v725_v37 = vsub.f32 %v717_v13, %v724_v34  ;;  %488 = vadd.xlane.f32.xlu1 %v487_v35 }
 0x31d   :  { %1703 = vmatmul.mubr.msk.bf16.vlgmr.msra.gmra.mrb[12].mxu0 %vm315_vm2, %v492_v36 }
 0x31e   :  { %v726_v39 = vmul.f32 1.442695, %v725_v37  ;;  %1714 = vmatprep.mubr.msk.bf16.mxu0 %vm2001_vm0, %v2000_v0  ;;  %v856_v37 = vld [vmem:[#allocation3 + $0x8] sm:$0xff] }
 0x31f   :  { %v615_v42 = vpop.permute.xlu0 %614 }
 0x320   :  { %1848 = vpow2.f32 %v726_v39  ;;  %v620_v43 = vsel %vm381_vm4, %v615_v42, 0  ;;  %117 = vmax.xlane.f32.xlu1 %v116_v38  ;;  %v857_v38 = vpack.c.bf16 %v856_v37, %v856_v37 }
 0x321   :  { %1713 = vmatpush3.bf16.msra.mxu0 %v620_v43 }
 0x322   :  { %v1847_v44 = vpop.eup %1846  ;;  %1724 = vmatprep.subr.bf16.mxu0 %v2000_v0 }
 0x323   :  { %v608_v46 = vsel %vm315_vm2, %v1847_v44, 0.0  ;;  %v613_v47 = vpack.c.bf16 %v1847_v44, %v1847_v44 }
 0x324   :  { %609 = vadd.xlane.f32.xlu0 %v608_v46 }
 0x325   :  { %1715 = vmatmul.mubr.msk.bf16.vlgmr.msra.gmra.mrb[16].mxu0 %vm315_vm2, %v613_v47 }
 0x326   :  { %1725 = vmatpush3.bf16.msra.mxu0 %v740_v41  ;;  %1726 = vmatprep.mubr.msk.bf16.mxu0 %vm2001_vm0, %v2000_v0 }
 0x327   :  { %1738 = vmatprep.subr.bf16.mxu0 %v2000_v0 }
 0x32a   :  { %v1849_v48 = vpop.eup %1848 }
 0x32b   :  { %v728_v50 = vsel %vm315_vm2, %v1849_v48, 0.0  ;;  %v733_v51 = vpack.c.bf16 %v1849_v48, %v1849_v48 }
 0x32c   :  { %729 = vadd.xlane.f32.xlu0 %v728_v50 }
 0x32d   :  { %1727 = vmatmul.mubr.msk.bf16.vlgmr.msra.gmra.mrb[20].mxu0 %vm315_vm2, %v733_v51 }
 0x32e   :  { %1739 = vmatpush3.bf16.msra.mxu0 %v2122_v2  ;;  %1742 = vmatprep.mubr.msk.bf16.mxu0 %vm2001_vm0, %v2000_v0 }
 0x32f   :  { %1740 = vmatprep.subr.bf16.mxu0 %v2000_v0 }
 0x330   :  { %369 = vadd.xlane.f32.xlu0 %v368_v52 }
 0x332   :  { %1741 = vmatpush3.bf16.msra.mxu0 %v2130_v5 }
 0x333   :  { %1754 = vmatprep.subr.bf16.mxu0 %v2000_v0 }
 0x335   :  { %1743 = vmatmul.mubr.msk.bf16.vlgmr.msra.gmra.mrb[24].mxu0 %vm140_vm1, %v857_v38 }
 0x336   :  { %1755 = vmatpush3.bf16.msra.mxu0 %v2165_v24  ;;  %1758 = vmatprep.mubr.msk.bf16.mxu0 %vm2001_vm0, %v2000_v0 }
 0x337   :  { %1756 = vmatprep.subr.bf16.mxu0 %v2000_v0 }
 0x33a   :  { %1757 = vmatpush3.bf16.msra.mxu0 %v2168_v25  ;;  %v859_v25 = vld [vmem:[#allocation6 + $0x8] sm:$0xff] }
 0x33b   :  { %1768 = vmatprep.subr.bf16.mxu0 %v2000_v0  ;;  %v860_v44 = vpack.c.bf16 %v859_v25, %v859_v25 }
 0x37e   :  { %v419_v53 = vpop.f32.mrb[8].mxu0 }
 0x37f   :  { %v1692_v54 = vpop.f32.mrb[9].mxu0 }
 0x380   :  { %v422_v55 = vpop.f32.mrb[10].mxu0 }
 0x381   :  { %v1693_v56 = vpop.f32.mrb[11].mxu0 }
 0x3a9   :  { %v489_v59 = vpop.xlane.xlu1 %488 }
 0x3ad   :  { %v118_v60 = vpop.xlane.xlu1 %117 }
 0x3ae   :  { %vm119_vm6 = vcmp.eq.f32.partialorder %v118_v60, 0.0 }
 0x3af   :  { %v1551_v61 = vsel %vm119_vm6, 1.0, %v2000_v0 }
 0x3b0   :  { %v375_v62 = vrot.slane %v1551_v61, %v2194_v40 }
 0x3b1   :  { %v610_v57 = vpop.xlane.xlu0 %609 }
 0x3b9   :  { %v730_v58 = vpop.xlane.xlu0 %729 }
 0x3bd   :  { %v370_v2 = vpop.xlane.xlu0 %369 }
 0x3be   :  { %1850 = vrcp.f32 %v370_v2 }
 0x3bf   :  { %1852 = vrcp.f32 %v489_v59 }
 0x3c0   :  { %1854 = vrcp.f32 %v610_v57 }
 0x3c1   :  { %1856 = vrcp.f32 %v730_v58 }
 0x3c8   :  { %v1851_v63 = vpop.eup %1850 }
 0x3c9   :  { %v376_v4 = vmul.f32 %v1851_v63, %v375_v62  ;;  %v1853_v7 = vpop.eup %1852 }
 0x3ca   :  { %v491_v8 = vmul.f32 %v1853_v7, %v375_v62  ;;  %v1855_v17 = vpop.eup %1854 }
 0x3cb   :  { %v425_v5 = vmul.f32 %v419_v53, %v376_v4  ;;  %v612_v18 = vmul.f32 %v1855_v17, %v375_v62  ;;  %v1857_v29 = vpop.eup %1856 }
 0x3cc   :  { %v732_v30 = vmul.f32 %v1857_v29, %v375_v62 }
 0x3cd   :  { %v426_v6 = vpack.c.bf16 %v425_v5, %v425_v5 }
 0x3cf   :  { %428 = vst.msk [vmem:[#allocation2] sm:$0xf] %vm427_vm7, %v426_v6 }
 0x3f0   :  { %v536_v11 = vpop.f32.mrb[12].mxu0 }
 0x3f1   :  { %v542_v12 = vmul.f32 %v536_v11, %v491_v8  ;;  %v1704_v13 = vpop.f32.mrb[13].mxu0 }
 0x3f2   :  { %v539_v14 = vpop.f32.mrb[14].mxu0 }
 0x3f3   :  { %v1596_v15 = vpack.c.bf16 %v542_v12, %v542_v12  ;;  %v1705_v16 = vpop.f32.mrb[15].mxu0 }
 0x3f5   :  { %547 = vrot.lane.b32.xlu1 %v1596_v15, %s1995_s10 }
 0x3f8   :  { %v656_v19 = vpop.f32.mrb[16].mxu0 }
 0x3f9   :  { %v662_v21 = vmul.f32 %v656_v19, %v612_v18  ;;  %v1716_v22 = vpop.f32.mrb[17].mxu0  ;;  %v1579_v18 = vld [vmem:[%s2394_s3 + $0x1] sm:$0x1]  ;;  %s2007_s3 = smov [#allocation11]  }
 0x3fa   :  { %v659_v23 = vpop.f32.mrb[18].mxu0  ;;  %vm866_vm11 = vcmp.eq.f32.partialorder %v1579_v18, 0.0  ;;  %s1534_s15 = sshll.u32 %s2007_s3, 4  ;;  %s1535_s15 = int_to_ptr.vmem [resolvable:$true] %s1534_s15 }
 0x3fb   :  { %v1597_v27 = vpack.c.bf16 %v662_v21, %v662_v21  ;;  %v1717_v28 = vpop.f32.mrb[19].mxu0  ;;  %v2329_v19 = vsel %vm866_vm11, -1e+30, %v2000_v0  ;;  %s1962_s16 = scalar_lea.vmem %s1535_s15, 256  ;;  %p1967_p5 = scmp.lt.s32.totalorder %s1535_s15, %s1535_s15 }
 0x3fc   :  { %v1010_v21 = vrot.slane %v2329_v19, %v2194_v40  ;;  %p1963_p4 = scmp.ne.s32.totalorder %s1535_s15, %s1962_s16  ;;  %p1968_p6 = scmp.lt.s32.totalorder %s1962_s16, %s1962_s16 }
 0x3fd   :  { %667 = vrot.lane.b32.xlu0 %v1597_v27, %s2005_s0 }
 0x3fe   :  { %p1969_p7 = por %p1968_p6, %p1967_p5 }
 0x400   :  { %v776_v31 = vpop.f32.mrb[20].mxu0  ;;  %p1970_p8 = pnand %p1969_p7, %p1963_p4 }
 0x401   :  { %v782_v32 = vmul.f32 %v776_v31, %v732_v30  ;;  %v1728_v33 = vpop.f32.mrb[21].mxu0 }
 0x402   :  { %v779_v34 = vpop.f32.mrb[22].mxu0 }
 0x403   :  { %v1598_v35 = vpack.c.bf16 %v782_v32, %v782_v32  ;;  %v1729_v36 = vpop.f32.mrb[23].mxu0 }
 0x405   :  { %787 = vrot.lane.b32.xlu1 %v1598_v35, %s2006_s24 }
 0x408   :  { %v911_v45 = vpop.f32.mrb[24].mxu0 }
 0x409   :  { %v912_v46 = vadd.f32 %v2150_v10, %v911_v45  ;;  %v2288_v10 = vld [vmem:[%s2396_s5 + $0x3] ss:$0 sm:$0xff] }
 0x40b   :  { %v917_v41 = vpack.c.bf16 %v912_v46, %v912_v46 }
 0x40d   :  { %1124 = vrot.lane.b32.xlu0 %v917_v41, %s2003_s28 }
 0x411   :  { %1245 = vrot.lane.b32.xlu0 %v917_v41, %s2002_s27 }
 0x415   :  { %1364 = vrot.lane.b32.xlu0 %v917_v41, %s2004_s29 }
 0x467   :  { %v548_v39 = vpop.permute.xlu1 %547 }
 0x468   :  { %551 = vst.msk [vmem:[#allocation2] sm:$0xf] %vm550_vm8, %v548_v39 }
 0x46f   :  { %v668_v42 = vpop.permute.xlu0 %667 }
 0x470   :  { %671 = vst.msk [vmem:[#allocation2] sm:$0xf] %vm670_vm9, %v668_v42 }
 0x477   :  { %v788_v43 = vpop.permute.xlu1 %787 }
 0x478   :  { %791 = vst.msk [vmem:[#allocation2] sm:$0xf] %vm790_vm10, %v788_v43 }
 0x47f   :  { %v792_v24 = vld [vmem:[#allocation2] sm:$0xf]  ;;  %v1125_v13 = vpop.permute.xlu0 %1124 }
 0x480   :  { %1735 = vmatmul.mubr.msk.bf16.vlgmr.msra.gmra.mrb[20].mxu1 %vm140_vm1, %v792_v24 }
 0x481   :  { %1747 = vmatpush3.bf16.msra.mxu1 %v2120_v1  ;;  %1750 = vmatprep.mubr.msk.bf16.mxu1 %vm2001_vm0, %v2000_v0  ;;  %v1744_v1 = vpop.f32.mrb[25].mxu0 }
 0x482   :  { %1748 = vmatprep.subr.bf16.mxu1 %v2000_v0  ;;  %v914_v47 = vpop.f32.mrb[26].mxu0 }
 0x483   :  { %v1745_v48 = vpop.f32.mrb[27].mxu0  ;;  %v1246_v15 = vpop.permute.xlu0 %1245 }
 0x485   :  { %1749 = vmatpush3.bf16.msra.mxu1 %v2125_v3  ;;  %v862_v3 = vld [vmem:[#allocation8 + $0x8] sm:$0xff] }
 0x486   :  { %1762 = vmatprep.subr.bf16.mxu1 %v2000_v0  ;;  %v863_v50 = vpack.c.bf16 %v862_v3, %v862_v3 }
 0x487   :  { %v1365_v17 = vpop.permute.xlu0 %1364 }
 0x488   :  { %1751 = vmatmul.mubr.msk.bf16.vlgmr.msra.gmra.mrb[24].mxu1 %vm140_vm1, %v860_v44  ;;  %1759 = vmatmul.mubr.msk.bf16.vlgmr.msra.gmra.mrb[28].mxu0 %vm140_vm1, %v863_v50 }
 0x489   :  { %1764 = vmatprep.mubr.msk.bf16.mxu1 %vm2001_vm0, %v2000_v0  ;;  %1770 = vmatprep.mubr.msk.bf16.mxu0 %vm2001_vm0, %v2000_v0 }
 0x553   :  { %v848_v51 = vpop.f32.mrb[20].mxu1 }
 0x554   :  { %v849_v52 = vadd.f32 %v2288_v10, %v848_v51  ;;  %v1736_v53 = vpop.f32.mrb[21].mxu1 }
 0x555   :  { %v851_v54 = vpop.f32.mrb[22].mxu1 }
 0x556   :  { %854 = vst.msk [vmem:[#allocation11] sm:$0xff] %vm140_vm1, %v849_v52  ;;  %v1737_v55 = vpop.f32.mrb[23].mxu1 }
 0x55b   :  { %v955_v56 = vpop.f32.mrb[24].mxu1 }
 0x55c   :  { %v956_v57 = vadd.f32 %v2145_v9, %v955_v56  ;;  %v1752_v58 = vpop.f32.mrb[25].mxu1  ;;  %v999_v9 = vpop.f32.mrb[28].mxu0 }
 0x55d   :  { %v958_v59 = vpop.f32.mrb[26].mxu1  ;;  %v1760_v62 = vpop.f32.mrb[29].mxu0  ;;  %v1000_v5 = vadd.f32 %v2205_v49, %v999_v9 }
 0x55e   :  { %v961_v2 = vpack.c.bf16 %v956_v57, %v956_v57  ;;  %v1753_v60 = vpop.f32.mrb[27].mxu1  ;;  %v1002_v63 = vpop.f32.mrb[30].mxu0 }
 0x55f   :  { %v1761_v4 = vpop.f32.mrb[31].mxu0  ;;  %v2302_v6 = vpack.c.bf16 %v1000_v5, %v1000_v5 }
 0x560   :  { %1127 = vrot.lane.b32.xlu1 %v961_v2, %s2003_s28  ;;  %v1016_v61 = vsel %vm315_vm2, %v961_v2, 0 }
 0x561   :  { %1763 = vmatpush3.bf16.xpose.msra.mxu1 %v1016_v61  ;;  %v1078_v7 = vsel %vm381_vm4, %v2302_v6, 0 }
 0x562   :  { %1774 = vmatprep.subr.bf16.mxu1 %v2000_v0  ;;  %1769 = vmatpush3.bf16.msra.mxu0 %v1078_v7 }
 0x563   :  { %1780 = vmatprep.subr.bf16.mxu0 %v2000_v0 }
 0x564   :  { %1247 = vrot.lane.b32.xlu1 %v961_v2, %s2002_s27 }
 0x568   :  { %1366 = vrot.lane.b32.xlu1 %v961_v2, %s2004_s29  ;;  %1765 = vmatmul.mubr.msk.bf16.vlgmr.msra.gmra.mrb[28].mxu1 %vm315_vm2, %v917_v41 }
 0x569   :  { %1776 = vmatprep.mubr.msk.bf16.mxu1 %vm2001_vm0, %v2000_v0 }
 0x5d2   :  { %v1128_v8 = vpop.permute.xlu1 %1127 }
 0x5d3   :  { %v1133_v11 = vsel %vm315_vm2, %v1128_v8, 0 }
 0x5d4   :  { %1775 = vmatpush3.bf16.xpose.msra.mxu1 %v1133_v11 }
 0x5d5   :  { %1786 = vmatprep.subr.bf16.mxu1 %v2000_v0 }
 0x5d6   :  { %v1248_v12 = vpop.permute.xlu1 %1247 }
 0x5d7   :  { %v1253_v14 = vsel %vm315_vm2, %v1248_v12, 0 }
 0x5da   :  { %v1367_v49 = vpop.permute.xlu1 %1366 }
 0x5db   :  { %1777 = vmatmul.mubr.msk.bf16.vlgmr.msra.gmra.mrb[32].mxu1 %vm315_vm2, %v1125_v13  ;;  %v1372_v16 = vsel %vm315_vm2, %v1367_v49, 0  ;;  %v868_v49 = vsel %vm115_vm5, %v2329_v19, -inf }
 0x5dc   :  { %1787 = vmatpush3.bf16.xpose.msra.mxu1 %v1253_v14  ;;  %1788 = vmatprep.mubr.msk.bf16.mxu1 %vm2001_vm0, %v2000_v0 }
 0x5dd   :  { %1798 = vmatprep.subr.bf16.mxu1 %v2000_v0 }
 0x5e3   :  { %1789 = vmatmul.mubr.msk.bf16.vlgmr.msra.gmra.mrb[36].mxu1 %vm315_vm2, %v1246_v15 }
 0x5e4   :  { %1799 = vmatpush3.bf16.xpose.msra.mxu1 %v1372_v16  ;;  %1800 = vmatprep.mubr.msk.bf16.mxu1 %vm2001_vm0, %v2000_v0 }
 0x5e5   :  { %1810 = vmatprep.subr.bf16.mxu1 %v2000_v0 }
 0x5eb   :  { %1801 = vmatmul.mubr.msk.bf16.vlgmr.msra.gmra.mrb[40].mxu1 %vm315_vm2, %v1365_v17 }
 0x5ec   :  { %1811 = vmatpush3.bf16.msra.mxu1 %v2248_v20  ;;  %1814 = vmatprep.mubr.msk.bf16.mxu1 %vm2001_vm0, %v2000_v0 }
 0x5ed   :  { %1812 = vmatprep.subr.bf16.mxu1 %v2000_v0 }
 0x5f0   :  { %1813 = vmatpush3.bf16.msra.mxu1 %v2251_v26 }
 0x63b   :  { %v1052_v22 = vpop.f32.mrb[28].mxu1 }
 0x63c   :  { %v1053_v20 = vadd.f32 %v1052_v22, %v1010_v21  ;;  %v1766_v23 = vpop.f32.mrb[29].mxu1 }
 0x63d   :  { %v1055_v27 = vpop.f32.mrb[30].mxu1 }
 0x63e   :  { %v1767_v28 = vpop.f32.mrb[31].mxu1  ;;  %v1058_v29 = vsel %vm315_vm2, %v1053_v20, -inf }
 0x63f   :  { %1059 = vmax.xlane.f32.xlu1 %v1058_v29 }
 0x650   :  { %1307 = vrot.lane.b32.xlu1 %v2302_v6, %s2002_s27 }
 0x6ae   :  { %v1169_v26 = vpop.f32.mrb[32].mxu1 }
 0x6af   :  { %v1170_v30 = vadd.f32 %v1169_v26, %v1010_v21  ;;  %v1778_v31 = vpop.f32.mrb[33].mxu1 }
 0x6b0   :  { %v1172_v32 = vpop.f32.mrb[34].mxu1 }
 0x6b1   :  { %v1779_v33 = vpop.f32.mrb[35].mxu1  ;;  %v1175_v34 = vsel %vm315_vm2, %v1170_v30, -inf }
 0x6b2   :  { %1176 = vmax.xlane.f32.xlu0 %v1175_v34 }
 0x6b6   :  { %v1289_v35 = vpop.f32.mrb[36].mxu1 }
 0x6b7   :  { %v1290_v36 = vadd.f32 %v1289_v35, %v1010_v21  ;;  %v1790_v37 = vpop.f32.mrb[37].mxu1 }
 0x6b8   :  { %v1292_v38 = vpop.f32.mrb[38].mxu1 }
 0x6b9   :  { %v1791_v39 = vpop.f32.mrb[39].mxu1  ;;  %v1295_v42 = vsel %vm315_vm2, %v1290_v36, -inf }
 0x6ba   :  { %1296 = vmax.xlane.f32.xlu0 %v1295_v42 }
 0x6be   :  { %v1408_v43 = vpop.f32.mrb[40].mxu1 }
 0x6bf   :  { %v1409_v24 = vadd.f32 %v1408_v43, %v1010_v21  ;;  %v1802_v25 = vpop.f32.mrb[41].mxu1 }
 0x6c0   :  { %v1411_v44 = vpop.f32.mrb[42].mxu1 }
 0x6c1   :  { %v1803_v45 = vpop.f32.mrb[43].mxu1  ;;  %v1414_v46 = vsel %vm315_vm2, %v1409_v24, -inf }
 0x6c2   :  { %1415 = vmax.xlane.f32.xlu1 %v1414_v46 }
 0x6cc   :  { %v1060_v1 = vpop.xlane.xlu1 %1059 }
 0x6cd   :  { %v1061_v47 = vsub.f32 %v1053_v20, %v1060_v1 }
 0x6cf   :  { %v1062_v41 = vmul.f32 1.442695, %v1061_v47 }
 0x6d0   :  { %1188 = vrot.lane.b32.xlu0 %v2302_v6, %s2003_s28  ;;  %v1308_v56 = vpop.permute.xlu1 %1307 }
 0x6d1   :  { %1858 = vpow2.f32 %v1062_v41  ;;  %v1313_v62 = vsel %vm381_vm4, %v1308_v56, 0 }
 0x6d3   :  { %1426 = vrot.lane.b32.xlu1 %v2302_v6, %s2004_s29 }
 0x6db   :  { %v1859_v48 = vpop.eup %1858 }
 0x6dc   :  { %v1073_v3 = vpack.c.bf16 %v1859_v48, %v1859_v48  ;;  %v1064_v11 = vsel %vm315_vm2, %v1859_v48, 0.0 }
 0x6de   :  { %1771 = vmatmul.mubr.msk.bf16.vlgmr.msra.gmra.mrb[32].mxu0 %vm315_vm2, %v1073_v3 }
 0x6df   :  { %1782 = vmatprep.mubr.msk.bf16.mxu0 %vm2001_vm0, %v2000_v0 }
 0x73f   :  { %v1177_v50 = vpop.xlane.xlu0 %1176 }
 0x740   :  { %v1178_v51 = vsub.f32 %v1170_v30, %v1177_v50 }
 0x742   :  { %v1179_v52 = vmul.f32 1.442695, %v1178_v51 }
 0x744   :  { %1860 = vpow2.f32 %v1179_v52 }
 0x747   :  { %v1297_v53 = vpop.xlane.xlu0 %1296 }
 0x748   :  { %v1298_v54 = vsub.f32 %v1290_v36, %v1297_v53 }
 0x74a   :  { %v1299_v55 = vmul.f32 1.442695, %v1298_v54 }
 0x74b   :  { %v1189_v57 = vpop.permute.xlu0 %1188 }
 0x74c   :  { %1862 = vpow2.f32 %v1299_v55  ;;  %v1194_v58 = vsel %vm381_vm4, %v1189_v57, 0 }
 0x74d   :  { %1781 = vmatpush3.bf16.msra.mxu0 %v1194_v58 }
 0x74e   :  { %v1861_v59 = vpop.eup %1860  ;;  %1792 = vmatprep.subr.bf16.mxu0 %v2000_v0 }
 0x74f   :  { %v1416_v2 = vpop.xlane.xlu1 %1415  ;;  %v1181_v60 = vsel %vm315_vm2, %v1861_v59, 0.0  ;;  %v1186_v61 = vpack.c.bf16 %v1861_v59, %v1861_v59 }
 0x750   :  { %v1417_v9 = vsub.f32 %v1409_v24, %v1416_v2  ;;  %1182 = vadd.xlane.f32.xlu0 %v1181_v60 }
 0x751   :  { %1783 = vmatmul.mubr.msk.bf16.vlgmr.msra.gmra.mrb[36].mxu0 %vm315_vm2, %v1186_v61 }
 0x752   :  { %v1418_v63 = vmul.f32 1.442695, %v1417_v9  ;;  %1793 = vmatpush3.bf16.msra.mxu0 %v1313_v62  ;;  %1794 = vmatprep.mubr.msk.bf16.mxu0 %vm2001_vm0, %v2000_v0 }
 0x753   :  { %1804 = vmatprep.subr.bf16.mxu0 %v2000_v0  ;;  %v1427_v5 = vpop.permute.xlu1 %1426 }
 0x754   :  { %1864 = vpow2.f32 %v1418_v63  ;;  %v1432_v8 = vsel %vm381_vm4, %v1427_v5, 0 }
 0x756   :  { %v1863_v4 = vpop.eup %1862 }
 0x757   :  { %v1301_v6 = vsel %vm315_vm2, %v1863_v4, 0.0  ;;  %v1306_v7 = vpack.c.bf16 %v1863_v4, %v1863_v4 }
 0x758   :  { %1302 = vadd.xlane.f32.xlu1 %v1301_v6 }
 0x759   :  { %1795 = vmatmul.mubr.msk.bf16.vlgmr.msra.gmra.mrb[40].mxu0 %vm315_vm2, %v1306_v7 }
 0x75a   :  { %1805 = vmatpush3.bf16.msra.mxu0 %v1432_v8  ;;  %1806 = vmatprep.mubr.msk.bf16.mxu0 %vm2001_vm0, %v2000_v0 }
 0x75c   :  { %1065 = vadd.xlane.f32.xlu1 %v1064_v11 }
 0x75e   :  { %v1865_v12 = vpop.eup %1864 }
 0x75f   :  { %v1420_v13 = vsel %vm315_vm2, %v1865_v12, 0.0  ;;  %v1425_v14 = vpack.c.bf16 %v1865_v12, %v1865_v12 }
 0x760   :  { %1421 = vadd.xlane.f32.xlu0 %v1420_v13 }
 0x761   :  { %1807 = vmatmul.mubr.msk.bf16.vlgmr.msra.gmra.mrb[44].mxu0 %vm315_vm2, %v1425_v14 }
 0x764   :  { %869 = vmax.xlane.f32.xlu0 %v868_v49 }
 0x7b1   :  { %v1114_v15 = vpop.f32.mrb[32].mxu0 }
 0x7b2   :  { %v1772_v16 = vpop.f32.mrb[33].mxu0 }
 0x7b3   :  { %v1117_v17 = vpop.f32.mrb[34].mxu0 }
 0x7b4   :  { %v1773_v18 = vpop.f32.mrb[35].mxu0 }
 0x7dd   :  { %v1183_v22 = vpop.xlane.xlu0 %1182 }
 0x7e5   :  { %v1303_v21 = vpop.xlane.xlu1 %1302 }
 0x7e9   :  { %v1066_v20 = vpop.xlane.xlu1 %1065 }
 0x7ea   :  { %1866 = vrcp.f32 %v1066_v20 }
 0x7eb   :  { %1868 = vrcp.f32 %v1183_v22 }
 0x7ec   :  { %1870 = vrcp.f32 %v1303_v21 }
 0x7ed   :  { %v1422_v23 = vpop.xlane.xlu0 %1421 }
 0x7ee   :  { %1872 = vrcp.f32 %v1422_v23 }
 0x7f1   :  { %v870_v27 = vpop.xlane.xlu0 %869 }
 0x7f2   :  { %vm871_vm12 = vcmp.eq.f32.partialorder %v870_v27, 0.0 }
 0x7f3   :  { %v1580_v28 = vsel %vm871_vm12, 1.0, %v2000_v0 }
 0x7f4   :  { %v1867_v29 = vpop.eup %1866  ;;  %v1071_v26 = vrot.slane %v1580_v28, %v2194_v40 }
 0x7f5   :  { %v1869_v32 = vpop.eup %1868 }
 0x7f6   :  { %v1072_v30 = vmul.f32 %v1867_v29, %v1071_v26  ;;  %v1185_v33 = vmul.f32 %v1869_v32, %v1071_v26  ;;  %v1871_v0 = vpop.eup %1870 }
 0x7f7   :  { %v1305_v40 = vmul.f32 %v1871_v0, %v1071_v26 }
 0x7f8   :  { %v1120_v31 = vmul.f32 %v1114_v15, %v1072_v30  ;;  %v1873_v46 = vpop.eup %1872 }
 0x7f9   :  { %v1424_v1 = vmul.f32 %v1873_v46, %v1071_v26 }
 0x7fa   :  { %v1121_v19 = vpack.c.bf16 %v1120_v31, %v1120_v31 }
 0x7fc   :  { %1122 = vst.msk [vmem:[#allocation2] sm:$0xf] %vm427_vm7, %v1121_v19 }
 0x824   :  { %v1230_v34 = vpop.f32.mrb[36].mxu0 }
 0x825   :  { %v1236_v35 = vmul.f32 %v1230_v34, %v1185_v33  ;;  %v1784_v36 = vpop.f32.mrb[37].mxu0 }
 0x826   :  { %v1233_v37 = vpop.f32.mrb[38].mxu0 }
 0x827   :  { %v1599_v38 = vpack.c.bf16 %v1236_v35, %v1236_v35  ;;  %v1785_v39 = vpop.f32.mrb[39].mxu0 }
 0x829   :  { %1241 = vrot.lane.b32.xlu0 %v1599_v38, %s1995_s10 }
 0x82c   :  { %v1349_v42 = vpop.f32.mrb[40].mxu0 }
 0x82d   :  { %v1355_v43 = vmul.f32 %v1349_v42, %v1305_v40  ;;  %v1796_v24 = vpop.f32.mrb[41].mxu0 }
 0x82e   :  { %v1352_v25 = vpop.f32.mrb[42].mxu0 }
 0x82f   :  { %v1600_v44 = vpack.c.bf16 %v1355_v43, %v1355_v43  ;;  %v1797_v45 = vpop.f32.mrb[43].mxu0 }
 0x831   :  { %1360 = vrot.lane.b32.xlu1 %v1600_v44, %s2005_s0 }
 0x834   :  { %v1468_v47 = vpop.f32.mrb[44].mxu0 }
 0x835   :  { %v1474_v41 = vmul.f32 %v1468_v47, %v1424_v1  ;;  %v1808_v48 = vpop.f32.mrb[45].mxu0 }
 0x836   :  { %v1471_v3 = vpop.f32.mrb[46].mxu0 }
 0x837   :  { %v1601_v50 = vpack.c.bf16 %v1474_v41, %v1474_v41  ;;  %v1809_v51 = vpop.f32.mrb[47].mxu0 }
 0x839   :  { %1479 = vrot.lane.b32.xlu1 %v1601_v50, %s2006_s24 }
 0x89b   :  { %v1242_v52 = vpop.permute.xlu0 %1241 }
 0x89c   :  { %1244 = vst.msk [vmem:[#allocation2] sm:$0xf] %vm550_vm8, %v1242_v52 }
 0x8a3   :  { %v1361_v53 = vpop.permute.xlu1 %1360 }
 0x8a4   :  { %1363 = vst.msk [vmem:[#allocation2] sm:$0xf] %vm670_vm9, %v1361_v53 }
 0x8ab   :  { %v1480_v54 = vpop.permute.xlu1 %1479 }
 0x8ac   :  { %1482 = vst.msk [vmem:[#allocation2] sm:$0xf] %vm790_vm10, %v1480_v54 }
 0x8b3   :  { %v1483_v55 = vld [vmem:[#allocation2] sm:$0xf] }
 0x8b4   :  { %1815 = vmatmul.mubr.msk.bf16.vlgmr.msra.gmra.mrb[44].mxu1 %vm140_vm1, %v1483_v55 }
 0x987   :  { %v1521_v56 = vpop.f32.mrb[44].mxu1 }
 0x988   :  { %v1522_v57 = vadd.f32 %v2288_v10, %v1521_v56  ;;  %v1816_v58 = vpop.f32.mrb[45].mxu1 }
 0x989   :  { %v1524_v59 = vpop.f32.mrb[46].mxu1 }
 0x98a   :  { %1528 = vst.msk [vmem:[#allocation11 + $0x8] sm:$0xff] %vm140_vm1, %v1522_v57  ;;  %v1817_v2 = vpop.f32.mrb[47].mxu1 }
 0x98b   :  { %1973 = shalt.err (!%p1970_p8)
}
 0x98c   :  { %s1974_s19 = scalar_lea.hbm %s2397_s6, 256 }
 0x98d   :  { %p1975_p9 = scmp.ne.s32.totalorder %s2397_s6, %s1974_s19  ;;  %p1978_p10 = scmp.lt.u32.totalorder %s1974_s19, %s2397_s6 }
 0x98f   :  { %p1980_p11 = pnand %p1978_p10, %p1975_p9 }
 0x991   :  { %1983 = shalt.err (!%p1980_p11)
}
 0x992   :  { %1540 = dma.vmem_to_hbm [thread:$0]  %s1535_s15, 256, %s2397_s6, [#allocation5], %s1994_s9, %s1994_s9, %s1995_s10  }
 0x993   :  { %1990 = dma.done.wait [#allocation5], 256  }
 0x994   :  { %1991 = vsyncadd [#allocation5], 4294967040 }
 0x995   :  { %1544 = vsyncpa [#allocation4], 1 }
 0x996   :  { %1545 = vsyncpa [#allocation7], 1 }
 0x997   :  { %1546 = vsyncpa [#allocation10], 1 }
 0x998   :  { %1547 = vsyncpa [#allocation5], 1 }

// kernel: tpu_custom_call.1
= control target key start
LH: loop header
LB: loop body
LE: loop exit
PB: predicated region body
PF: predicated region fallthrough
CT: control target
= control target key end

     0   :  { %11 = vsyncpa [#allocation4], 0  ;;  %s2391_s0 = inlined_call_operand.hbm [shape: f32[2,8,32], index: 0, kind: input, shape index: {}]   ;;  %s2392_s1 = inlined_call_operand.hbm [shape: f32[2,8,32], index: 1, kind: input, shape index: {}]   ;;  %s2393_s2 = inlined_call_operand.hbm [shape: f32[2,8,32], index: 2, kind: input, shape index: {}]   ;;  %s2394_s3 = inlined_call_operand.vmem [shape: f32[2,1,8], index: 3, kind: input, shape index: {}]   ;;  %s2395_s4 = inlined_call_operand.hbm [shape: bf16[4,32,32], index: 4, kind: input, shape index: {}]   ;;  %s2396_s5 = inlined_call_operand.vmem [shape: f32[4,1,32], index: 5, kind: input, shape index: {}]   ;;  %s2397_s6 = inlined_call_operand.hbm [shape: f32[2,8,32], index: 6, kind: output, shape index: {}]  }
   0x1   :  { %12 = vsyncpa [#allocation7], 0 }
   0x2   :  { %13 = vsyncpa [#allocation10], 0 }
   0x3   :  { %14 = vsyncpa [#allocation5], 0  ;;  %s1992_s21 = smov [#allocation6]   ;;  %s1993_s23 = smov [#allocation3]  }
   0x4   :  { %s32_s22 = sshll.u32 %s1992_s21, 4  ;;  %s20_s24 = sshll.u32 %s1993_s23, 4  ;;  %s33_s22 = int_to_ptr.vmem [resolvable:$true] %s32_s22  ;;  %s2043_s24 = int_to_ptr.vmem [resolvable:$true] %s20_s24 }
   0x5   :  { %s1874_s27 = scalar_lea.hbm %s2392_s1, 256 }
   0x6   :  { %p1875_p0 = scmp.ne.s32.totalorder %s2392_s1, %s1874_s27  ;;  %p1878_p1 = scmp.lt.u32.totalorder %s1874_s27, %s2392_s1 }
   0x8   :  { %p1880_p2 = pnand %p1878_p1, %p1875_p0 }
   0xa   :  { %1883 = shalt.err (!%p1880_p2)
}
   0xb   :  { %s1884_s8 = scalar_lea.vmem %s33_s22, 256  ;;  %p1889_p4 = scmp.lt.s32.totalorder %s33_s22, %s33_s22 }
   0xc   :  { %p1885_p3 = scmp.ne.s32.totalorder %s33_s22, %s1884_s8  ;;  %p1890_p5 = scmp.lt.s32.totalorder %s1884_s8, %s1884_s8 }
   0xe   :  { %p1891_p6 = por %p1890_p5, %p1889_p4 }
  0x10   :  { %p1892_p7 = pnand %p1891_p6, %p1885_p3 }
  0x12   :  { %1895 = shalt.err (!%p1892_p7)
}
  0x13   :  { %s1994_s9 = smov 128   ;;  %s1995_s10 = smov 8  }
  0x14   :  { %38 = dma.hbm_to_vmem [thread:$0]  %s2392_s1, 256, %s33_s22, [#allocation7], %s1994_s9, %s1994_s9, %s1995_s10  }
  0x15   :  { %s1896_s15 = scalar_lea.hbm %s2391_s0, 256 }
  0x16   :  { %p1897_p8 = scmp.ne.s32.totalorder %s2391_s0, %s1896_s15  ;;  %p1900_p9 = scmp.lt.u32.totalorder %s1896_s15, %s2391_s0 }
  0x18   :  { %p1902_p10 = pnand %p1900_p9, %p1897_p8 }
  0x1a   :  { %1905 = shalt.err (!%p1902_p10)
}
  0x1b   :  { %s1906_s20 = scalar_lea.vmem %s2043_s24, 256  ;;  %p1911_p12 = scmp.lt.s32.totalorder %s2043_s24, %s2043_s24 }
  0x1c   :  { %p1907_p11 = scmp.ne.s32.totalorder %s2043_s24, %s1906_s20  ;;  %p1912_p13 = scmp.lt.s32.totalorder %s1906_s20, %s1906_s20 }
  0x1e   :  { %p1913_p0 = por %p1912_p13, %p1911_p12 }
  0x20   :  { %p1914_p1 = pnand %p1913_p0, %p1907_p11 }
  0x22   :  { %1917 = shalt.err (!%p1914_p1)
}
  0x23   :  { %26 = dma.hbm_to_vmem [thread:$0]  %s2391_s0, 256, %s2043_s24, [#allocation4], %s1994_s9, %s1994_s9, %s1995_s10  }
  0x24   :  { %s1996_s22 = smov [#allocation8]   ;;  %s1997_s25 = smov [#allocation9]  }
  0x25   :  { %s44_s23 = sshll.u32 %s1996_s22, 4  ;;  %s58_s26 = sshll.u32 %s1997_s25, 4  ;;  %s45_s23 = int_to_ptr.vmem [resolvable:$true] %s44_s23  ;;  %s2080_s26 = int_to_ptr.vmem [resolvable:$true] %s58_s26 }
  0x26   :  { %s1918_s29 = scalar_lea.hbm %s2393_s2, 256 }
  0x27   :  { %p1919_p2 = scmp.ne.s32.totalorder %s2393_s2, %s1918_s29  ;;  %p1922_p3 = scmp.lt.u32.totalorder %s1918_s29, %s2393_s2 }
  0x29   :  { %p1924_p4 = pnand %p1922_p3, %p1919_p2 }
  0x2b   :  { %1927 = shalt.err (!%p1924_p4)
}
  0x2c   :  { %s1928_s0 = scalar_lea.vmem %s45_s23, 256  ;;  %p1933_p6 = scmp.lt.s32.totalorder %s45_s23, %s45_s23 }
  0x2d   :  { %p1929_p5 = scmp.ne.s32.totalorder %s45_s23, %s1928_s0  ;;  %p1934_p7 = scmp.lt.s32.totalorder %s1928_s0, %s1928_s0 }
  0x2f   :  { %p1935_p8 = por %p1934_p7, %p1933_p6 }
  0x31   :  { %p1936_p9 = pnand %p1935_p8, %p1929_p5 }
  0x33   :  { %1939 = shalt.err (!%p1936_p9)
}
  0x34   :  { %50 = dma.hbm_to_vmem [thread:$0]  %s2393_s2, 256, %s45_s23, [#allocation7], %s1994_s9, %s1994_s9, %s1995_s10  }
  0x35   :  { %s1940_s15 = scalar_lea.hbm %s2395_s4, 1024 }
  0x36   :  { %p1941_p10 = scmp.ne.s32.totalorder %s2395_s4, %s1940_s15  ;;  %p1944_p11 = scmp.lt.u32.totalorder %s1940_s15, %s2395_s4 }
  0x38   :  { %p1946_p12 = pnand %p1944_p11, %p1941_p10 }
  0x3a   :  { %1949 = shalt.err (!%p1946_p12)
}
  0x3b   :  { %s1950_s20 = scalar_lea.vmem %s2080_s26, 1024  ;;  %p1955_p0 = scmp.lt.s32.totalorder %s2080_s26, %s2080_s26 }
  0x3c   :  { %p1951_p13 = scmp.ne.s32.totalorder %s2080_s26, %s1950_s20  ;;  %p1956_p1 = scmp.lt.s32.totalorder %s1950_s20, %s1950_s20 }
  0x3e   :  { %p1957_p2 = por %p1956_p1, %p1955_p0 }
  0x40   :  { %p1958_p3 = pnand %p1957_p2, %p1951_p13 }
  0x42   :  { %1961 = shalt.err (!%p1958_p3)
}
  0x43   :  { %s1998_s2 = smov 64   ;;  %s1999_s1 = smov 4  }
  0x44   :  { %64 = dma.hbm_to_vmem [thread:$0]  %s2395_s4, 1024, %s2080_s26, [#allocation10], %s1998_s2, %s1998_s2, %s1999_s1  }
  0x45   :  { %1984 = dma.done.wait [#allocation4], 256  }
  0x46   :  { %1985 = vsyncadd [#allocation4], 4294967040 }
  0x47   :  { %1986 = dma.done.wait [#allocation7], 512  }
  0x48   :  { %1987 = vsyncadd [#allocation7], 4294966784 }
  0x49   :  { %1988 = dma.done.wait [#allocation10], 1024  }
  0x4a   :  { %1989 = vsyncadd [#allocation10], 4294966272  ;;  %v2000_v0 = vmov 0.0   ;;  %vm2001_vm0 = vmmov 0   ;;  %v2120_v1 = vld [vmem:[#allocation9 + $0x10] sm:$0xff]   ;;  %v2122_v2 = vld [vmem:[#allocation9] sm:$0xff]   ;;  %v310_v37 = vlaneseq }
  0x4b   :  { %1666 = vmatprep.subr.bf16.mxu1 %v2000_v0  ;;  %1658 = vmatprep.subr.bf16.mxu0 %v2000_v0  ;;  %v2125_v3 = vld [vmem:[#allocation9 + $0x18] sm:$0xff]   ;;  %v108_v4 = vld [vmem:[#allocation6] sm:$0xff]  ;;  %vm140_vm1 = vcmask 261120   ;;  %v2130_v5 = vld [vmem:[#allocation9 + $0x8] sm:$0xff]   ;;  %vm315_vm2 = vcmask 64512   ;;  %s2002_s27 = smov 112  }
  0x4c   :  { %1670 = vmatprep.mubr.msk.bf16.mxu1 %vm2001_vm0, %v2000_v0  ;;  %1662 = vmatprep.mubr.msk.bf16.mxu0 %vm2001_vm0, %v2000_v0  ;;  %v106_v6 = vld [vmem:[#allocation3] sm:$0xff]  ;;  %v109_v7 = vpack.c.bf16 %v108_v4, %v108_v4  ;;  %v2145_v9 = vld [vmem:[%s2396_s5 + $0x1] ss:$0 sm:$0xff]  ;;  %v2150_v10 = vld [vmem:[%s2396_s5] ss:$0 sm:$0xff]  ;;  %s2003_s28 = smov 120  }
  0x4d   :  { %1667 = vmatpush3.bf16.msra.mxu1 %v2120_v1  ;;  %1659 = vmatpush3.bf16.msra.mxu0 %v2122_v2  ;;  %v107_v8 = vpack.c.bf16 %v106_v6, %v106_v6  ;;  %s2004_s29 = smov 104   ;;  %v2165_v24 = vld [vmem:[#allocation9 + $0x20] sm:$0xff]   ;;  %v2168_v25 = vld [vmem:[#allocation9 + $0x28] sm:$0xff]   ;;  %v110_v26 = vld [vmem:[#allocation8] sm:$0xff]  ;;  %v311_v39 = vshrl.u32 %v310_v37, 7  ;;  %vm381_vm4 = vcmask 1043456  }
  0x4e   :  { %1668 = vmatprep.subr.bf16.mxu1 %v2000_v0  ;;  %1660 = vmatprep.subr.bf16.mxu0 %v2000_v0  ;;  %v111_v27 = vpack.c.bf16 %v110_v26, %v110_v26  ;;  %v112_v38 = vld [vmem:[%s2394_s3] sm:$0x1]  ;;  %v2205_v49 = vld [vmem:[%s2396_s5 + $0x2] ss:$0 sm:$0xff]  ;;  %vm115_vm5 = vcmask 57344   ;;  %vm427_vm7 = vcmask 60416  }
  0x4f   :  { %vm113_vm3 = vcmp.eq.f32.partialorder %v112_v38, 0.0  ;;  %v2194_v40 = vsub.s32 0, %v311_v39  ;;  %s2005_s0 = smov 16   ;;  %s2006_s24 = smov 24   ;;  %vm550_vm8 = vcmask 126016   ;;  %vm670_vm9 = vcmask 191616  }
  0x50   :  { %v2197_v41 = vsel %vm113_vm3, -1e+30, %v2000_v0  ;;  %vm790_vm10 = vcmask 257216  }
  0x51   :  { %1669 = vmatpush3.bf16.msra.mxu1 %v2125_v3  ;;  %1661 = vmatpush3.bf16.msra.mxu0 %v2130_v5  ;;  %v313_v42 = vrot.slane %v2197_v41, %v2194_v40  ;;  %v116_v38 = vsel %vm115_vm5, %v2197_v41, -inf }
  0x52   :  { %1682 = vmatprep.subr.bf16.mxu1 %v2000_v0  ;;  %1674 = vmatprep.subr.bf16.mxu0 %v2000_v0 }
  0x54   :  { %1671 = vmatmul.mubr.msk.bf16.vlgmr.msra.gmra.mrb[0].mxu1 %vm140_vm1, %v109_v7  ;;  %1663 = vmatmul.mubr.msk.bf16.vlgmr.msra.gmra.mrb[0].mxu0 %vm140_vm1, %v107_v8 }
  0x55   :  { %1684 = vmatprep.mubr.msk.bf16.mxu1 %vm2001_vm0, %v2000_v0  ;;  %1678 = vmatprep.mubr.msk.bf16.mxu0 %vm2001_vm0, %v2000_v0 }
  0x56   :  { %1675 = vmatpush3.bf16.msra.mxu0 %v2165_v24 }
  0x57   :  { %1676 = vmatprep.subr.bf16.mxu0 %v2000_v0 }
  0x5a   :  { %1677 = vmatpush3.bf16.msra.mxu0 %v2168_v25 }
  0x5b   :  { %1688 = vmatprep.subr.bf16.mxu0 %v2000_v0 }
  0x5d   :  { %1679 = vmatmul.mubr.msk.bf16.vlgmr.msra.gmra.mrb[4].mxu0 %vm140_vm1, %v111_v27 }
  0x5e   :  { %1690 = vmatprep.mubr.msk.bf16.mxu0 %vm2001_vm0, %v2000_v0 }
 0x127   :  { %v240_v11 = vpop.f32.mrb[0].mxu1  ;;  %v178_v14 = vpop.f32.mrb[0].mxu0 }
 0x128   :  { %v241_v12 = vadd.f32 %v2145_v9, %v240_v11  ;;  %v1672_v13 = vpop.f32.mrb[1].mxu1  ;;  %v179_v16 = vadd.f32 %v2150_v10, %v178_v14  ;;  %v1664_v17 = vpop.f32.mrb[1].mxu0 }
 0x129   :  { %v243_v15 = vpop.f32.mrb[2].mxu1  ;;  %v181_v20 = vpop.f32.mrb[2].mxu0 }
 0x12a   :  { %v246_v18 = vpack.c.bf16 %v241_v12, %v241_v12  ;;  %v1673_v19 = vpop.f32.mrb[3].mxu1  ;;  %v1665_v21 = vpop.f32.mrb[3].mxu0  ;;  %v184_v22 = vpack.c.bf16 %v179_v16, %v179_v16 }
 0x12c   :  { %554 = vrot.lane.b32.xlu1 %v246_v18, %s2002_s27  ;;  %433 = vrot.lane.b32.xlu0 %v246_v18, %s2003_s28  ;;  %v320_v23 = vsel %vm315_vm2, %v246_v18, 0 }
 0x12d   :  { %1683 = vmatpush3.bf16.xpose.msra.mxu1 %v320_v23 }
 0x12e   :  { %1694 = vmatprep.subr.bf16.mxu1 %v2000_v0 }
 0x130   :  { %552 = vrot.lane.b32.xlu1 %v184_v22, %s2002_s27  ;;  %430 = vrot.lane.b32.xlu0 %v184_v22, %s2003_s28  ;;  %v302_v50 = vpop.f32.mrb[4].mxu0 }
 0x131   :  { %v303_v51 = vadd.f32 %v2205_v49, %v302_v50  ;;  %v1680_v52 = vpop.f32.mrb[5].mxu0 }
 0x132   :  { %v305_v53 = vpop.f32.mrb[6].mxu0 }
 0x133   :  { %v1681_v54 = vpop.f32.mrb[7].mxu0  ;;  %v308_v55 = vpack.c.bf16 %v303_v51, %v303_v51 }
 0x134   :  { %672 = vrot.lane.b32.xlu1 %v184_v22, %s2004_s29  ;;  %674 = vrot.lane.b32.xlu0 %v246_v18, %s2004_s29 }
 0x135   :  { %1685 = vmatmul.mubr.msk.bf16.vlgmr.msra.gmra.mrb[4].mxu1 %vm315_vm2, %v184_v22  ;;  %v383_v56 = vsel %vm381_vm4, %v308_v55, 0 }
 0x136   :  { %1696 = vmatprep.mubr.msk.bf16.mxu1 %vm2001_vm0, %v2000_v0  ;;  %1689 = vmatpush3.bf16.msra.mxu0 %v383_v56 }
 0x137   :  { %1700 = vmatprep.subr.bf16.mxu0 %v2000_v0 }
 0x19e   :  { %v434_v28 = vpop.permute.xlu0 %433  ;;  %v555_v30 = vpop.permute.xlu1 %554 }
 0x19f   :  { %v439_v29 = vsel %vm315_vm2, %v434_v28, 0  ;;  %v560_v32 = vsel %vm315_vm2, %v555_v30, 0 }
 0x1a0   :  { %1695 = vmatpush3.bf16.xpose.msra.mxu1 %v439_v29 }
 0x1a1   :  { %1706 = vmatprep.subr.bf16.mxu1 %v2000_v0 }
 0x1a2   :  { %v431_v31 = vpop.permute.xlu0 %430  ;;  %v553_v34 = vpop.permute.xlu1 %552 }
 0x1a6   :  { %v675_v33 = vpop.permute.xlu0 %674  ;;  %v673_v36 = vpop.permute.xlu1 %672 }
 0x1a7   :  { %1697 = vmatmul.mubr.msk.bf16.vlgmr.msra.gmra.mrb[8].mxu1 %vm315_vm2, %v431_v31  ;;  %v680_v35 = vsel %vm315_vm2, %v675_v33, 0 }
 0x1a8   :  { %1707 = vmatpush3.bf16.xpose.msra.mxu1 %v560_v32  ;;  %1708 = vmatprep.mubr.msk.bf16.mxu1 %vm2001_vm0, %v2000_v0 }
 0x1a9   :  { %1718 = vmatprep.subr.bf16.mxu1 %v2000_v0 }
 0x1af   :  { %1709 = vmatmul.mubr.msk.bf16.vlgmr.msra.gmra.mrb[12].mxu1 %vm315_vm2, %v553_v34 }
 0x1b0   :  { %1719 = vmatpush3.bf16.xpose.msra.mxu1 %v680_v35  ;;  %1720 = vmatprep.mubr.msk.bf16.mxu1 %vm2001_vm0, %v2000_v0 }
 0x1b1   :  { %1730 = vmatprep.subr.bf16.mxu1 %v2000_v0 }
 0x1b7   :  { %1721 = vmatmul.mubr.msk.bf16.vlgmr.msra.gmra.mrb[16].mxu1 %vm315_vm2, %v673_v36 }
 0x1b8   :  { %1734 = vmatprep.mubr.msk.bf16.mxu1 %vm2001_vm0, %v2000_v0 }
 0x208   :  { %v356_v43 = vpop.f32.mrb[4].mxu1 }
 0x209   :  { %v357_v44 = vadd.f32 %v356_v43, %v313_v42  ;;  %v1686_v45 = vpop.f32.mrb[5].mxu1 }
 0x20a   :  { %v359_v46 = vpop.f32.mrb[6].mxu1 }
 0x20b   :  { %v1687_v47 = vpop.f32.mrb[7].mxu1  ;;  %v362_v48 = vsel %vm315_vm2, %v357_v44, -inf }
 0x20c   :  { %363 = vmax.xlane.f32.xlu0 %v362_v48 }
 0x27a   :  { %v475_v57 = vpop.f32.mrb[8].mxu1 }
 0x27b   :  { %v476_v58 = vadd.f32 %v475_v57, %v313_v42  ;;  %v1698_v59 = vpop.f32.mrb[9].mxu1 }
 0x27c   :  { %v478_v60 = vpop.f32.mrb[10].mxu1 }
 0x27d   :  { %v1699_v61 = vpop.f32.mrb[11].mxu1  ;;  %v481_v62 = vsel %vm315_vm2, %v476_v58, -inf }
 0x27e   :  { %482 = vmax.xlane.f32.xlu1 %v481_v62 }
 0x282   :  { %v596_v63 = vpop.f32.mrb[12].mxu1 }
 0x283   :  { %v597_v4 = vadd.f32 %v596_v63, %v313_v42  ;;  %v1710_v6 = vpop.f32.mrb[13].mxu1 }
 0x284   :  { %v599_v7 = vpop.f32.mrb[14].mxu1 }
 0x285   :  { %v1711_v8 = vpop.f32.mrb[15].mxu1  ;;  %v602_v11 = vsel %vm315_vm2, %v597_v4, -inf }
 0x286   :  { %603 = vmax.xlane.f32.xlu0 %v602_v11 }
 0x28a   :  { %v716_v12 = vpop.f32.mrb[16].mxu1 }
 0x28b   :  { %v717_v13 = vadd.f32 %v716_v12, %v313_v42  ;;  %v1722_v14 = vpop.f32.mrb[17].mxu1 }
 0x28c   :  { %v719_v15 = vpop.f32.mrb[18].mxu1 }
 0x28d   :  { %v1723_v16 = vpop.f32.mrb[19].mxu1  ;;  %v722_v17 = vsel %vm315_vm2, %v717_v13, -inf }
 0x28e   :  { %723 = vmax.xlane.f32.xlu0 %v722_v17 }
 0x28f   :  { %494 = vrot.lane.b32.xlu1 %v308_v55, %s2003_s28 }
 0x293   :  { %734 = vrot.lane.b32.xlu1 %v308_v55, %s2004_s29 }
 0x299   :  { %v364_v18 = vpop.xlane.xlu0 %363 }
 0x29a   :  { %v365_v19 = vsub.f32 %v357_v44, %v364_v18 }
 0x29c   :  { %v366_v20 = vmul.f32 1.442695, %v365_v19 }
 0x29e   :  { %1842 = vpow2.f32 %v366_v20  ;;  %v2248_v20 = vld [vmem:[#allocation9 + $0x30] sm:$0xff]  }
 0x29f   :  { %1731 = vmatpush3.bf16.msra.mxu1 %v2248_v20 }
 0x2a0   :  { %1732 = vmatprep.subr.bf16.mxu1 %v2000_v0 }
 0x2a4   :  { %614 = vrot.lane.b32.xlu0 %v308_v55, %s2002_s27 }
 0x2a8   :  { %v1843_v21 = vpop.eup %1842 }
 0x2a9   :  { %v377_v22 = vpack.c.bf16 %v1843_v21, %v1843_v21  ;;  %v368_v52 = vsel %vm315_vm2, %v1843_v21, 0.0 }
 0x2ab   :  { %1691 = vmatmul.mubr.msk.bf16.vlgmr.msra.gmra.mrb[8].mxu0 %vm315_vm2, %v377_v22 }
 0x2ac   :  { %1702 = vmatprep.mubr.msk.bf16.mxu0 %vm2001_vm0, %v2000_v0 }
 0x30b   :  { %v483_v23 = vpop.xlane.xlu1 %482 }
 0x30c   :  { %v484_v26 = vsub.f32 %v476_v58, %v483_v23 }
 0x30e   :  { %v485_v27 = vmul.f32 1.442695, %v484_v26  ;;  %v2251_v26 = vld [vmem:[#allocation9 + $0x38] sm:$0xff]  }
 0x30f   :  { %v495_v28 = vpop.permute.xlu1 %494  ;;  %1733 = vmatpush3.bf16.msra.mxu1 %v2251_v26 }
 0x310   :  { %1844 = vpow2.f32 %v485_v27  ;;  %v500_v29 = vsel %vm381_vm4, %v495_v28, 0  ;;  %1746 = vmatprep.subr.bf16.mxu1 %v2000_v0 }
 0x311   :  { %1701 = vmatpush3.bf16.msra.mxu0 %v500_v29 }
 0x312   :  { %1712 = vmatprep.subr.bf16.mxu0 %v2000_v0 }
 0x313   :  { %v604_v30 = vpop.xlane.xlu0 %603  ;;  %v735_v45 = vpop.permute.xlu1 %734 }
 0x314   :  { %v605_v31 = vsub.f32 %v597_v4, %v604_v30  ;;  %v740_v41 = vsel %vm381_vm4, %v735_v45, 0 }
 0x316   :  { %v606_v32 = vmul.f32 1.442695, %v605_v31 }
 0x318   :  { %1846 = vpow2.f32 %v606_v32 }
 0x31a   :  { %v1845_v33 = vpop.eup %1844 }
 0x31b   :  { %v724_v34 = vpop.xlane.xlu0 %723  ;;  %v487_v35 = vsel %vm315_vm2, %v1845_v33, 0.0  ;;  %v492_v36 = vpack.c.bf16 %v1845_v33, %v1845_v33 }
 0x31c   :  { %v725_v37 = vsub.f32 %v717_v13, %v724_v34  ;;  %488 = vadd.xlane.f32.xlu1 %v487_v35 }
 0x31d   :  { %1703 = vmatmul.mubr.msk.bf16.vlgmr.msra.gmra.mrb[12].mxu0 %vm315_vm2, %v492_v36 }
 0x31e   :  { %v726_v39 = vmul.f32 1.442695, %v725_v37  ;;  %1714 = vmatprep.mubr.msk.bf16.mxu0 %vm2001_vm0, %v2000_v0  ;;  %v856_v37 = vld [vmem:[#allocation3 + $0x8] sm:$0xff] }
 0x31f   :  { %v615_v42 = vpop.permute.xlu0 %614 }
 0x320   :  { %1848 = vpow2.f32 %v726_v39  ;;  %v620_v43 = vsel %vm381_vm4, %v615_v42, 0  ;;  %117 = vmax.xlane.f32.xlu1 %v116_v38  ;;  %v857_v38 = vpack.c.bf16 %v856_v37, %v856_v37 }
 0x321   :  { %1713 = vmatpush3.bf16.msra.mxu0 %v620_v43 }
 0x322   :  { %v1847_v44 = vpop.eup %1846  ;;  %1724 = vmatprep.subr.bf16.mxu0 %v2000_v0 }
 0x323   :  { %v608_v46 = vsel %vm315_vm2, %v1847_v44, 0.0  ;;  %v613_v47 = vpack.c.bf16 %v1847_v44, %v1847_v44 }
 0x324   :  { %609 = vadd.xlane.f32.xlu0 %v608_v46 }
 0x325   :  { %1715 = vmatmul.mubr.msk.bf16.vlgmr.msra.gmra.mrb[16].mxu0 %vm315_vm2, %v613_v47 }
 0x326   :  { %1725 = vmatpush3.bf16.msra.mxu0 %v740_v41  ;;  %1726 = vmatprep.mubr.msk.bf16.mxu0 %vm2001_vm0, %v2000_v0 }
 0x327   :  { %1738 = vmatprep.subr.bf16.mxu0 %v2000_v0 }
 0x32a   :  { %v1849_v48 = vpop.eup %1848 }
 0x32b   :  { %v728_v50 = vsel %vm315_vm2, %v1849_v48, 0.0  ;;  %v733_v51 = vpack.c.bf16 %v1849_v48, %v1849_v48 }
 0x32c   :  { %729 = vadd.xlane.f32.xlu0 %v728_v50 }
 0x32d   :  { %1727 = vmatmul.mubr.msk.bf16.vlgmr.msra.gmra.mrb[20].mxu0 %vm315_vm2, %v733_v51 }
 0x32e   :  { %1739 = vmatpush3.bf16.msra.mxu0 %v2122_v2  ;;  %1742 = vmatprep.mubr.msk.bf16.mxu0 %vm2001_vm0, %v2000_v0 }
 0x32f   :  { %1740 = vmatprep.subr.bf16.mxu0 %v2000_v0 }
 0x330   :  { %369 = vadd.xlane.f32.xlu0 %v368_v52 }
 0x332   :  { %1741 = vmatpush3.bf16.msra.mxu0 %v2130_v5 }
 0x333   :  { %1754 = vmatprep.subr.bf16.mxu0 %v2000_v0 }
 0x335   :  { %1743 = vmatmul.mubr.msk.bf16.vlgmr.msra.gmra.mrb[24].mxu0 %vm140_vm1, %v857_v38 }
 0x336   :  { %1755 = vmatpush3.bf16.msra.mxu0 %v2165_v24  ;;  %1758 = vmatprep.mubr.msk.bf16.mxu0 %vm2001_vm0, %v2000_v0 }
 0x337   :  { %1756 = vmatprep.subr.bf16.mxu0 %v2000_v0 }
 0x33a   :  { %1757 = vmatpush3.bf16.msra.mxu0 %v2168_v25  ;;  %v859_v25 = vld [vmem:[#allocation6 + $0x8] sm:$0xff] }
 0x33b   :  { %1768 = vmatprep.subr.bf16.mxu0 %v2000_v0  ;;  %v860_v44 = vpack.c.bf16 %v859_v25, %v859_v25 }
 0x37e   :  { %v419_v53 = vpop.f32.mrb[8].mxu0 }
 0x37f   :  { %v1692_v54 = vpop.f32.mrb[9].mxu0 }
 0x380   :  { %v422_v55 = vpop.f32.mrb[10].mxu0 }
 0x381   :  { %v1693_v56 = vpop.f32.mrb[11].mxu0 }
 0x3a9   :  { %v489_v59 = vpop.xlane.xlu1 %488 }
 0x3ad   :  { %v118_v60 = vpop.xlane.xlu1 %117 }
 0x3ae   :  { %vm119_vm6 = vcmp.eq.f32.partialorder %v118_v60, 0.0 }
 0x3af   :  { %v1551_v61 = vsel %vm119_vm6, 1.0, %v2000_v0 }
 0x3b0   :  { %v375_v62 = vrot.slane %v1551_v61, %v2194_v40 }
 0x3b1   :  { %v610_v57 = vpop.xlane.xlu0 %609 }
 0x3b9   :  { %v730_v58 = vpop.xlane.xlu0 %729 }
 0x3bd   :  { %v370_v2 = vpop.xlane.xlu0 %369 }
 0x3be   :  { %1850 = vrcp.f32 %v370_v2 }
 0x3bf   :  { %1852 = vrcp.f32 %v489_v59 }
 0x3c0   :  { %1854 = vrcp.f32 %v610_v57 }
 0x3c1   :  { %1856 = vrcp.f32 %v730_v58 }
 0x3c8   :  { %v1851_v63 = vpop.eup %1850 }
 0x3c9   :  { %v376_v4 = vmul.f32 %v1851_v63, %v375_v62  ;;  %v1853_v7 = vpop.eup %1852 }
 0x3ca   :  { %v491_v8 = vmul.f32 %v1853_v7, %v375_v62  ;;  %v1855_v17 = vpop.eup %1854 }
 0x3cb   :  { %v425_v5 = vmul.f32 %v419_v53, %v376_v4  ;;  %v612_v18 = vmul.f32 %v1855_v17, %v375_v62  ;;  %v1857_v29 = vpop.eup %1856 }
 0x3cc   :  { %v732_v30 = vmul.f32 %v1857_v29, %v375_v62 }
 0x3cd   :  { %v426_v6 = vpack.c.bf16 %v425_v5, %v425_v5 }
 0x3cf   :  { %428 = vst.msk [vmem:[#allocation2] sm:$0xf] %vm427_vm7, %v426_v6 }
 0x3f0   :  { %v536_v11 = vpop.f32.mrb[12].mxu0 }
 0x3f1   :  { %v542_v12 = vmul.f32 %v536_v11, %v491_v8  ;;  %v1704_v13 = vpop.f32.mrb[13].mxu0 }
 0x3f2   :  { %v539_v14 = vpop.f32.mrb[14].mxu0 }
 0x3f3   :  { %v1596_v15 = vpack.c.bf16 %v542_v12, %v542_v12  ;;  %v1705_v16 = vpop.f32.mrb[15].mxu0 }
 0x3f5   :  { %547 = vrot.lane.b32.xlu1 %v1596_v15, %s1995_s10 }
 0x3f8   :  { %v656_v19 = vpop.f32.mrb[16].mxu0 }
 0x3f9   :  { %v662_v21 = vmul.f32 %v656_v19, %v612_v18  ;;  %v1716_v22 = vpop.f32.mrb[17].mxu0  ;;  %v1579_v18 = vld [vmem:[%s2394_s3 + $0x1] sm:$0x1]  ;;  %s2007_s3 = smov [#allocation11]  }
 0x3fa   :  { %v659_v23 = vpop.f32.mrb[18].mxu0  ;;  %vm866_vm11 = vcmp.eq.f32.partialorder %v1579_v18, 0.0  ;;  %s1534_s15 = sshll.u32 %s2007_s3, 4  ;;  %s1535_s15 = int_to_ptr.vmem [resolvable:$true] %s1534_s15 }
 0x3fb   :  { %v1597_v27 = vpack.c.bf16 %v662_v21, %v662_v21  ;;  %v1717_v28 = vpop.f32.mrb[19].mxu0  ;;  %v2329_v19 = vsel %vm866_vm11, -1e+30, %v2000_v0  ;;  %s1962_s16 = scalar_lea.vmem %s1535_s15, 256  ;;  %p1967_p5 = scmp.lt.s32.totalorder %s1535_s15, %s1535_s15 }
 0x3fc   :  { %v1010_v21 = vrot.slane %v2329_v19, %v2194_v40  ;;  %p1963_p4 = scmp.ne.s32.totalorder %s1535_s15, %s1962_s16  ;;  %p1968_p6 = scmp.lt.s32.totalorder %s1962_s16, %s1962_s16 }
 0x3fd   :  { %667 = vrot.lane.b32.xlu0 %v1597_v27, %s2005_s0 }
 0x3fe   :  { %p1969_p7 = por %p1968_p6, %p1967_p5 }
 0x400   :  { %v776_v31 = vpop.f32.mrb[20].mxu0  ;;  %p1970_p8 = pnand %p1969_p7, %p1963_p4 }
 0x401   :  { %v782_v32 = vmul.f32 %v776_v31, %v732_v30  ;;  %v1728_v33 = vpop.f32.mrb[21].mxu0 }
 0x402   :  { %v779_v34 = vpop.f32.mrb[22].mxu0 }
 0x403   :  { %v1598_v35 = vpack.c.bf16 %v782_v32, %v782_v32  ;;  %v1729_v36 = vpop.f32.mrb[23].mxu0 }
 0x405   :  { %787 = vrot.lane.b32.xlu1 %v1598_v35, %s2006_s24 }
 0x408   :  { %v911_v45 = vpop.f32.mrb[24].mxu0 }
 0x409   :  { %v912_v46 = vadd.f32 %v2150_v10, %v911_v45  ;;  %v2288_v10 = vld [vmem:[%s2396_s5 + $0x3] ss:$0 sm:$0xff] }
 0x40b   :  { %v917_v41 = vpack.c.bf16 %v912_v46, %v912_v46 }
 0x40d   :  { %1124 = vrot.lane.b32.xlu0 %v917_v41, %s2003_s28 }
 0x411   :  { %1245 = vrot.lane.b32.xlu0 %v917_v41, %s2002_s27 }
 0x415   :  { %1364 = vrot.lane.b32.xlu0 %v917_v41, %s2004_s29 }
 0x467   :  { %v548_v39 = vpop.permute.xlu1 %547 }
 0x468   :  { %551 = vst.msk [vmem:[#allocation2] sm:$0xf] %vm550_vm8, %v548_v39 }
 0x46f   :  { %v668_v42 = vpop.permute.xlu0 %667 }
 0x470   :  { %671 = vst.msk [vmem:[#allocation2] sm:$0xf] %vm670_vm9, %v668_v42 }
 0x477   :  { %v788_v43 = vpop.permute.xlu1 %787 }
 0x478   :  { %791 = vst.msk [vmem:[#allocation2] sm:$0xf] %vm790_vm10, %v788_v43 }
 0x47f   :  { %v792_v24 = vld [vmem:[#allocation2] sm:$0xf]  ;;  %v1125_v13 = vpop.permute.xlu0 %1124 }
 0x480   :  { %1735 = vmatmul.mubr.msk.bf16.vlgmr.msra.gmra.mrb[20].mxu1 %vm140_vm1, %v792_v24 }
 0x481   :  { %1747 = vmatpush3.bf16.msra.mxu1 %v2120_v1  ;;  %1750 = vmatprep.mubr.msk.bf16.mxu1 %vm2001_vm0, %v2000_v0  ;;  %v1744_v1 = vpop.f32.mrb[25].mxu0 }
 0x482   :  { %1748 = vmatprep.subr.bf16.mxu1 %v2000_v0  ;;  %v914_v47 = vpop.f32.mrb[26].mxu0 }
 0x483   :  { %v1745_v48 = vpop.f32.mrb[27].mxu0  ;;  %v1246_v15 = vpop.permute.xlu0 %1245 }
 0x485   :  { %1749 = vmatpush3.bf16.msra.mxu1 %v2125_v3  ;;  %v862_v3 = vld [vmem:[#allocation8 + $0x8] sm:$0xff] }
 0x486   :  { %1762 = vmatprep.subr.bf16.mxu1 %v2000_v0  ;;  %v863_v50 = vpack.c.bf16 %v862_v3, %v862_v3 }
 0x487   :  { %v1365_v17 = vpop.permute.xlu0 %1364 }
 0x488   :  { %1751 = vmatmul.mubr.msk.bf16.vlgmr.msra.gmra.mrb[24].mxu1 %vm140_vm1, %v860_v44  ;;  %1759 = vmatmul.mubr.msk.bf16.vlgmr.msra.gmra.mrb[28].mxu0 %vm140_vm1, %v863_v50 }
 0x489   :  { %1764 = vmatprep.mubr.msk.bf16.mxu1 %vm2001_vm0, %v2000_v0  ;;  %1770 = vmatprep.mubr.msk.bf16.mxu0 %vm2001_vm0, %v2000_v0 }
 0x553   :  { %v848_v51 = vpop.f32.mrb[20].mxu1 }
 0x554   :  { %v849_v52 = vadd.f32 %v2288_v10, %v848_v51  ;;  %v1736_v53 = vpop.f32.mrb[21].mxu1 }
 0x555   :  { %v851_v54 = vpop.f32.mrb[22].mxu1 }
 0x556   :  { %854 = vst.msk [vmem:[#allocation11] sm:$0xff] %vm140_vm1, %v849_v52  ;;  %v1737_v55 = vpop.f32.mrb[23].mxu1 }
 0x55b   :  { %v955_v56 = vpop.f32.mrb[24].mxu1 }
 0x55c   :  { %v956_v57 = vadd.f32 %v2145_v9, %v955_v56  ;;  %v1752_v58 = vpop.f32.mrb[25].mxu1  ;;  %v999_v9 = vpop.f32.mrb[28].mxu0 }
 0x55d   :  { %v958_v59 = vpop.f32.mrb[26].mxu1  ;;  %v1760_v62 = vpop.f32.mrb[29].mxu0  ;;  %v1000_v5 = vadd.f32 %v2205_v49, %v999_v9 }
 0x55e   :  { %v961_v2 = vpack.c.bf16 %v956_v57, %v956_v57  ;;  %v1753_v60 = vpop.f32.mrb[27].mxu1  ;;  %v1002_v63 = vpop.f32.mrb[30].mxu0 }
 0x55f   :  { %v1761_v4 = vpop.f32.mrb[31].mxu0  ;;  %v2302_v6 = vpack.c.bf16 %v1000_v5, %v1000_v5 }
 0x560   :  { %1127 = vrot.lane.b32.xlu1 %v961_v2, %s2003_s28  ;;  %v1016_v61 = vsel %vm315_vm2, %v961_v2, 0 }
 0x561   :  { %1763 = vmatpush3.bf16.xpose.msra.mxu1 %v1016_v61  ;;  %v1078_v7 = vsel %vm381_vm4, %v2302_v6, 0 }
 0x562   :  { %1774 = vmatprep.subr.bf16.mxu1 %v2000_v0  ;;  %1769 = vmatpush3.bf16.msra.mxu0 %v1078_v7 }
 0x563   :  { %1780 = vmatprep.subr.bf16.mxu0 %v2000_v0 }
 0x564   :  { %1247 = vrot.lane.b32.xlu1 %v961_v2, %s2002_s27 }
 0x568   :  { %1366 = vrot.lane.b32.xlu1 %v961_v2, %s2004_s29  ;;  %1765 = vmatmul.mubr.msk.bf16.vlgmr.msra.gmra.mrb[28].mxu1 %vm315_vm2, %v917_v41 }
 0x569   :  { %1776 = vmatprep.mubr.msk.bf16.mxu1 %vm2001_vm0, %v2000_v0 }
 0x5d2   :  { %v1128_v8 = vpop.permute.xlu1 %1127 }
 0x5d3   :  { %v1133_v11 = vsel %vm315_vm2, %v1128_v8, 0 }
 0x5d4   :  { %1775 = vmatpush3.bf16.xpose.msra.mxu1 %v1133_v11 }
 0x5d5   :  { %1786 = vmatprep.subr.bf16.mxu1 %v2000_v0 }
 0x5d6   :  { %v1248_v12 = vpop.permute.xlu1 %1247 }
 0x5d7   :  { %v1253_v14 = vsel %vm315_vm2, %v1248_v12, 0 }
 0x5da   :  { %v1367_v49 = vpop.permute.xlu1 %1366 }
 0x5db   :  { %1777 = vmatmul.mubr.msk.bf16.vlgmr.msra.gmra.mrb[32].mxu1 %vm315_vm2, %v1125_v13  ;;  %v1372_v16 = vsel %vm315_vm2, %v1367_v49, 0  ;;  %v868_v49 = vsel %vm115_vm5, %v2329_v19, -inf }
 0x5dc   :  { %1787 = vmatpush3.bf16.xpose.msra.mxu1 %v1253_v14  ;;  %1788 = vmatprep.mubr.msk.bf16.mxu1 %vm2001_vm0, %v2000_v0 }
 0x5dd   :  { %1798 = vmatprep.subr.bf16.mxu1 %v2000_v0 }
 0x5e3   :  { %1789 = vmatmul.mubr.msk.bf16.vlgmr.msra.gmra.mrb[36].mxu1 %vm315_vm2, %v1246_v15 }
 0x5e4   :  { %1799 = vmatpush3.bf16.xpose.msra.mxu1 %v1372_v16  ;;  %1800 = vmatprep.mubr.msk.bf16.mxu1 %vm2001_vm0, %v2000_v0 }
 0x5e5   :  { %1810 = vmatprep.subr.bf16.mxu1 %v2000_v0 }
 0x5eb   :  { %1801 = vmatmul.mubr.msk.bf16.vlgmr.msra.gmra.mrb[40].mxu1 %vm315_vm2, %v1365_v17 }
 0x5ec   :  { %1811 = vmatpush3.bf16.msra.mxu1 %v2248_v20  ;;  %1814 = vmatprep.mubr.msk.bf16.mxu1 %vm2001_vm0, %v2000_v0 }
 0x5ed   :  { %1812 = vmatprep.subr.bf16.mxu1 %v2000_v0 }
 0x5f0   :  { %1813 = vmatpush3.bf16.msra.mxu1 %v2251_v26 }
 0x63b   :  { %v1052_v22 = vpop.f32.mrb[28].mxu1 }
 0x63c   :  { %v1053_v20 = vadd.f32 %v1052_v22, %v1010_v21  ;;  %v1766_v23 = vpop.f32.mrb[29].mxu1 }
 0x63d   :  { %v1055_v27 = vpop.f32.mrb[30].mxu1 }
 0x63e   :  { %v1767_v28 = vpop.f32.mrb[31].mxu1  ;;  %v1058_v29 = vsel %vm315_vm2, %v1053_v20, -inf }
 0x63f   :  { %1059 = vmax.xlane.f32.xlu1 %v1058_v29 }
 0x650   :  { %1307 = vrot.lane.b32.xlu1 %v2302_v6, %s2002_s27 }
 0x6ae   :  { %v1169_v26 = vpop.f32.mrb[32].mxu1 }
 0x6af   :  { %v1170_v30 = vadd.f32 %v1169_v26, %v1010_v21  ;;  %v1778_v31 = vpop.f32.mrb[33].mxu1 }
 0x6b0   :  { %v1172_v32 = vpop.f32.mrb[34].mxu1 }
 0x6b1   :  { %v1779_v33 = vpop.f32.mrb[35].mxu1  ;;  %v1175_v34 = vsel %vm315_vm2, %v1170_v30, -inf }
 0x6b2   :  { %1176 = vmax.xlane.f32.xlu0 %v1175_v34 }
 0x6b6   :  { %v1289_v35 = vpop.f32.mrb[36].mxu1 }
 0x6b7   :  { %v1290_v36 = vadd.f32 %v1289_v35, %v1010_v21  ;;  %v1790_v37 = vpop.f32.mrb[37].mxu1 }
 0x6b8   :  { %v1292_v38 = vpop.f32.mrb[38].mxu1 }
 0x6b9   :  { %v1791_v39 = vpop.f32.mrb[39].mxu1  ;;  %v1295_v42 = vsel %vm315_vm2, %v1290_v36, -inf }
 0x6ba   :  { %1296 = vmax.xlane.f32.xlu0 %v1295_v42 }
 0x6be   :  { %v1408_v43 = vpop.f32.mrb[40].mxu1 }
 0x6bf   :  { %v1409_v24 = vadd.f32 %v1408_v43, %v1010_v21  ;;  %v1802_v25 = vpop.f32.mrb[41].mxu1 }
 0x6c0   :  { %v1411_v44 = vpop.f32.mrb[42].mxu1 }
 0x6c1   :  { %v1803_v45 = vpop.f32.mrb[43].mxu1  ;;  %v1414_v46 = vsel %vm315_vm2, %v1409_v24, -inf }
 0x6c2   :  { %1415 = vmax.xlane.f32.xlu1 %v1414_v46 }
 0x6cc   :  { %v1060_v1 = vpop.xlane.xlu1 %1059 }
 0x6cd   :  { %v1061_v47 = vsub.f32 %v1053_v20, %v1060_v1 }
 0x6cf   :  { %v1062_v41 = vmul.f32 1.442695, %v1061_v47 }
 0x6d0   :  { %1188 = vrot.lane.b32.xlu0 %v2302_v6, %s2003_s28  ;;  %v1308_v56 = vpop.permute.xlu1 %1307 }
 0x6d1   :  { %1858 = vpow2.f32 %v1062_v41  ;;  %v1313_v62 = vsel %vm381_vm4, %v1308_v56, 0 }
 0x6d3   :  { %1426 = vrot.lane.b32.xlu1 %v2302_v6, %s2004_s29 }
 0x6db   :  { %v1859_v48 = vpop.eup %1858 }
 0x6dc   :  { %v1073_v3 = vpack.c.bf16 %v1859_v48, %v1859_v48  ;;  %v1064_v11 = vsel %vm315_vm2, %v1859_v48, 0.0 }
 0x6de   :  { %1771 = vmatmul.mubr.msk.bf16.vlgmr.msra.gmra.mrb[32].mxu0 %vm315_vm2, %v1073_v3 }
 0x6df   :  { %1782 = vmatprep.mubr.msk.bf16.mxu0 %vm2001_vm0, %v2000_v0 }
 0x73f   :  { %v1177_v50 = vpop.xlane.xlu0 %1176 }
 0x740   :  { %v1178_v51 = vsub.f32 %v1170_v30, %v1177_v50 }
 0x742   :  { %v1179_v52 = vmul.f32 1.442695, %v1178_v51 }
 0x744   :  { %1860 = vpow2.f32 %v1179_v52 }
 0x747   :  { %v1297_v53 = vpop.xlane.xlu0 %1296 }
 0x748   :  { %v1298_v54 = vsub.f32 %v1290_v36, %v1297_v53 }
 0x74a   :  { %v1299_v55 = vmul.f32 1.442695, %v1298_v54 }
 0x74b   :  { %v1189_v57 = vpop.permute.xlu0 %1188 }
 0x74c   :  { %1862 = vpow2.f32 %v1299_v55  ;;  %v1194_v58 = vsel %vm381_vm4, %v1189_v57, 0 }
 0x74d   :  { %1781 = vmatpush3.bf16.msra.mxu0 %v1194_v58 }
 0x74e   :  { %v1861_v59 = vpop.eup %1860  ;;  %1792 = vmatprep.subr.bf16.mxu0 %v2000_v0 }
 0x74f   :  { %v1416_v2 = vpop.xlane.xlu1 %1415  ;;  %v1181_v60 = vsel %vm315_vm2, %v1861_v59, 0.0  ;;  %v1186_v61 = vpack.c.bf16 %v1861_v59, %v1861_v59 }
 0x750   :  { %v1417_v9 = vsub.f32 %v1409_v24, %v1416_v2  ;;  %1182 = vadd.xlane.f32.xlu0 %v1181_v60 }
 0x751   :  { %1783 = vmatmul.mubr.msk.bf16.vlgmr.msra.gmra.mrb[36].mxu0 %vm315_vm2, %v1186_v61 }
 0x752   :  { %v1418_v63 = vmul.f32 1.442695, %v1417_v9  ;;  %1793 = vmatpush3.bf16.msra.mxu0 %v1313_v62  ;;  %1794 = vmatprep.mubr.msk.bf16.mxu0 %vm2001_vm0, %v2000_v0 }
 0x753   :  { %1804 = vmatprep.subr.bf16.mxu0 %v2000_v0  ;;  %v1427_v5 = vpop.permute.xlu1 %1426 }
 0x754   :  { %1864 = vpow2.f32 %v1418_v63  ;;  %v1432_v8 = vsel %vm381_vm4, %v1427_v5, 0 }
 0x756   :  { %v1863_v4 = vpop.eup %1862 }
 0x757   :  { %v1301_v6 = vsel %vm315_vm2, %v1863_v4, 0.0  ;;  %v1306_v7 = vpack.c.bf16 %v1863_v4, %v1863_v4 }
 0x758   :  { %1302 = vadd.xlane.f32.xlu1 %v1301_v6 }
 0x759   :  { %1795 = vmatmul.mubr.msk.bf16.vlgmr.msra.gmra.mrb[40].mxu0 %vm315_vm2, %v1306_v7 }
 0x75a   :  { %1805 = vmatpush3.bf16.msra.mxu0 %v1432_v8  ;;  %1806 = vmatprep.mubr.msk.bf16.mxu0 %vm2001_vm0, %v2000_v0 }
 0x75c   :  { %1065 = vadd.xlane.f32.xlu1 %v1064_v11 }
 0x75e   :  { %v1865_v12 = vpop.eup %1864 }
 0x75f   :  { %v1420_v13 = vsel %vm315_vm2, %v1865_v12, 0.0  ;;  %v1425_v14 = vpack.c.bf16 %v1865_v12, %v1865_v12 }
 0x760   :  { %1421 = vadd.xlane.f32.xlu0 %v1420_v13 }
 0x761   :  { %1807 = vmatmul.mubr.msk.bf16.vlgmr.msra.gmra.mrb[44].mxu0 %vm315_vm2, %v1425_v14 }
 0x764   :  { %869 = vmax.xlane.f32.xlu0 %v868_v49 }
 0x7b1   :  { %v1114_v15 = vpop.f32.mrb[32].mxu0 }
 0x7b2   :  { %v1772_v16 = vpop.f32.mrb[33].mxu0 }
 0x7b3   :  { %v1117_v17 = vpop.f32.mrb[34].mxu0 }
 0x7b4   :  { %v1773_v18 = vpop.f32.mrb[35].mxu0 }
 0x7dd   :  { %v1183_v22 = vpop.xlane.xlu0 %1182 }
 0x7e5   :  { %v1303_v21 = vpop.xlane.xlu1 %1302 }
 0x7e9   :  { %v1066_v20 = vpop.xlane.xlu1 %1065 }
 0x7ea   :  { %1866 = vrcp.f32 %v1066_v20 }
 0x7eb   :  { %1868 = vrcp.f32 %v1183_v22 }
 0x7ec   :  { %1870 = vrcp.f32 %v1303_v21 }
 0x7ed   :  { %v1422_v23 = vpop.xlane.xlu0 %1421 }
 0x7ee   :  { %1872 = vrcp.f32 %v1422_v23 }
 0x7f1   :  { %v870_v27 = vpop.xlane.xlu0 %869 }
 0x7f2   :  { %vm871_vm12 = vcmp.eq.f32.partialorder %v870_v27, 0.0 }
 0x7f3   :  { %v1580_v28 = vsel %vm871_vm12, 1.0, %v2000_v0 }
 0x7f4   :  { %v1867_v29 = vpop.eup %1866  ;;  %v1071_v26 = vrot.slane %v1580_v28, %v2194_v40 }
 0x7f5   :  { %v1869_v32 = vpop.eup %1868 }
 0x7f6   :  { %v1072_v30 = vmul.f32 %v1867_v29, %v1071_v26  ;;  %v1185_v33 = vmul.f32 %v1869_v32, %v1071_v26  ;;  %v1871_v0 = vpop.eup %1870 }
 0x7f7   :  { %v1305_v40 = vmul.f32 %v1871_v0, %v1071_v26 }
 0x7f8   :  { %v1120_v31 = vmul.f32 %v1114_v15, %v1072_v30  ;;  %v1873_v46 = vpop.eup %1872 }
 0x7f9   :  { %v1424_v1 = vmul.f32 %v1873_v46, %v1071_v26 }
 0x7fa   :  { %v1121_v19 = vpack.c.bf16 %v1120_v31, %v1120_v31 }
 0x7fc   :  { %1122 = vst.msk [vmem:[#allocation2] sm:$0xf] %vm427_vm7, %v1121_v19 }
 0x824   :  { %v1230_v34 = vpop.f32.mrb[36].mxu0 }
 0x825   :  { %v1236_v35 = vmul.f32 %v1230_v34, %v1185_v33  ;;  %v1784_v36 = vpop.f32.mrb[37].mxu0 }
 0x826   :  { %v1233_v37 = vpop.f32.mrb[38].mxu0 }
 0x827   :  { %v1599_v38 = vpack.c.bf16 %v1236_v35, %v1236_v35  ;;  %v1785_v39 = vpop.f32.mrb[39].mxu0 }
 0x829   :  { %1241 = vrot.lane.b32.xlu0 %v1599_v38, %s1995_s10 }
 0x82c   :  { %v1349_v42 = vpop.f32.mrb[40].mxu0 }
 0x82d   :  { %v1355_v43 = vmul.f32 %v1349_v42, %v1305_v40  ;;  %v1796_v24 = vpop.f32.mrb[41].mxu0 }
 0x82e   :  { %v1352_v25 = vpop.f32.mrb[42].mxu0 }
 0x82f   :  { %v1600_v44 = vpack.c.bf16 %v1355_v43, %v1355_v43  ;;  %v1797_v45 = vpop.f32.mrb[43].mxu0 }
 0x831   :  { %1360 = vrot.lane.b32.xlu1 %v1600_v44, %s2005_s0 }
 0x834   :  { %v1468_v47 = vpop.f32.mrb[44].mxu0 }
 0x835   :  { %v1474_v41 = vmul.f32 %v1468_v47, %v1424_v1  ;;  %v1808_v48 = vpop.f32.mrb[45].mxu0 }
 0x836   :  { %v1471_v3 = vpop.f32.mrb[46].mxu0 }
 0x837   :  { %v1601_v50 = vpack.c.bf16 %v1474_v41, %v1474_v41  ;;  %v1809_v51 = vpop.f32.mrb[47].mxu0 }
 0x839   :  { %1479 = vrot.lane.b32.xlu1 %v1601_v50, %s2006_s24 }
 0x89b   :  { %v1242_v52 = vpop.permute.xlu0 %1241 }
 0x89c   :  { %1244 = vst.msk [vmem:[#allocation2] sm:$0xf] %vm550_vm8, %v1242_v52 }
 0x8a3   :  { %v1361_v53 = vpop.permute.xlu1 %1360 }
 0x8a4   :  { %1363 = vst.msk [vmem:[#allocation2] sm:$0xf] %vm670_vm9, %v1361_v53 }
 0x8ab   :  { %v1480_v54 = vpop.permute.xlu1 %1479 }
 0x8ac   :  { %1482 = vst.msk [vmem:[#allocation2] sm:$0xf] %vm790_vm10, %v1480_v54 }
 0x8b3   :  { %v1483_v55 = vld [vmem:[#allocation2] sm:$0xf] }
 0x8b4   :  { %1815 = vmatmul.mubr.msk.bf16.vlgmr.msra.gmra.mrb[44].mxu1 %vm140_vm1, %v1483_v55 }
 0x987   :  { %v1521_v56 = vpop.f32.mrb[44].mxu1 }
 0x988   :  { %v1522_v57 = vadd.f32 %v2288_v10, %v1521_v56  ;;  %v1816_v58 = vpop.f32.mrb[45].mxu1 }
 0x989   :  { %v1524_v59 = vpop.f32.mrb[46].mxu1 }
 0x98a   :  { %1528 = vst.msk [vmem:[#allocation11 + $0x8] sm:$0xff] %vm140_vm1, %v1522_v57  ;;  %v1817_v2 = vpop.f32.mrb[47].mxu1 }
 0x98b   :  { %1973 = shalt.err (!%p1970_p8)
}
 0x98c   :  { %s1974_s19 = scalar_lea.hbm %s2397_s6, 256 }
 0x98d   :  { %p1975_p9 = scmp.ne.s32.totalorder %s2397_s6, %s1974_s19  ;;  %p1978_p10 = scmp.lt.u32.totalorder %s1974_s19, %s2397_s6 }
 0x98f   :  { %p1980_p11 = pnand %p1978_p10, %p1975_p9 }
 0x991   :  { %1983 = shalt.err (!%p1980_p11)
}
 0x992   :  { %1540 = dma.vmem_to_hbm [thread:$0]  %s1535_s15, 256, %s2397_s6, [#allocation5], %s1994_s9, %s1994_s9, %s1995_s10  }
 0x993   :  { %1990 = dma.done.wait [#allocation5], 256  }
 0x994   :  { %1991 = vsyncadd [#allocation5], 4294967040 }
 0x995   :  { %1544 = vsyncpa [#allocation4], 1 }
 0x996   :  { %1545 = vsyncpa [#allocation7], 1 }
 0x997   :  { %1546 = vsyncpa [#allocation10], 1 }
 0x998   :  { %1547 = vsyncpa [#allocation5], 1 }

</bundles_post_ra>
